<compile_context>
chip_gen: v6e
topology: v6e:2x2x1
jax: 0.10.0
libtpu: 0.0.40
codegen_flags: <defaults>
</compile_context>

<pallas_src>
import functools

import jax
import jax.numpy as jnp
from jax import lax
from jax.experimental import pallas as pl
from jax.experimental.pallas import tpu as pltpu

BETA = 0.9          # snn.Leaky default decay
THRESHOLD = 1.0     # snn.Leaky default threshold
LN_EPS = 1e-5       # nn.LayerNorm default eps


# ----------------------------------------------------------------------------
# Fused whole-layer kernel.
# Refs:
#   x_ref      (T*SP, E)  time-major flattened input, row r = t*SP + s (s padded to SP)
#   wqkv_ref   (E, 3E)    concat([wq, wk, wv], axis=1)
#   wo_ref     (E, E) ; wff1_ref (E, 4E) ; wff2_ref (4E, E)
#   g1/b1/g2/b2_ref (T,)  LayerNorm affine params in SMEM (scalar per time step)
#   o_ref      (SP, T*E)  lane-dense output slab, column = t*E + e
#   s_*        VMEM scratch for LIF spike tensors / post-LN1 activations
# ----------------------------------------------------------------------------
def _layer_kernel(x_ref, wqkv_ref, wo_ref, wff1_ref, wff2_ref,
                  g1_ref, b1_ref, g2_ref, b2_ref,
                  o_ref,
                  s_qkv, s_o, s_x1, s_f1, s_f2,
                  *, T, SP, E, H):
    D = E // H
    ROWS = T * SP

    def row(t):
        # SP == 8 -> every time slice is a whole, aligned sublane group.
        return slice(t * SP, (t + 1) * SP)

    # ---- LIF recurrence (snn.Leaky: reset from previous mem, subtract, fire post-update) ----
    # Spikes go straight into a VMEM scratch ref: bounded live ranges, no concatenates.
    # TODO(synk): for large T, switch to lax.fori_loop with syn staged in scratch.
    def lif_scan(syn2d, spk_ref, width):
        mem = jnp.zeros((SP, width), jnp.float32)
        for t in range(T):
            syn_t = syn2d[row(t), :]
            reset = (mem > THRESHOLD).astype(jnp.float32)      # previous-step membrane
            mem = BETA * mem + syn_t - reset * THRESHOLD       # reset-by-subtraction
            spk_ref[row(t), :] = (mem > THRESHOLD).astype(jnp.float32)

    # ---- LayerNorm along the module's last (== time) axis; gamma/beta are SMEM scalars ----
    def layernorm_time(z_list, g_ref, b_ref):
        mean = z_list[0]
        for z in z_list[1:]:
            mean = mean + z
        mean = mean * (1.0 / T)
        devs = [z - mean for z in z_list]
        var = devs[0] * devs[0]
        for dv in devs[1:]:
            var = var + dv * dv
        var = var * (1.0 / T)                                   # biased variance (torch)
        inv = lax.rsqrt(var + LN_EPS)
        return [devs[t] * inv * g_ref[t] + b_ref[t] for t in range(T)]

    x2d = x_ref[...]                                            # (T*SP, E)

    # ---------- fused Q/K/V projection: ONE matmul, then a pure-VPU LIF scan ----------
    syn_qkv = jnp.dot(x2d, wqkv_ref[...], preferred_element_type=jnp.float32)   # (T*SP, 3E)
    lif_scan(syn_qkv, s_qkv, 3 * E)

    # ---------- per-head phase shift: one whole-tensor row roll per head ----------
    spk = s_qkv[...]                                            # (T*SP, 3E)

    def roll_rows(xv, shift_rows):
        # torch.roll(+shift) along time: rolled[r] = x[(r - shift) % ROWS];
        # shift is a multiple of SP, so this is two aligned sublane-group slabs.
        if shift_rows == 0:
            return xv
        return jnp.concatenate([xv[ROWS - shift_rows:, :], xv[:ROWS - shift_rows, :]], axis=0)

    Q3, K3, V3 = [], [], []
    for h in range(H):
        shift_rows = ((h * (T // H)) % T) * SP
        r = roll_rows(spk, shift_rows)
        # Leading-dim splits are free (layout-preserving).
        Q3.append(r[:, h * D:(h + 1) * D].reshape(T, SP, D))
        K3.append(r[:, E + h * D:E + (h + 1) * D].reshape(T, SP, D))
        V3.append(r[:, 2 * E + h * D:2 * E + (h + 1) * D].reshape(T, SP, D))

    # ---------- coincidence detection + softmax over the key-head axis ----------
    # scores[i, a, b] = sum_{t,d} q_rolled[i, a, d, t] * k_rolled[a, b, d, t]
    # For each a, all b are batched into one wide product; the t-sum is a leading-axis
    # (vreg-wise VPU) reduce, and the D-wide sums are 2-term slice adds (no XLU reduces).
    Wsm = []                                                    # Wsm[a][i, b]
    for a in range(H):
        qa = Q3[a]                                              # (T, SP, D)
        qa_wide = jnp.concatenate([qa] * H, axis=-1)            # (T, SP, H*D)
        ka_wide = jnp.concatenate(
            [K3[b][:, a:a + 1, :] for b in range(H)], axis=-1)  # (T, 1, H*D)
        red = jnp.sum(qa_wide * ka_wide, axis=0)                # (SP, H*D)
        cols = []
        for b in range(H):
            c = red[:, b * D:b * D + 1]
            for d in range(1, D):
                c = c + red[:, b * D + d:b * D + d + 1]
            cols.append(c)
        sc = jnp.concatenate(cols, axis=-1)                     # (SP, H)
        sc = sc - jnp.max(sc, axis=-1, keepdims=True)
        ex = jnp.exp(sc)
        denom = jnp.sum(ex, axis=-1, keepdims=True)
        Wsm.append(ex * pl.reciprocal(denom, approx=True))      # EUP reciprocal

    # ---------- apply attention weights: out[s,n,d,t] = sum_b W[s,n,b] * v_rolled[s,b,d,t] ----------
    heads = []
    for n in range(H):
        w = Wsm[n]                                              # (SP, H)
        acc = w[:, 0:1] * V3[0]                                 # (SP,1) * (T,SP,D)
        for b in range(1, H):
            acc = acc + w[:, b:b + 1] * V3[b]
        heads.append(acc)                                       # (T, SP, D)
    att2d = jnp.concatenate(heads, axis=-1).reshape(ROWS, E)    # lane concat + free merge

    # ---------- output projection (1 matmul) + LIF ----------
    syn_o = jnp.dot(att2d, wo_ref[...], preferred_element_type=jnp.float32)
    lif_scan(syn_o, s_o, E)

    # ---------- residual + LayerNorm1 (over the time axis) ----------
    z1 = [x_ref[row(t), :] + s_o[row(t), :] for t in range(T)]
    x1 = layernorm_time(z1, g1_ref, b1_ref)
    for t in range(T):
        s_x1[row(t), :] = x1[t]

    # ---------- feed-forward: two spiking linears (1 matmul + VPU scan each) ----------
    syn_f1 = jnp.dot(s_x1[...], wff1_ref[...], preferred_element_type=jnp.float32)  # (T*SP, 4E)
    lif_scan(syn_f1, s_f1, 4 * E)
    syn_f2 = jnp.dot(s_f1[...], wff2_ref[...], preferred_element_type=jnp.float32)  # (T*SP, E)
    lif_scan(syn_f2, s_f2, E)

    # ---------- residual + LayerNorm2, single lane-dense store ----------
    z2 = [s_x1[row(t), :] + s_f2[row(t), :] for t in range(T)]
    y = layernorm_time(z2, g2_ref, b2_ref)
    o_ref[...] = jnp.concatenate(y, axis=-1)                    # (SP, T*E), one store


# ----------------------------------------------------------------------------
# Wrapper: pad + one layout change in, one pallas_call, one layout change out.
# ----------------------------------------------------------------------------
def spiking_transformer_layer(x, params, *, num_heads):
    s_len, e_dim, t_steps = x.shape
    assert s_len == num_heads, "reference module requires seq_len == num_heads"
    assert t_steps == e_dim, "reference module requires time_steps == embedding_dim"
    assert e_dim % num_heads == 0
    f32 = jnp.float32

    sp = ((s_len + 7) // 8) * 8            # pad seq rows to a full sublane group
    rows = t_steps * sp

    # (S, E, T) -> zero-pad seq -> time-major flattened (T*SP, E).
    xp = jnp.zeros((sp, e_dim, t_steps), f32).at[:s_len].set(x.astype(f32))
    x2d = jnp.transpose(xp, (2, 0, 1)).reshape(rows, e_dim)

    # Fuse the three projection weights into one matmul operand.
    wqkv = jnp.concatenate([params["wq"], params["wk"], params["wv"]], axis=1).astype(f32)

    operands = (
        x2d,
        wqkv,
        params["wo"].astype(f32),
        params["wff1"].astype(f32),
        params["wff2"].astype(f32),
        params["ln1_g"].astype(f32), params["ln1_b"].astype(f32),
        params["ln2_g"].astype(f32), params["ln2_b"].astype(f32),
    )

    def vmem_spec(shape):
        nd = len(shape)
        return pl.BlockSpec(shape, lambda i, _nd=nd: (0,) * _nd)

    smem_spec = pl.BlockSpec(memory_space=pltpu.MemorySpace.SMEM)

    kernel = functools.partial(_layer_kernel, T=t_steps, SP=sp, E=e_dim, H=num_heads)
    out_slab = pl.pallas_call(
        kernel,
        out_shape=jax.ShapeDtypeStruct((sp, t_steps * e_dim), f32),
        grid=(1,),
        in_specs=[
            vmem_spec(x2d.shape),
            vmem_spec(wqkv.shape),
            vmem_spec((e_dim, e_dim)),
            vmem_spec((e_dim, 4 * e_dim)),
            vmem_spec((4 * e_dim, e_dim)),
            smem_spec, smem_spec, smem_spec, smem_spec,
        ],
        out_specs=vmem_spec((sp, t_steps * e_dim)),
        scratch_shapes=[
            pltpu.VMEM((rows, 3 * e_dim), f32),   # QKV spikes
            pltpu.VMEM((rows, e_dim), f32),       # out-projection spikes
            pltpu.VMEM((rows, e_dim), f32),       # post-LN1 activations
            pltpu.VMEM((rows, 4 * e_dim), f32),   # FF hidden spikes
            pltpu.VMEM((rows, e_dim), f32),       # FF output spikes
        ],
        compiler_params=pltpu.CompilerParams(dimension_semantics=("arbitrary",)),
    )(*operands)

    # (SP, T*E) lane-dense slab -> (S, E, T); the only exit-side relayout.
    out = out_slab.reshape(sp, t_steps, e_dim)[:s_len]
    return jnp.transpose(out, (0, 2, 1))


def init_params(key, embedding_dim):
    hidden = embedding_dim * 4
    ks = jax.random.split(key, 6)

    def lin(k, f_in, f_out):
        # deterministic init; scaled so the LIF neurons actually fire some spikes
        bound = 3.0 / (f_in ** 0.5)
        return jax.random.uniform(k, (f_in, f_out), jnp.float32, -bound, bound)

    return {
        "wq": lin(ks[0], embedding_dim, embedding_dim),
        "wk": lin(ks[1], embedding_dim, embedding_dim),
        "wv": lin(ks[2], embedding_dim, embedding_dim),
        "wo": lin(ks[3], embedding_dim, embedding_dim),
        "wff1": lin(ks[4], embedding_dim, hidden),
        "wff2": lin(ks[5], hidden, embedding_dim),
        # nn.LayerNorm defaults: weight=1, bias=0
        "ln1_g": jnp.ones((embedding_dim,), jnp.float32),
        "ln1_b": jnp.zeros((embedding_dim,), jnp.float32),
        "ln2_g": jnp.ones((embedding_dim,), jnp.float32),
        "ln2_b": jnp.zeros((embedding_dim,), jnp.float32),
    }


if __name__ == "__main__":
    NUM_HEADS = 4
    SEQ_LEN = 4          # must equal NUM_HEADS (see note at top)
    EMBED = 8
    TIME = 8             # must equal EMBED (LayerNorm over last == time axis)

    key = jax.random.PRNGKey(0)
    kx, kp = jax.random.split(key)
    x = jax.random.normal(kx, (SEQ_LEN, EMBED, TIME), jnp.float32)
    params = init_params(kp, EMBED)

    fwd = jax.jit(functools.partial(spiking_transformer_layer, num_heads=NUM_HEADS))
    out = fwd(x, params)
    out = jax.block_until_ready(out)

    assert out.shape == (SEQ_LEN, EMBED, TIME)
    assert bool(jnp.all(jnp.isfinite(out)))
    print("KERNEL_OK")
</pallas_src>

<mosaic_0001>
module attributes {stable_mosaic.version = 11 : i64} {
  func.func @_layer_kernel(%arg0: i32, %arg1: memref<64x8xf32, #tpu.memory_space<vmem>>, %arg2: memref<8x24xf32, #tpu.memory_space<vmem>>, %arg3: memref<8x8xf32, #tpu.memory_space<vmem>>, %arg4: memref<8x32xf32, #tpu.memory_space<vmem>>, %arg5: memref<32x8xf32, #tpu.memory_space<vmem>>, %arg6: memref<8xf32, #tpu.memory_space<smem>>, %arg7: memref<8xf32, #tpu.memory_space<smem>>, %arg8: memref<8xf32, #tpu.memory_space<smem>>, %arg9: memref<8xf32, #tpu.memory_space<smem>>, %arg10: memref<8x64xf32, #tpu.memory_space<vmem>>, %arg11: memref<64x24xf32, #tpu.memory_space<vmem>>, %arg12: memref<64x8xf32, #tpu.memory_space<vmem>>, %arg13: memref<64x8xf32, #tpu.memory_space<vmem>>, %arg14: memref<64x32xf32, #tpu.memory_space<vmem>>, %arg15: memref<64x8xf32, #tpu.memory_space<vmem>>) attributes {dimension_semantics = [#tpu.dimension_semantics<arbitrary>], iteration_bounds = array<i64: 1>, scalar_prefetch = 0 : i64, scratch_operands = 5 : i64, tpu.core_type = #tpu.core_type<tc>, window_params = [{pipeline_mode = #tpu.pipeline_mode<synchronous>, transform_indices = @transform_0, window_bounds = array<i64: 64, 8>}, {pipeline_mode = #tpu.pipeline_mode<synchronous>, transform_indices = @transform_1, window_bounds = array<i64: 8, 24>}, {pipeline_mode = #tpu.pipeline_mode<synchronous>, transform_indices = @transform_2, window_bounds = array<i64: 8, 8>}, {pipeline_mode = #tpu.pipeline_mode<synchronous>, transform_indices = @transform_3, window_bounds = array<i64: 8, 32>}, {pipeline_mode = #tpu.pipeline_mode<synchronous>, transform_indices = @transform_4, window_bounds = array<i64: 32, 8>}, {transform_indices = @transform_5, window_bounds = array<i64: 8>}, {transform_indices = @transform_6, window_bounds = array<i64: 8>}, {transform_indices = @transform_7, window_bounds = array<i64: 8>}, {transform_indices = @transform_8, window_bounds = array<i64: 8>}, {pipeline_mode = #tpu.pipeline_mode<synchronous>, transform_indices = @transform_9, window_bounds = array<i64: 8, 64>}]} {
    %c0 = arith.constant 0 : index
    %c0_0 = arith.constant 0 : index
    %0 = vector.load %arg1[%c0, %c0_0] : memref<64x8xf32, #tpu.memory_space<vmem>>, vector<64x8xf32>
    %c0_1 = arith.constant 0 : index
    %c0_2 = arith.constant 0 : index
    %1 = vector.load %arg2[%c0_1, %c0_2] : memref<8x24xf32, #tpu.memory_space<vmem>>, vector<8x24xf32>
    %cst = arith.constant dense<0.000000e+00> : vector<64x24xf32>
    %2 = tpu.matmul %0, %1, %cst {dimension_numbers = #tpu.dot_dimension_numbers<[1], [0], [0], [1], [0, 0, 1, 1], [], []>} : vector<64x8xf32>, vector<8x24xf32>, vector<64x24xf32> -> vector<64x24xf32>
    %cst_3 = arith.constant 0.000000e+00 : f32
    %3 = vector.broadcast %cst_3 : f32 to vector<8x24xf32>
    %4 = vector.extract_strided_slice %2 {offsets = [0, 0], sizes = [8, 24], strides = [1, 1]} : vector<64x24xf32> to vector<8x24xf32>
    %cst_4 = arith.constant 1.000000e+00 : f32
    %5 = vector.broadcast %cst_4 : f32 to vector<8x24xf32>
    %6 = arith.cmpf ogt, %3, %5 : vector<8x24xf32>
    %7 = arith.extui %6 : vector<8x24xi1> to vector<8x24xi32>
    %8 = arith.sitofp %7 : vector<8x24xi32> to vector<8x24xf32>
    %cst_5 = arith.constant 0.899999976 : f32
    %9 = vector.broadcast %cst_5 : f32 to vector<8x24xf32>
    %10 = arith.mulf %9, %3 : vector<8x24xf32>
    %11 = arith.addf %10, %4 : vector<8x24xf32>
    %cst_6 = arith.constant 1.000000e+00 : f32
    %12 = vector.broadcast %cst_6 : f32 to vector<8x24xf32>
    %13 = arith.mulf %8, %12 : vector<8x24xf32>
    %14 = arith.subf %11, %13 : vector<8x24xf32>
    %cst_7 = arith.constant 1.000000e+00 : f32
    %15 = vector.broadcast %cst_7 : f32 to vector<8x24xf32>
    %16 = arith.cmpf ogt, %14, %15 : vector<8x24xf32>
    %17 = arith.extui %16 : vector<8x24xi1> to vector<8x24xi32>
    %18 = arith.sitofp %17 : vector<8x24xi32> to vector<8x24xf32>
    %c0_8 = arith.constant 0 : index
    %c0_9 = arith.constant 0 : index
    %19 = vector.load %arg11[%c0_8, %c0_9] : memref<64x24xf32, #tpu.memory_space<vmem>>, vector<8x24xf32>
    tpu.vector_store %arg11[%c0_8, %c0_9], %18 {strides = array<i32>} : memref<64x24xf32, #tpu.memory_space<vmem>>, vector<8x24xf32>,
    %20 = vector.extract_strided_slice %2 {offsets = [8, 0], sizes = [8, 24], strides = [1, 1]} : vector<64x24xf32> to vector<8x24xf32>
    %cst_10 = arith.constant 1.000000e+00 : f32
    %21 = vector.broadcast %cst_10 : f32 to vector<8x24xf32>
    %22 = arith.cmpf ogt, %14, %21 : vector<8x24xf32>
    %23 = arith.extui %22 : vector<8x24xi1> to vector<8x24xi32>
    %24 = arith.sitofp %23 : vector<8x24xi32> to vector<8x24xf32>
    %cst_11 = arith.constant 0.899999976 : f32
    %25 = vector.broadcast %cst_11 : f32 to vector<8x24xf32>
    %26 = arith.mulf %25, %14 : vector<8x24xf32>
    %27 = arith.addf %26, %20 : vector<8x24xf32>
    %cst_12 = arith.constant 1.000000e+00 : f32
    %28 = vector.broadcast %cst_12 : f32 to vector<8x24xf32>
    %29 = arith.mulf %24, %28 : vector<8x24xf32>
    %30 = arith.subf %27, %29 : vector<8x24xf32>
    %cst_13 = arith.constant 1.000000e+00 : f32
    %31 = vector.broadcast %cst_13 : f32 to vector<8x24xf32>
    %32 = arith.cmpf ogt, %30, %31 : vector<8x24xf32>
    %33 = arith.extui %32 : vector<8x24xi1> to vector<8x24xi32>
    %34 = arith.sitofp %33 : vector<8x24xi32> to vector<8x24xf32>
    %c8 = arith.constant 8 : index
    %c0_14 = arith.constant 0 : index
    %35 = vector.load %arg11[%c8, %c0_14] : memref<64x24xf32, #tpu.memory_space<vmem>>, vector<8x24xf32>
    tpu.vector_store %arg11[%c8, %c0_14], %34 {strides = array<i32>} : memref<64x24xf32, #tpu.memory_space<vmem>>, vector<8x24xf32>,
    %36 = vector.extract_strided_slice %2 {offsets = [16, 0], sizes = [8, 24], strides = [1, 1]} : vector<64x24xf32> to vector<8x24xf32>
    %cst_15 = arith.constant 1.000000e+00 : f32
    %37 = vector.broadcast %cst_15 : f32 to vector<8x24xf32>
    %38 = arith.cmpf ogt, %30, %37 : vector<8x24xf32>
    %39 = arith.extui %38 : vector<8x24xi1> to vector<8x24xi32>
    %40 = arith.sitofp %39 : vector<8x24xi32> to vector<8x24xf32>
    %cst_16 = arith.constant 0.899999976 : f32
    %41 = vector.broadcast %cst_16 : f32 to vector<8x24xf32>
    %42 = arith.mulf %41, %30 : vector<8x24xf32>
    %43 = arith.addf %42, %36 : vector<8x24xf32>
    %cst_17 = arith.constant 1.000000e+00 : f32
    %44 = vector.broadcast %cst_17 : f32 to vector<8x24xf32>
    %45 = arith.mulf %40, %44 : vector<8x24xf32>
    %46 = arith.subf %43, %45 : vector<8x24xf32>
    %cst_18 = arith.constant 1.000000e+00 : f32
    %47 = vector.broadcast %cst_18 : f32 to vector<8x24xf32>
    %48 = arith.cmpf ogt, %46, %47 : vector<8x24xf32>
    %49 = arith.extui %48 : vector<8x24xi1> to vector<8x24xi32>
    %50 = arith.sitofp %49 : vector<8x24xi32> to vector<8x24xf32>
    %c16 = arith.constant 16 : index
    %c0_19 = arith.constant 0 : index
    %51 = vector.load %arg11[%c16, %c0_19] : memref<64x24xf32, #tpu.memory_space<vmem>>, vector<8x24xf32>
    tpu.vector_store %arg11[%c16, %c0_19], %50 {strides = array<i32>} : memref<64x24xf32, #tpu.memory_space<vmem>>, vector<8x24xf32>,
    %52 = vector.extract_strided_slice %2 {offsets = [24, 0], sizes = [8, 24], strides = [1, 1]} : vector<64x24xf32> to vector<8x24xf32>
    %cst_20 = arith.constant 1.000000e+00 : f32
    %53 = vector.broadcast %cst_20 : f32 to vector<8x24xf32>
    %54 = arith.cmpf ogt, %46, %53 : vector<8x24xf32>
    %55 = arith.extui %54 : vector<8x24xi1> to vector<8x24xi32>
    %56 = arith.sitofp %55 : vector<8x24xi32> to vector<8x24xf32>
    %cst_21 = arith.constant 0.899999976 : f32
    %57 = vector.broadcast %cst_21 : f32 to vector<8x24xf32>
    %58 = arith.mulf %57, %46 : vector<8x24xf32>
    %59 = arith.addf %58, %52 : vector<8x24xf32>
    %cst_22 = arith.constant 1.000000e+00 : f32
    %60 = vector.broadcast %cst_22 : f32 to vector<8x24xf32>
    %61 = arith.mulf %56, %60 : vector<8x24xf32>
    %62 = arith.subf %59, %61 : vector<8x24xf32>
    %cst_23 = arith.constant 1.000000e+00 : f32
    %63 = vector.broadcast %cst_23 : f32 to vector<8x24xf32>
    %64 = arith.cmpf ogt, %62, %63 : vector<8x24xf32>
    %65 = arith.extui %64 : vector<8x24xi1> to vector<8x24xi32>
    %66 = arith.sitofp %65 : vector<8x24xi32> to vector<8x24xf32>
    %c24 = arith.constant 24 : index
    %c0_24 = arith.constant 0 : index
    %67 = vector.load %arg11[%c24, %c0_24] : memref<64x24xf32, #tpu.memory_space<vmem>>, vector<8x24xf32>
    tpu.vector_store %arg11[%c24, %c0_24], %66 {strides = array<i32>} : memref<64x24xf32, #tpu.memory_space<vmem>>, vector<8x24xf32>,
    %68 = vector.extract_strided_slice %2 {offsets = [32, 0], sizes = [8, 24], strides = [1, 1]} : vector<64x24xf32> to vector<8x24xf32>
    %cst_25 = arith.constant 1.000000e+00 : f32
    %69 = vector.broadcast %cst_25 : f32 to vector<8x24xf32>
    %70 = arith.cmpf ogt, %62, %69 : vector<8x24xf32>
    %71 = arith.extui %70 : vector<8x24xi1> to vector<8x24xi32>
    %72 = arith.sitofp %71 : vector<8x24xi32> to vector<8x24xf32>
    %cst_26 = arith.constant 0.899999976 : f32
    %73 = vector.broadcast %cst_26 : f32 to vector<8x24xf32>
    %74 = arith.mulf %73, %62 : vector<8x24xf32>
    %75 = arith.addf %74, %68 : vector<8x24xf32>
    %cst_27 = arith.constant 1.000000e+00 : f32
    %76 = vector.broadcast %cst_27 : f32 to vector<8x24xf32>
    %77 = arith.mulf %72, %76 : vector<8x24xf32>
    %78 = arith.subf %75, %77 : vector<8x24xf32>
    %cst_28 = arith.constant 1.000000e+00 : f32
    %79 = vector.broadcast %cst_28 : f32 to vector<8x24xf32>
    %80 = arith.cmpf ogt, %78, %79 : vector<8x24xf32>
    %81 = arith.extui %80 : vector<8x24xi1> to vector<8x24xi32>
    %82 = arith.sitofp %81 : vector<8x24xi32> to vector<8x24xf32>
    %c32 = arith.constant 32 : index
    %c0_29 = arith.constant 0 : index
    %83 = vector.load %arg11[%c32, %c0_29] : memref<64x24xf32, #tpu.memory_space<vmem>>, vector<8x24xf32>
    tpu.vector_store %arg11[%c32, %c0_29], %82 {strides = array<i32>} : memref<64x24xf32, #tpu.memory_space<vmem>>, vector<8x24xf32>,
    %84 = vector.extract_strided_slice %2 {offsets = [40, 0], sizes = [8, 24], strides = [1, 1]} : vector<64x24xf32> to vector<8x24xf32>
    %cst_30 = arith.constant 1.000000e+00 : f32
    %85 = vector.broadcast %cst_30 : f32 to vector<8x24xf32>
    %86 = arith.cmpf ogt, %78, %85 : vector<8x24xf32>
    %87 = arith.extui %86 : vector<8x24xi1> to vector<8x24xi32>
    %88 = arith.sitofp %87 : vector<8x24xi32> to vector<8x24xf32>
    %cst_31 = arith.constant 0.899999976 : f32
    %89 = vector.broadcast %cst_31 : f32 to vector<8x24xf32>
    %90 = arith.mulf %89, %78 : vector<8x24xf32>
    %91 = arith.addf %90, %84 : vector<8x24xf32>
    %cst_32 = arith.constant 1.000000e+00 : f32
    %92 = vector.broadcast %cst_32 : f32 to vector<8x24xf32>
    %93 = arith.mulf %88, %92 : vector<8x24xf32>
    %94 = arith.subf %91, %93 : vector<8x24xf32>
    %cst_33 = arith.constant 1.000000e+00 : f32
    %95 = vector.broadcast %cst_33 : f32 to vector<8x24xf32>
    %96 = arith.cmpf ogt, %94, %95 : vector<8x24xf32>
    %97 = arith.extui %96 : vector<8x24xi1> to vector<8x24xi32>
    %98 = arith.sitofp %97 : vector<8x24xi32> to vector<8x24xf32>
    %c40 = arith.constant 40 : index
    %c0_34 = arith.constant 0 : index
    %99 = vector.load %arg11[%c40, %c0_34] : memref<64x24xf32, #tpu.memory_space<vmem>>, vector<8x24xf32>
    tpu.vector_store %arg11[%c40, %c0_34], %98 {strides = array<i32>} : memref<64x24xf32, #tpu.memory_space<vmem>>, vector<8x24xf32>,
    %100 = vector.extract_strided_slice %2 {offsets = [48, 0], sizes = [8, 24], strides = [1, 1]} : vector<64x24xf32> to vector<8x24xf32>
    %cst_35 = arith.constant 1.000000e+00 : f32
    %101 = vector.broadcast %cst_35 : f32 to vector<8x24xf32>
    %102 = arith.cmpf ogt, %94, %101 : vector<8x24xf32>
    %103 = arith.extui %102 : vector<8x24xi1> to vector<8x24xi32>
    %104 = arith.sitofp %103 : vector<8x24xi32> to vector<8x24xf32>
    %cst_36 = arith.constant 0.899999976 : f32
    %105 = vector.broadcast %cst_36 : f32 to vector<8x24xf32>
    %106 = arith.mulf %105, %94 : vector<8x24xf32>
    %107 = arith.addf %106, %100 : vector<8x24xf32>
    %cst_37 = arith.constant 1.000000e+00 : f32
    %108 = vector.broadcast %cst_37 : f32 to vector<8x24xf32>
    %109 = arith.mulf %104, %108 : vector<8x24xf32>
    %110 = arith.subf %107, %109 : vector<8x24xf32>
    %cst_38 = arith.constant 1.000000e+00 : f32
    %111 = vector.broadcast %cst_38 : f32 to vector<8x24xf32>
    %112 = arith.cmpf ogt, %110, %111 : vector<8x24xf32>
    %113 = arith.extui %112 : vector<8x24xi1> to vector<8x24xi32>
    %114 = arith.sitofp %113 : vector<8x24xi32> to vector<8x24xf32>
    %c48 = arith.constant 48 : index
    %c0_39 = arith.constant 0 : index
    %115 = vector.load %arg11[%c48, %c0_39] : memref<64x24xf32, #tpu.memory_space<vmem>>, vector<8x24xf32>
    tpu.vector_store %arg11[%c48, %c0_39], %114 {strides = array<i32>} : memref<64x24xf32, #tpu.memory_space<vmem>>, vector<8x24xf32>,
    %116 = vector.extract_strided_slice %2 {offsets = [56, 0], sizes = [8, 24], strides = [1, 1]} : vector<64x24xf32> to vector<8x24xf32>
    %cst_40 = arith.constant 1.000000e+00 : f32
    %117 = vector.broadcast %cst_40 : f32 to vector<8x24xf32>
    %118 = arith.cmpf ogt, %110, %117 : vector<8x24xf32>
    %119 = arith.extui %118 : vector<8x24xi1> to vector<8x24xi32>
    %120 = arith.sitofp %119 : vector<8x24xi32> to vector<8x24xf32>
    %cst_41 = arith.constant 0.899999976 : f32
    %121 = vector.broadcast %cst_41 : f32 to vector<8x24xf32>
    %122 = arith.mulf %121, %110 : vector<8x24xf32>
    %123 = arith.addf %122, %116 : vector<8x24xf32>
    %cst_42 = arith.constant 1.000000e+00 : f32
    %124 = vector.broadcast %cst_42 : f32 to vector<8x24xf32>
    %125 = arith.mulf %120, %124 : vector<8x24xf32>
    %126 = arith.subf %123, %125 : vector<8x24xf32>
    %cst_43 = arith.constant 1.000000e+00 : f32
    %127 = vector.broadcast %cst_43 : f32 to vector<8x24xf32>
    %128 = arith.cmpf ogt, %126, %127 : vector<8x24xf32>
    %129 = arith.extui %128 : vector<8x24xi1> to vector<8x24xi32>
    %130 = arith.sitofp %129 : vector<8x24xi32> to vector<8x24xf32>
    %c56 = arith.constant 56 : index
    %c0_44 = arith.constant 0 : index
    %131 = vector.load %arg11[%c56, %c0_44] : memref<64x24xf32, #tpu.memory_space<vmem>>, vector<8x24xf32>
    tpu.vector_store %arg11[%c56, %c0_44], %130 {strides = array<i32>} : memref<64x24xf32, #tpu.memory_space<vmem>>, vector<8x24xf32>,
    %c0_45 = arith.constant 0 : index
    %c0_46 = arith.constant 0 : index
    %132 = vector.load %arg11[%c0_45, %c0_46] : memref<64x24xf32, #tpu.memory_space<vmem>>, vector<64x24xf32>
    %133 = vector.extract_strided_slice %132 {offsets = [0, 0], sizes = [64, 2], strides = [1, 1]} : vector<64x24xf32> to vector<64x2xf32>
    %134 = vector.shape_cast %133 : vector<64x2xf32> to vector<8x8x2xf32>
    %135 = vector.extract_strided_slice %132 {offsets = [0, 8], sizes = [64, 2], strides = [1, 1]} : vector<64x24xf32> to vector<64x2xf32>
    %136 = vector.shape_cast %135 : vector<64x2xf32> to vector<8x8x2xf32>
    %137 = vector.extract_strided_slice %132 {offsets = [0, 16], sizes = [64, 2], strides = [1, 1]} : vector<64x24xf32> to vector<64x2xf32>
    %138 = vector.shape_cast %137 : vector<64x2xf32> to vector<8x8x2xf32>
    %139 = vector.extract_strided_slice %132 {offsets = [48, 0], sizes = [16, 24], strides = [1, 1]} : vector<64x24xf32> to vector<16x24xf32>
    %140 = vector.extract_strided_slice %132 {offsets = [0, 0], sizes = [48, 24], strides = [1, 1]} : vector<64x24xf32> to vector<48x24xf32>
    %141 = tpu.concatenate %139, %140 in 0 : vector<16x24xf32>, vector<48x24xf32> -> vector<64x24xf32>
    %142 = vector.extract_strided_slice %141 {offsets = [0, 2], sizes = [64, 2], strides = [1, 1]} : vector<64x24xf32> to vector<64x2xf32>
    %143 = vector.shape_cast %142 : vector<64x2xf32> to vector<8x8x2xf32>
    %144 = vector.extract_strided_slice %141 {offsets = [0, 10], sizes = [64, 2], strides = [1, 1]} : vector<64x24xf32> to vector<64x2xf32>
    %145 = vector.shape_cast %144 : vector<64x2xf32> to vector<8x8x2xf32>
    %146 = vector.extract_strided_slice %141 {offsets = [0, 18], sizes = [64, 2], strides = [1, 1]} : vector<64x24xf32> to vector<64x2xf32>
    %147 = vector.shape_cast %146 : vector<64x2xf32> to vector<8x8x2xf32>
    %148 = vector.extract_strided_slice %132 {offsets = [32, 0], sizes = [32, 24], strides = [1, 1]} : vector<64x24xf32> to vector<32x24xf32>
    %149 = vector.extract_strided_slice %132 {offsets = [0, 0], sizes = [32, 24], strides = [1, 1]} : vector<64x24xf32> to vector<32x24xf32>
    %150 = tpu.concatenate %148, %149 in 0 : vector<32x24xf32>, vector<32x24xf32> -> vector<64x24xf32>
    %151 = vector.extract_strided_slice %150 {offsets = [0, 4], sizes = [64, 2], strides = [1, 1]} : vector<64x24xf32> to vector<64x2xf32>
    %152 = vector.shape_cast %151 : vector<64x2xf32> to vector<8x8x2xf32>
    %153 = vector.extract_strided_slice %150 {offsets = [0, 12], sizes = [64, 2], strides = [1, 1]} : vector<64x24xf32> to vector<64x2xf32>
    %154 = vector.shape_cast %153 : vector<64x2xf32> to vector<8x8x2xf32>
    %155 = vector.extract_strided_slice %150 {offsets = [0, 20], sizes = [64, 2], strides = [1, 1]} : vector<64x24xf32> to vector<64x2xf32>
    %156 = vector.shape_cast %155 : vector<64x2xf32> to vector<8x8x2xf32>
    %157 = vector.extract_strided_slice %132 {offsets = [16, 0], sizes = [48, 24], strides = [1, 1]} : vector<64x24xf32> to vector<48x24xf32>
    %158 = vector.extract_strided_slice %132 {offsets = [0, 0], sizes = [16, 24], strides = [1, 1]} : vector<64x24xf32> to vector<16x24xf32>
    %159 = tpu.concatenate %157, %158 in 0 : vector<48x24xf32>, vector<16x24xf32> -> vector<64x24xf32>
    %160 = vector.extract_strided_slice %159 {offsets = [0, 6], sizes = [64, 2], strides = [1, 1]} : vector<64x24xf32> to vector<64x2xf32>
    %161 = vector.shape_cast %160 : vector<64x2xf32> to vector<8x8x2xf32>
    %162 = vector.extract_strided_slice %159 {offsets = [0, 14], sizes = [64, 2], strides = [1, 1]} : vector<64x24xf32> to vector<64x2xf32>
    %163 = vector.shape_cast %162 : vector<64x2xf32> to vector<8x8x2xf32>
    %164 = vector.extract_strided_slice %159 {offsets = [0, 22], sizes = [64, 2], strides = [1, 1]} : vector<64x24xf32> to vector<64x2xf32>
    %165 = vector.shape_cast %164 : vector<64x2xf32> to vector<8x8x2xf32>
    %166 = tpu.concatenate %134, %134, %134, %134 in 2 : vector<8x8x2xf32>, vector<8x8x2xf32>, vector<8x8x2xf32>, vector<8x8x2xf32> -> vector<8x8x8xf32>
    %167 = vector.extract_strided_slice %136 {offsets = [0, 0, 0], sizes = [8, 1, 2], strides = [1, 1, 1]} : vector<8x8x2xf32> to vector<8x1x2xf32>
    %168 = vector.extract_strided_slice %145 {offsets = [0, 0, 0], sizes = [8, 1, 2], strides = [1, 1, 1]} : vector<8x8x2xf32> to vector<8x1x2xf32>
    %169 = vector.extract_strided_slice %154 {offsets = [0, 0, 0], sizes = [8, 1, 2], strides = [1, 1, 1]} : vector<8x8x2xf32> to vector<8x1x2xf32>
    %170 = vector.extract_strided_slice %163 {offsets = [0, 0, 0], sizes = [8, 1, 2], strides = [1, 1, 1]} : vector<8x8x2xf32> to vector<8x1x2xf32>
    %171 = tpu.concatenate %167, %168, %169, %170 in 2 : vector<8x1x2xf32>, vector<8x1x2xf32>, vector<8x1x2xf32>, vector<8x1x2xf32> -> vector<8x1x8xf32>
    %172 = vector.broadcast %171 : vector<8x1x8xf32> to vector<8x8x8xf32>
    %173 = arith.mulf %166, %172 : vector<8x8x8xf32>
    %cst_47 = arith.constant dense<0.000000e+00> : vector<8x8xf32>
    %174 = vector.multi_reduction <add>, %173, %cst_47 [0] : vector<8x8x8xf32> to vector<8x8xf32>
    %175 = vector.extract_strided_slice %174 {offsets = [0, 0], sizes = [8, 1], strides = [1, 1]} : vector<8x8xf32> to vector<8x1xf32>
    %176 = vector.extract_strided_slice %174 {offsets = [0, 1], sizes = [8, 1], strides = [1, 1]} : vector<8x8xf32> to vector<8x1xf32>
    %177 = arith.addf %175, %176 : vector<8x1xf32>
    %178 = vector.extract_strided_slice %174 {offsets = [0, 2], sizes = [8, 1], strides = [1, 1]} : vector<8x8xf32> to vector<8x1xf32>
    %179 = vector.extract_strided_slice %174 {offsets = [0, 3], sizes = [8, 1], strides = [1, 1]} : vector<8x8xf32> to vector<8x1xf32>
    %180 = arith.addf %178, %179 : vector<8x1xf32>
    %181 = vector.extract_strided_slice %174 {offsets = [0, 4], sizes = [8, 1], strides = [1, 1]} : vector<8x8xf32> to vector<8x1xf32>
    %182 = vector.extract_strided_slice %174 {offsets = [0, 5], sizes = [8, 1], strides = [1, 1]} : vector<8x8xf32> to vector<8x1xf32>
    %183 = arith.addf %181, %182 : vector<8x1xf32>
    %184 = vector.extract_strided_slice %174 {offsets = [0, 6], sizes = [8, 1], strides = [1, 1]} : vector<8x8xf32> to vector<8x1xf32>
    %185 = vector.extract_strided_slice %174 {offsets = [0, 7], sizes = [8, 1], strides = [1, 1]} : vector<8x8xf32> to vector<8x1xf32>
    %186 = arith.addf %184, %185 : vector<8x1xf32>
    %187 = tpu.concatenate %177, %180, %183, %186 in 1 : vector<8x1xf32>, vector<8x1xf32>, vector<8x1xf32>, vector<8x1xf32> -> vector<8x4xf32>
    %cst_48 = arith.constant dense<0xFF800000> : vector<8xf32>
    %188 = vector.multi_reduction <maximumf>, %187, %cst_48 [1] : vector<8x4xf32> to vector<8xf32>
    %189 = vector.shape_cast %188 : vector<8xf32> to vector<8x1xf32>
    %190 = vector.broadcast %189 : vector<8x1xf32> to vector<8x4xf32>
    %191 = arith.subf %187, %190 : vector<8x4xf32>
    %192 = math.exp %191 : vector<8x4xf32>
    %cst_49 = arith.constant dense<0.000000e+00> : vector<8xf32>
    %193 = vector.multi_reduction <add>, %192, %cst_49 [1] : vector<8x4xf32> to vector<8xf32>
    %194 = vector.shape_cast %193 : vector<8xf32> to vector<8x1xf32>
    %195 = tpu.reciprocal %194 {approx = true} : vector<8x1xf32> -> vector<8x1xf32>
    %196 = vector.broadcast %195 : vector<8x1xf32> to vector<8x4xf32>
    %197 = arith.mulf %192, %196 : vector<8x4xf32>
    %198 = tpu.concatenate %143, %143, %143, %143 in 2 : vector<8x8x2xf32>, vector<8x8x2xf32>, vector<8x8x2xf32>, vector<8x8x2xf32> -> vector<8x8x8xf32>
    %199 = vector.extract_strided_slice %136 {offsets = [0, 1, 0], sizes = [8, 1, 2], strides = [1, 1, 1]} : vector<8x8x2xf32> to vector<8x1x2xf32>
    %200 = vector.extract_strided_slice %145 {offsets = [0, 1, 0], sizes = [8, 1, 2], strides = [1, 1, 1]} : vector<8x8x2xf32> to vector<8x1x2xf32>
    %201 = vector.extract_strided_slice %154 {offsets = [0, 1, 0], sizes = [8, 1, 2], strides = [1, 1, 1]} : vector<8x8x2xf32> to vector<8x1x2xf32>
    %202 = vector.extract_strided_slice %163 {offsets = [0, 1, 0], sizes = [8, 1, 2], strides = [1, 1, 1]} : vector<8x8x2xf32> to vector<8x1x2xf32>
    %203 = tpu.concatenate %199, %200, %201, %202 in 2 : vector<8x1x2xf32>, vector<8x1x2xf32>, vector<8x1x2xf32>, vector<8x1x2xf32> -> vector<8x1x8xf32>
    %204 = vector.broadcast %203 : vector<8x1x8xf32> to vector<8x8x8xf32>
    %205 = arith.mulf %198, %204 : vector<8x8x8xf32>
    %cst_50 = arith.constant dense<0.000000e+00> : vector<8x8xf32>
    %206 = vector.multi_reduction <add>, %205, %cst_50 [0] : vector<8x8x8xf32> to vector<8x8xf32>
    %207 = vector.extract_strided_slice %206 {offsets = [0, 0], sizes = [8, 1], strides = [1, 1]} : vector<8x8xf32> to vector<8x1xf32>
    %208 = vector.extract_strided_slice %206 {offsets = [0, 1], sizes = [8, 1], strides = [1, 1]} : vector<8x8xf32> to vector<8x1xf32>
    %209 = arith.addf %207, %208 : vector<8x1xf32>
    %210 = vector.extract_strided_slice %206 {offsets = [0, 2], sizes = [8, 1], strides = [1, 1]} : vector<8x8xf32> to vector<8x1xf32>
    %211 = vector.extract_strided_slice %206 {offsets = [0, 3], sizes = [8, 1], strides = [1, 1]} : vector<8x8xf32> to vector<8x1xf32>
    %212 = arith.addf %210, %211 : vector<8x1xf32>
    %213 = vector.extract_strided_slice %206 {offsets = [0, 4], sizes = [8, 1], strides = [1, 1]} : vector<8x8xf32> to vector<8x1xf32>
    %214 = vector.extract_strided_slice %206 {offsets = [0, 5], sizes = [8, 1], strides = [1, 1]} : vector<8x8xf32> to vector<8x1xf32>
    %215 = arith.addf %213, %214 : vector<8x1xf32>
    %216 = vector.extract_strided_slice %206 {offsets = [0, 6], sizes = [8, 1], strides = [1, 1]} : vector<8x8xf32> to vector<8x1xf32>
    %217 = vector.extract_strided_slice %206 {offsets = [0, 7], sizes = [8, 1], strides = [1, 1]} : vector<8x8xf32> to vector<8x1xf32>
    %218 = arith.addf %216, %217 : vector<8x1xf32>
    %219 = tpu.concatenate %209, %212, %215, %218 in 1 : vector<8x1xf32>, vector<8x1xf32>, vector<8x1xf32>, vector<8x1xf32> -> vector<8x4xf32>
    %cst_51 = arith.constant dense<0xFF800000> : vector<8xf32>
    %220 = vector.multi_reduction <maximumf>, %219, %cst_51 [1] : vector<8x4xf32> to vector<8xf32>
    %221 = vector.shape_cast %220 : vector<8xf32> to vector<8x1xf32>
    %222 = vector.broadcast %221 : vector<8x1xf32> to vector<8x4xf32>
    %223 = arith.subf %219, %222 : vector<8x4xf32>
    %224 = math.exp %223 : vector<8x4xf32>
    %cst_52 = arith.constant dense<0.000000e+00> : vector<8xf32>
    %225 = vector.multi_reduction <add>, %224, %cst_52 [1] : vector<8x4xf32> to vector<8xf32>
    %226 = vector.shape_cast %225 : vector<8xf32> to vector<8x1xf32>
    %227 = tpu.reciprocal %226 {approx = true} : vector<8x1xf32> -> vector<8x1xf32>
    %228 = vector.broadcast %227 : vector<8x1xf32> to vector<8x4xf32>
    %229 = arith.mulf %224, %228 : vector<8x4xf32>
    %230 = tpu.concatenate %152, %152, %152, %152 in 2 : vector<8x8x2xf32>, vector<8x8x2xf32>, vector<8x8x2xf32>, vector<8x8x2xf32> -> vector<8x8x8xf32>
    %231 = vector.extract_strided_slice %136 {offsets = [0, 2, 0], sizes = [8, 1, 2], strides = [1, 1, 1]} : vector<8x8x2xf32> to vector<8x1x2xf32>
    %232 = vector.extract_strided_slice %145 {offsets = [0, 2, 0], sizes = [8, 1, 2], strides = [1, 1, 1]} : vector<8x8x2xf32> to vector<8x1x2xf32>
    %233 = vector.extract_strided_slice %154 {offsets = [0, 2, 0], sizes = [8, 1, 2], strides = [1, 1, 1]} : vector<8x8x2xf32> to vector<8x1x2xf32>
    %234 = vector.extract_strided_slice %163 {offsets = [0, 2, 0], sizes = [8, 1, 2], strides = [1, 1, 1]} : vector<8x8x2xf32> to vector<8x1x2xf32>
    %235 = tpu.concatenate %231, %232, %233, %234 in 2 : vector<8x1x2xf32>, vector<8x1x2xf32>, vector<8x1x2xf32>, vector<8x1x2xf32> -> vector<8x1x8xf32>
    %236 = vector.broadcast %235 : vector<8x1x8xf32> to vector<8x8x8xf32>
    %237 = arith.mulf %230, %236 : vector<8x8x8xf32>
    %cst_53 = arith.constant dense<0.000000e+00> : vector<8x8xf32>
    %238 = vector.multi_reduction <add>, %237, %cst_53 [0] : vector<8x8x8xf32> to vector<8x8xf32>
    %239 = vector.extract_strided_slice %238 {offsets = [0, 0], sizes = [8, 1], strides = [1, 1]} : vector<8x8xf32> to vector<8x1xf32>
    %240 = vector.extract_strided_slice %238 {offsets = [0, 1], sizes = [8, 1], strides = [1, 1]} : vector<8x8xf32> to vector<8x1xf32>
    %241 = arith.addf %239, %240 : vector<8x1xf32>
    %242 = vector.extract_strided_slice %238 {offsets = [0, 2], sizes = [8, 1], strides = [1, 1]} : vector<8x8xf32> to vector<8x1xf32>
    %243 = vector.extract_strided_slice %238 {offsets = [0, 3], sizes = [8, 1], strides = [1, 1]} : vector<8x8xf32> to vector<8x1xf32>
    %244 = arith.addf %242, %243 : vector<8x1xf32>
    %245 = vector.extract_strided_slice %238 {offsets = [0, 4], sizes = [8, 1], strides = [1, 1]} : vector<8x8xf32> to vector<8x1xf32>
    %246 = vector.extract_strided_slice %238 {offsets = [0, 5], sizes = [8, 1], strides = [1, 1]} : vector<8x8xf32> to vector<8x1xf32>
    %247 = arith.addf %245, %246 : vector<8x1xf32>
    %248 = vector.extract_strided_slice %238 {offsets = [0, 6], sizes = [8, 1], strides = [1, 1]} : vector<8x8xf32> to vector<8x1xf32>
    %249 = vector.extract_strided_slice %238 {offsets = [0, 7], sizes = [8, 1], strides = [1, 1]} : vector<8x8xf32> to vector<8x1xf32>
    %250 = arith.addf %248, %249 : vector<8x1xf32>
    %251 = tpu.concatenate %241, %244, %247, %250 in 1 : vector<8x1xf32>, vector<8x1xf32>, vector<8x1xf32>, vector<8x1xf32> -> vector<8x4xf32>
    %cst_54 = arith.constant dense<0xFF800000> : vector<8xf32>
    %252 = vector.multi_reduction <maximumf>, %251, %cst_54 [1] : vector<8x4xf32> to vector<8xf32>
    %253 = vector.shape_cast %252 : vector<8xf32> to vector<8x1xf32>
    %254 = vector.broadcast %253 : vector<8x1xf32> to vector<8x4xf32>
    %255 = arith.subf %251, %254 : vector<8x4xf32>
    %256 = math.exp %255 : vector<8x4xf32>
    %cst_55 = arith.constant dense<0.000000e+00> : vector<8xf32>
    %257 = vector.multi_reduction <add>, %256, %cst_55 [1] : vector<8x4xf32> to vector<8xf32>
    %258 = vector.shape_cast %257 : vector<8xf32> to vector<8x1xf32>
    %259 = tpu.reciprocal %258 {approx = true} : vector<8x1xf32> -> vector<8x1xf32>
    %260 = vector.broadcast %259 : vector<8x1xf32> to vector<8x4xf32>
    %261 = arith.mulf %256, %260 : vector<8x4xf32>
    %262 = tpu.concatenate %161, %161, %161, %161 in 2 : vector<8x8x2xf32>, vector<8x8x2xf32>, vector<8x8x2xf32>, vector<8x8x2xf32> -> vector<8x8x8xf32>
    %263 = vector.extract_strided_slice %136 {offsets = [0, 3, 0], sizes = [8, 1, 2], strides = [1, 1, 1]} : vector<8x8x2xf32> to vector<8x1x2xf32>
    %264 = vector.extract_strided_slice %145 {offsets = [0, 3, 0], sizes = [8, 1, 2], strides = [1, 1, 1]} : vector<8x8x2xf32> to vector<8x1x2xf32>
    %265 = vector.extract_strided_slice %154 {offsets = [0, 3, 0], sizes = [8, 1, 2], strides = [1, 1, 1]} : vector<8x8x2xf32> to vector<8x1x2xf32>
    %266 = vector.extract_strided_slice %163 {offsets = [0, 3, 0], sizes = [8, 1, 2], strides = [1, 1, 1]} : vector<8x8x2xf32> to vector<8x1x2xf32>
    %267 = tpu.concatenate %263, %264, %265, %266 in 2 : vector<8x1x2xf32>, vector<8x1x2xf32>, vector<8x1x2xf32>, vector<8x1x2xf32> -> vector<8x1x8xf32>
    %268 = vector.broadcast %267 : vector<8x1x8xf32> to vector<8x8x8xf32>
    %269 = arith.mulf %262, %268 : vector<8x8x8xf32>
    %cst_56 = arith.constant dense<0.000000e+00> : vector<8x8xf32>
    %270 = vector.multi_reduction <add>, %269, %cst_56 [0] : vector<8x8x8xf32> to vector<8x8xf32>
    %271 = vector.extract_strided_slice %270 {offsets = [0, 0], sizes = [8, 1], strides = [1, 1]} : vector<8x8xf32> to vector<8x1xf32>
    %272 = vector.extract_strided_slice %270 {offsets = [0, 1], sizes = [8, 1], strides = [1, 1]} : vector<8x8xf32> to vector<8x1xf32>
    %273 = arith.addf %271, %272 : vector<8x1xf32>
    %274 = vector.extract_strided_slice %270 {offsets = [0, 2], sizes = [8, 1], strides = [1, 1]} : vector<8x8xf32> to vector<8x1xf32>
    %275 = vector.extract_strided_slice %270 {offsets = [0, 3], sizes = [8, 1], strides = [1, 1]} : vector<8x8xf32> to vector<8x1xf32>
    %276 = arith.addf %274, %275 : vector<8x1xf32>
    %277 = vector.extract_strided_slice %270 {offsets = [0, 4], sizes = [8, 1], strides = [1, 1]} : vector<8x8xf32> to vector<8x1xf32>
    %278 = vector.extract_strided_slice %270 {offsets = [0, 5], sizes = [8, 1], strides = [1, 1]} : vector<8x8xf32> to vector<8x1xf32>
    %279 = arith.addf %277, %278 : vector<8x1xf32>
    %280 = vector.extract_strided_slice %270 {offsets = [0, 6], sizes = [8, 1], strides = [1, 1]} : vector<8x8xf32> to vector<8x1xf32>
    %281 = vector.extract_strided_slice %270 {offsets = [0, 7], sizes = [8, 1], strides = [1, 1]} : vector<8x8xf32> to vector<8x1xf32>
    %282 = arith.addf %280, %281 : vector<8x1xf32>
    %283 = tpu.concatenate %273, %276, %279, %282 in 1 : vector<8x1xf32>, vector<8x1xf32>, vector<8x1xf32>, vector<8x1xf32> -> vector<8x4xf32>
    %cst_57 = arith.constant dense<0xFF800000> : vector<8xf32>
    %284 = vector.multi_reduction <maximumf>, %283, %cst_57 [1] : vector<8x4xf32> to vector<8xf32>
    %285 = vector.shape_cast %284 : vector<8xf32> to vector<8x1xf32>
    %286 = vector.broadcast %285 : vector<8x1xf32> to vector<8x4xf32>
    %287 = arith.subf %283, %286 : vector<8x4xf32>
    %288 = math.exp %287 : vector<8x4xf32>
    %cst_58 = arith.constant dense<0.000000e+00> : vector<8xf32>
    %289 = vector.multi_reduction <add>, %288, %cst_58 [1] : vector<8x4xf32> to vector<8xf32>
    %290 = vector.shape_cast %289 : vector<8xf32> to vector<8x1xf32>
    %291 = tpu.reciprocal %290 {approx = true} : vector<8x1xf32> -> vector<8x1xf32>
    %292 = vector.broadcast %291 : vector<8x1xf32> to vector<8x4xf32>
    %293 = arith.mulf %288, %292 : vector<8x4xf32>
    %294 = vector.extract_strided_slice %197 {offsets = [0, 0], sizes = [8, 1], strides = [1, 1]} : vector<8x4xf32> to vector<8x1xf32>
    %295 = vector.shape_cast %294 : vector<8x1xf32> to vector<1x8x1xf32>
    %296 = vector.broadcast %295 : vector<1x8x1xf32> to vector<8x8x2xf32>
    %297 = arith.mulf %296, %138 : vector<8x8x2xf32>
    %298 = vector.extract_strided_slice %197 {offsets = [0, 1], sizes = [8, 1], strides = [1, 1]} : vector<8x4xf32> to vector<8x1xf32>
    %299 = vector.shape_cast %298 : vector<8x1xf32> to vector<1x8x1xf32>
    %300 = vector.broadcast %299 : vector<1x8x1xf32> to vector<8x8x2xf32>
    %301 = arith.mulf %300, %147 : vector<8x8x2xf32>
    %302 = arith.addf %297, %301 : vector<8x8x2xf32>
    %303 = vector.extract_strided_slice %197 {offsets = [0, 2], sizes = [8, 1], strides = [1, 1]} : vector<8x4xf32> to vector<8x1xf32>
    %304 = vector.shape_cast %303 : vector<8x1xf32> to vector<1x8x1xf32>
    %305 = vector.broadcast %304 : vector<1x8x1xf32> to vector<8x8x2xf32>
    %306 = arith.mulf %305, %156 : vector<8x8x2xf32>
    %307 = arith.addf %302, %306 : vector<8x8x2xf32>
    %308 = vector.extract_strided_slice %197 {offsets = [0, 3], sizes = [8, 1], strides = [1, 1]} : vector<8x4xf32> to vector<8x1xf32>
    %309 = vector.shape_cast %308 : vector<8x1xf32> to vector<1x8x1xf32>
    %310 = vector.broadcast %309 : vector<1x8x1xf32> to vector<8x8x2xf32>
    %311 = arith.mulf %310, %165 : vector<8x8x2xf32>
    %312 = arith.addf %307, %311 : vector<8x8x2xf32>
    %313 = vector.extract_strided_slice %229 {offsets = [0, 0], sizes = [8, 1], strides = [1, 1]} : vector<8x4xf32> to vector<8x1xf32>
    %314 = vector.shape_cast %313 : vector<8x1xf32> to vector<1x8x1xf32>
    %315 = vector.broadcast %314 : vector<1x8x1xf32> to vector<8x8x2xf32>
    %316 = arith.mulf %315, %138 : vector<8x8x2xf32>
    %317 = vector.extract_strided_slice %229 {offsets = [0, 1], sizes = [8, 1], strides = [1, 1]} : vector<8x4xf32> to vector<8x1xf32>
    %318 = vector.shape_cast %317 : vector<8x1xf32> to vector<1x8x1xf32>
    %319 = vector.broadcast %318 : vector<1x8x1xf32> to vector<8x8x2xf32>
    %320 = arith.mulf %319, %147 : vector<8x8x2xf32>
    %321 = arith.addf %316, %320 : vector<8x8x2xf32>
    %322 = vector.extract_strided_slice %229 {offsets = [0, 2], sizes = [8, 1], strides = [1, 1]} : vector<8x4xf32> to vector<8x1xf32>
    %323 = vector.shape_cast %322 : vector<8x1xf32> to vector<1x8x1xf32>
    %324 = vector.broadcast %323 : vector<1x8x1xf32> to vector<8x8x2xf32>
    %325 = arith.mulf %324, %156 : vector<8x8x2xf32>
    %326 = arith.addf %321, %325 : vector<8x8x2xf32>
    %327 = vector.extract_strided_slice %229 {offsets = [0, 3], sizes = [8, 1], strides = [1, 1]} : vector<8x4xf32> to vector<8x1xf32>
    %328 = vector.shape_cast %327 : vector<8x1xf32> to vector<1x8x1xf32>
    %329 = vector.broadcast %328 : vector<1x8x1xf32> to vector<8x8x2xf32>
    %330 = arith.mulf %329, %165 : vector<8x8x2xf32>
    %331 = arith.addf %326, %330 : vector<8x8x2xf32>
    %332 = vector.extract_strided_slice %261 {offsets = [0, 0], sizes = [8, 1], strides = [1, 1]} : vector<8x4xf32> to vector<8x1xf32>
    %333 = vector.shape_cast %332 : vector<8x1xf32> to vector<1x8x1xf32>
    %334 = vector.broadcast %333 : vector<1x8x1xf32> to vector<8x8x2xf32>
    %335 = arith.mulf %334, %138 : vector<8x8x2xf32>
    %336 = vector.extract_strided_slice %261 {offsets = [0, 1], sizes = [8, 1], strides = [1, 1]} : vector<8x4xf32> to vector<8x1xf32>
    %337 = vector.shape_cast %336 : vector<8x1xf32> to vector<1x8x1xf32>
    %338 = vector.broadcast %337 : vector<1x8x1xf32> to vector<8x8x2xf32>
    %339 = arith.mulf %338, %147 : vector<8x8x2xf32>
    %340 = arith.addf %335, %339 : vector<8x8x2xf32>
    %341 = vector.extract_strided_slice %261 {offsets = [0, 2], sizes = [8, 1], strides = [1, 1]} : vector<8x4xf32> to vector<8x1xf32>
    %342 = vector.shape_cast %341 : vector<8x1xf32> to vector<1x8x1xf32>
    %343 = vector.broadcast %342 : vector<1x8x1xf32> to vector<8x8x2xf32>
    %344 = arith.mulf %343, %156 : vector<8x8x2xf32>
    %345 = arith.addf %340, %344 : vector<8x8x2xf32>
    %346 = vector.extract_strided_slice %261 {offsets = [0, 3], sizes = [8, 1], strides = [1, 1]} : vector<8x4xf32> to vector<8x1xf32>
    %347 = vector.shape_cast %346 : vector<8x1xf32> to vector<1x8x1xf32>
    %348 = vector.broadcast %347 : vector<1x8x1xf32> to vector<8x8x2xf32>
    %349 = arith.mulf %348, %165 : vector<8x8x2xf32>
    %350 = arith.addf %345, %349 : vector<8x8x2xf32>
    %351 = vector.extract_strided_slice %293 {offsets = [0, 0], sizes = [8, 1], strides = [1, 1]} : vector<8x4xf32> to vector<8x1xf32>
    %352 = vector.shape_cast %351 : vector<8x1xf32> to vector<1x8x1xf32>
    %353 = vector.broadcast %352 : vector<1x8x1xf32> to vector<8x8x2xf32>
    %354 = arith.mulf %353, %138 : vector<8x8x2xf32>
    %355 = vector.extract_strided_slice %293 {offsets = [0, 1], sizes = [8, 1], strides = [1, 1]} : vector<8x4xf32> to vector<8x1xf32>
    %356 = vector.shape_cast %355 : vector<8x1xf32> to vector<1x8x1xf32>
    %357 = vector.broadcast %356 : vector<1x8x1xf32> to vector<8x8x2xf32>
    %358 = arith.mulf %357, %147 : vector<8x8x2xf32>
    %359 = arith.addf %354, %358 : vector<8x8x2xf32>
    %360 = vector.extract_strided_slice %293 {offsets = [0, 2], sizes = [8, 1], strides = [1, 1]} : vector<8x4xf32> to vector<8x1xf32>
    %361 = vector.shape_cast %360 : vector<8x1xf32> to vector<1x8x1xf32>
    %362 = vector.broadcast %361 : vector<1x8x1xf32> to vector<8x8x2xf32>
    %363 = arith.mulf %362, %156 : vector<8x8x2xf32>
    %364 = arith.addf %359, %363 : vector<8x8x2xf32>
    %365 = vector.extract_strided_slice %293 {offsets = [0, 3], sizes = [8, 1], strides = [1, 1]} : vector<8x4xf32> to vector<8x1xf32>
    %366 = vector.shape_cast %365 : vector<8x1xf32> to vector<1x8x1xf32>
    %367 = vector.broadcast %366 : vector<1x8x1xf32> to vector<8x8x2xf32>
    %368 = arith.mulf %367, %165 : vector<8x8x2xf32>
    %369 = arith.addf %364, %368 : vector<8x8x2xf32>
    %370 = tpu.concatenate %312, %331, %350, %369 in 2 : vector<8x8x2xf32>, vector<8x8x2xf32>, vector<8x8x2xf32>, vector<8x8x2xf32> -> vector<8x8x8xf32>
    %371 = vector.shape_cast %370 : vector<8x8x8xf32> to vector<64x8xf32>
    %c0_59 = arith.constant 0 : index
    %c0_60 = arith.constant 0 : index
    %372 = vector.load %arg3[%c0_59, %c0_60] : memref<8x8xf32, #tpu.memory_space<vmem>>, vector<8x8xf32>
    %cst_61 = arith.constant dense<0.000000e+00> : vector<64x8xf32>
    %373 = tpu.matmul %371, %372, %cst_61 {dimension_numbers = #tpu.dot_dimension_numbers<[1], [0], [0], [1], [0, 0, 1, 1], [], []>} : vector<64x8xf32>, vector<8x8xf32>, vector<64x8xf32> -> vector<64x8xf32>
    %cst_62 = arith.constant 0.000000e+00 : f32
    %374 = vector.broadcast %cst_62 : f32 to vector<8x8xf32>
    %375 = vector.extract_strided_slice %373 {offsets = [0, 0], sizes = [8, 8], strides = [1, 1]} : vector<64x8xf32> to vector<8x8xf32>
    %cst_63 = arith.constant 1.000000e+00 : f32
    %376 = vector.broadcast %cst_63 : f32 to vector<8x8xf32>
    %377 = arith.cmpf ogt, %374, %376 : vector<8x8xf32>
    %378 = arith.extui %377 : vector<8x8xi1> to vector<8x8xi32>
    %379 = arith.sitofp %378 : vector<8x8xi32> to vector<8x8xf32>
    %cst_64 = arith.constant 0.899999976 : f32
    %380 = vector.broadcast %cst_64 : f32 to vector<8x8xf32>
    %381 = arith.mulf %380, %374 : vector<8x8xf32>
    %382 = arith.addf %381, %375 : vector<8x8xf32>
    %cst_65 = arith.constant 1.000000e+00 : f32
    %383 = vector.broadcast %cst_65 : f32 to vector<8x8xf32>
    %384 = arith.mulf %379, %383 : vector<8x8xf32>
    %385 = arith.subf %382, %384 : vector<8x8xf32>
    %cst_66 = arith.constant 1.000000e+00 : f32
    %386 = vector.broadcast %cst_66 : f32 to vector<8x8xf32>
    %387 = arith.cmpf ogt, %385, %386 : vector<8x8xf32>
    %388 = arith.extui %387 : vector<8x8xi1> to vector<8x8xi32>
    %389 = arith.sitofp %388 : vector<8x8xi32> to vector<8x8xf32>
    %c0_67 = arith.constant 0 : index
    %c0_68 = arith.constant 0 : index
    %390 = vector.load %arg12[%c0_67, %c0_68] : memref<64x8xf32, #tpu.memory_space<vmem>>, vector<8x8xf32>
    tpu.vector_store %arg12[%c0_67, %c0_68], %389 {strides = array<i32>} : memref<64x8xf32, #tpu.memory_space<vmem>>, vector<8x8xf32>,
    %391 = vector.extract_strided_slice %373 {offsets = [8, 0], sizes = [8, 8], strides = [1, 1]} : vector<64x8xf32> to vector<8x8xf32>
    %cst_69 = arith.constant 1.000000e+00 : f32
    %392 = vector.broadcast %cst_69 : f32 to vector<8x8xf32>
    %393 = arith.cmpf ogt, %385, %392 : vector<8x8xf32>
    %394 = arith.extui %393 : vector<8x8xi1> to vector<8x8xi32>
    %395 = arith.sitofp %394 : vector<8x8xi32> to vector<8x8xf32>
    %cst_70 = arith.constant 0.899999976 : f32
    %396 = vector.broadcast %cst_70 : f32 to vector<8x8xf32>
    %397 = arith.mulf %396, %385 : vector<8x8xf32>
    %398 = arith.addf %397, %391 : vector<8x8xf32>
    %cst_71 = arith.constant 1.000000e+00 : f32
    %399 = vector.broadcast %cst_71 : f32 to vector<8x8xf32>
    %400 = arith.mulf %395, %399 : vector<8x8xf32>
    %401 = arith.subf %398, %400 : vector<8x8xf32>
    %cst_72 = arith.constant 1.000000e+00 : f32
    %402 = vector.broadcast %cst_72 : f32 to vector<8x8xf32>
    %403 = arith.cmpf ogt, %401, %402 : vector<8x8xf32>
    %404 = arith.extui %403 : vector<8x8xi1> to vector<8x8xi32>
    %405 = arith.sitofp %404 : vector<8x8xi32> to vector<8x8xf32>
    %c8_73 = arith.constant 8 : index
    %c0_74 = arith.constant 0 : index
    %406 = vector.load %arg12[%c8_73, %c0_74] : memref<64x8xf32, #tpu.memory_space<vmem>>, vector<8x8xf32>
    tpu.vector_store %arg12[%c8_73, %c0_74], %405 {strides = array<i32>} : memref<64x8xf32, #tpu.memory_space<vmem>>, vector<8x8xf32>,
    %407 = vector.extract_strided_slice %373 {offsets = [16, 0], sizes = [8, 8], strides = [1, 1]} : vector<64x8xf32> to vector<8x8xf32>
    %cst_75 = arith.constant 1.000000e+00 : f32
    %408 = vector.broadcast %cst_75 : f32 to vector<8x8xf32>
    %409 = arith.cmpf ogt, %401, %408 : vector<8x8xf32>
    %410 = arith.extui %409 : vector<8x8xi1> to vector<8x8xi32>
    %411 = arith.sitofp %410 : vector<8x8xi32> to vector<8x8xf32>
    %cst_76 = arith.constant 0.899999976 : f32
    %412 = vector.broadcast %cst_76 : f32 to vector<8x8xf32>
    %413 = arith.mulf %412, %401 : vector<8x8xf32>
    %414 = arith.addf %413, %407 : vector<8x8xf32>
    %cst_77 = arith.constant 1.000000e+00 : f32
    %415 = vector.broadcast %cst_77 : f32 to vector<8x8xf32>
    %416 = arith.mulf %411, %415 : vector<8x8xf32>
    %417 = arith.subf %414, %416 : vector<8x8xf32>
    %cst_78 = arith.constant 1.000000e+00 : f32
    %418 = vector.broadcast %cst_78 : f32 to vector<8x8xf32>
    %419 = arith.cmpf ogt, %417, %418 : vector<8x8xf32>
    %420 = arith.extui %419 : vector<8x8xi1> to vector<8x8xi32>
    %421 = arith.sitofp %420 : vector<8x8xi32> to vector<8x8xf32>
    %c16_79 = arith.constant 16 : index
    %c0_80 = arith.constant 0 : index
    %422 = vector.load %arg12[%c16_79, %c0_80] : memref<64x8xf32, #tpu.memory_space<vmem>>, vector<8x8xf32>
    tpu.vector_store %arg12[%c16_79, %c0_80], %421 {strides = array<i32>} : memref<64x8xf32, #tpu.memory_space<vmem>>, vector<8x8xf32>,
    %423 = vector.extract_strided_slice %373 {offsets = [24, 0], sizes = [8, 8], strides = [1, 1]} : vector<64x8xf32> to vector<8x8xf32>
    %cst_81 = arith.constant 1.000000e+00 : f32
    %424 = vector.broadcast %cst_81 : f32 to vector<8x8xf32>
    %425 = arith.cmpf ogt, %417, %424 : vector<8x8xf32>
    %426 = arith.extui %425 : vector<8x8xi1> to vector<8x8xi32>
    %427 = arith.sitofp %426 : vector<8x8xi32> to vector<8x8xf32>
    %cst_82 = arith.constant 0.899999976 : f32
    %428 = vector.broadcast %cst_82 : f32 to vector<8x8xf32>
    %429 = arith.mulf %428, %417 : vector<8x8xf32>
    %430 = arith.addf %429, %423 : vector<8x8xf32>
    %cst_83 = arith.constant 1.000000e+00 : f32
    %431 = vector.broadcast %cst_83 : f32 to vector<8x8xf32>
    %432 = arith.mulf %427, %431 : vector<8x8xf32>
    %433 = arith.subf %430, %432 : vector<8x8xf32>
    %cst_84 = arith.constant 1.000000e+00 : f32
    %434 = vector.broadcast %cst_84 : f32 to vector<8x8xf32>
    %435 = arith.cmpf ogt, %433, %434 : vector<8x8xf32>
    %436 = arith.extui %435 : vector<8x8xi1> to vector<8x8xi32>
    %437 = arith.sitofp %436 : vector<8x8xi32> to vector<8x8xf32>
    %c24_85 = arith.constant 24 : index
    %c0_86 = arith.constant 0 : index
    %438 = vector.load %arg12[%c24_85, %c0_86] : memref<64x8xf32, #tpu.memory_space<vmem>>, vector<8x8xf32>
    tpu.vector_store %arg12[%c24_85, %c0_86], %437 {strides = array<i32>} : memref<64x8xf32, #tpu.memory_space<vmem>>, vector<8x8xf32>,
    %439 = vector.extract_strided_slice %373 {offsets = [32, 0], sizes = [8, 8], strides = [1, 1]} : vector<64x8xf32> to vector<8x8xf32>
    %cst_87 = arith.constant 1.000000e+00 : f32
    %440 = vector.broadcast %cst_87 : f32 to vector<8x8xf32>
    %441 = arith.cmpf ogt, %433, %440 : vector<8x8xf32>
    %442 = arith.extui %441 : vector<8x8xi1> to vector<8x8xi32>
    %443 = arith.sitofp %442 : vector<8x8xi32> to vector<8x8xf32>
    %cst_88 = arith.constant 0.899999976 : f32
    %444 = vector.broadcast %cst_88 : f32 to vector<8x8xf32>
    %445 = arith.mulf %444, %433 : vector<8x8xf32>
    %446 = arith.addf %445, %439 : vector<8x8xf32>
    %cst_89 = arith.constant 1.000000e+00 : f32
    %447 = vector.broadcast %cst_89 : f32 to vector<8x8xf32>
    %448 = arith.mulf %443, %447 : vector<8x8xf32>
    %449 = arith.subf %446, %448 : vector<8x8xf32>
    %cst_90 = arith.constant 1.000000e+00 : f32
    %450 = vector.broadcast %cst_90 : f32 to vector<8x8xf32>
    %451 = arith.cmpf ogt, %449, %450 : vector<8x8xf32>
    %452 = arith.extui %451 : vector<8x8xi1> to vector<8x8xi32>
    %453 = arith.sitofp %452 : vector<8x8xi32> to vector<8x8xf32>
    %c32_91 = arith.constant 32 : index
    %c0_92 = arith.constant 0 : index
    %454 = vector.load %arg12[%c32_91, %c0_92] : memref<64x8xf32, #tpu.memory_space<vmem>>, vector<8x8xf32>
    tpu.vector_store %arg12[%c32_91, %c0_92], %453 {strides = array<i32>} : memref<64x8xf32, #tpu.memory_space<vmem>>, vector<8x8xf32>,
    %455 = vector.extract_strided_slice %373 {offsets = [40, 0], sizes = [8, 8], strides = [1, 1]} : vector<64x8xf32> to vector<8x8xf32>
    %cst_93 = arith.constant 1.000000e+00 : f32
    %456 = vector.broadcast %cst_93 : f32 to vector<8x8xf32>
    %457 = arith.cmpf ogt, %449, %456 : vector<8x8xf32>
    %458 = arith.extui %457 : vector<8x8xi1> to vector<8x8xi32>
    %459 = arith.sitofp %458 : vector<8x8xi32> to vector<8x8xf32>
    %cst_94 = arith.constant 0.899999976 : f32
    %460 = vector.broadcast %cst_94 : f32 to vector<8x8xf32>
    %461 = arith.mulf %460, %449 : vector<8x8xf32>
    %462 = arith.addf %461, %455 : vector<8x8xf32>
    %cst_95 = arith.constant 1.000000e+00 : f32
    %463 = vector.broadcast %cst_95 : f32 to vector<8x8xf32>
    %464 = arith.mulf %459, %463 : vector<8x8xf32>
    %465 = arith.subf %462, %464 : vector<8x8xf32>
    %cst_96 = arith.constant 1.000000e+00 : f32
    %466 = vector.broadcast %cst_96 : f32 to vector<8x8xf32>
    %467 = arith.cmpf ogt, %465, %466 : vector<8x8xf32>
    %468 = arith.extui %467 : vector<8x8xi1> to vector<8x8xi32>
    %469 = arith.sitofp %468 : vector<8x8xi32> to vector<8x8xf32>
    %c40_97 = arith.constant 40 : index
    %c0_98 = arith.constant 0 : index
    %470 = vector.load %arg12[%c40_97, %c0_98] : memref<64x8xf32, #tpu.memory_space<vmem>>, vector<8x8xf32>
    tpu.vector_store %arg12[%c40_97, %c0_98], %469 {strides = array<i32>} : memref<64x8xf32, #tpu.memory_space<vmem>>, vector<8x8xf32>,
    %471 = vector.extract_strided_slice %373 {offsets = [48, 0], sizes = [8, 8], strides = [1, 1]} : vector<64x8xf32> to vector<8x8xf32>
    %cst_99 = arith.constant 1.000000e+00 : f32
    %472 = vector.broadcast %cst_99 : f32 to vector<8x8xf32>
    %473 = arith.cmpf ogt, %465, %472 : vector<8x8xf32>
    %474 = arith.extui %473 : vector<8x8xi1> to vector<8x8xi32>
    %475 = arith.sitofp %474 : vector<8x8xi32> to vector<8x8xf32>
    %cst_100 = arith.constant 0.899999976 : f32
    %476 = vector.broadcast %cst_100 : f32 to vector<8x8xf32>
    %477 = arith.mulf %476, %465 : vector<8x8xf32>
    %478 = arith.addf %477, %471 : vector<8x8xf32>
    %cst_101 = arith.constant 1.000000e+00 : f32
    %479 = vector.broadcast %cst_101 : f32 to vector<8x8xf32>
    %480 = arith.mulf %475, %479 : vector<8x8xf32>
    %481 = arith.subf %478, %480 : vector<8x8xf32>
    %cst_102 = arith.constant 1.000000e+00 : f32
    %482 = vector.broadcast %cst_102 : f32 to vector<8x8xf32>
    %483 = arith.cmpf ogt, %481, %482 : vector<8x8xf32>
    %484 = arith.extui %483 : vector<8x8xi1> to vector<8x8xi32>
    %485 = arith.sitofp %484 : vector<8x8xi32> to vector<8x8xf32>
    %c48_103 = arith.constant 48 : index
    %c0_104 = arith.constant 0 : index
    %486 = vector.load %arg12[%c48_103, %c0_104] : memref<64x8xf32, #tpu.memory_space<vmem>>, vector<8x8xf32>
    tpu.vector_store %arg12[%c48_103, %c0_104], %485 {strides = array<i32>} : memref<64x8xf32, #tpu.memory_space<vmem>>, vector<8x8xf32>,
    %487 = vector.extract_strided_slice %373 {offsets = [56, 0], sizes = [8, 8], strides = [1, 1]} : vector<64x8xf32> to vector<8x8xf32>
    %cst_105 = arith.constant 1.000000e+00 : f32
    %488 = vector.broadcast %cst_105 : f32 to vector<8x8xf32>
    %489 = arith.cmpf ogt, %481, %488 : vector<8x8xf32>
    %490 = arith.extui %489 : vector<8x8xi1> to vector<8x8xi32>
    %491 = arith.sitofp %490 : vector<8x8xi32> to vector<8x8xf32>
    %cst_106 = arith.constant 0.899999976 : f32
    %492 = vector.broadcast %cst_106 : f32 to vector<8x8xf32>
    %493 = arith.mulf %492, %481 : vector<8x8xf32>
    %494 = arith.addf %493, %487 : vector<8x8xf32>
    %cst_107 = arith.constant 1.000000e+00 : f32
    %495 = vector.broadcast %cst_107 : f32 to vector<8x8xf32>
    %496 = arith.mulf %491, %495 : vector<8x8xf32>
    %497 = arith.subf %494, %496 : vector<8x8xf32>
    %cst_108 = arith.constant 1.000000e+00 : f32
    %498 = vector.broadcast %cst_108 : f32 to vector<8x8xf32>
    %499 = arith.cmpf ogt, %497, %498 : vector<8x8xf32>
    %500 = arith.extui %499 : vector<8x8xi1> to vector<8x8xi32>
    %501 = arith.sitofp %500 : vector<8x8xi32> to vector<8x8xf32>
    %c56_109 = arith.constant 56 : index
    %c0_110 = arith.constant 0 : index
    %502 = vector.load %arg12[%c56_109, %c0_110] : memref<64x8xf32, #tpu.memory_space<vmem>>, vector<8x8xf32>
    tpu.vector_store %arg12[%c56_109, %c0_110], %501 {strides = array<i32>} : memref<64x8xf32, #tpu.memory_space<vmem>>, vector<8x8xf32>,
    %c0_111 = arith.constant 0 : index
    %c0_112 = arith.constant 0 : index
    %503 = vector.load %arg1[%c0_111, %c0_112] : memref<64x8xf32, #tpu.memory_space<vmem>>, vector<8x8xf32>
    %c0_113 = arith.constant 0 : index
    %c0_114 = arith.constant 0 : index
    %504 = vector.load %arg12[%c0_113, %c0_114] : memref<64x8xf32, #tpu.memory_space<vmem>>, vector<8x8xf32>
    %505 = arith.addf %503, %504 : vector<8x8xf32>
    %c8_115 = arith.constant 8 : index
    %c0_116 = arith.constant 0 : index
    %506 = vector.load %arg1[%c8_115, %c0_116] : memref<64x8xf32, #tpu.memory_space<vmem>>, vector<8x8xf32>
    %c8_117 = arith.constant 8 : index
    %c0_118 = arith.constant 0 : index
    %507 = vector.load %arg12[%c8_117, %c0_118] : memref<64x8xf32, #tpu.memory_space<vmem>>, vector<8x8xf32>
    %508 = arith.addf %506, %507 : vector<8x8xf32>
    %c16_119 = arith.constant 16 : index
    %c0_120 = arith.constant 0 : index
    %509 = vector.load %arg1[%c16_119, %c0_120] : memref<64x8xf32, #tpu.memory_space<vmem>>, vector<8x8xf32>
    %c16_121 = arith.constant 16 : index
    %c0_122 = arith.constant 0 : index
    %510 = vector.load %arg12[%c16_121, %c0_122] : memref<64x8xf32, #tpu.memory_space<vmem>>, vector<8x8xf32>
    %511 = arith.addf %509, %510 : vector<8x8xf32>
    %c24_123 = arith.constant 24 : index
    %c0_124 = arith.constant 0 : index
    %512 = vector.load %arg1[%c24_123, %c0_124] : memref<64x8xf32, #tpu.memory_space<vmem>>, vector<8x8xf32>
    %c24_125 = arith.constant 24 : index
    %c0_126 = arith.constant 0 : index
    %513 = vector.load %arg12[%c24_125, %c0_126] : memref<64x8xf32, #tpu.memory_space<vmem>>, vector<8x8xf32>
    %514 = arith.addf %512, %513 : vector<8x8xf32>
    %c32_127 = arith.constant 32 : index
    %c0_128 = arith.constant 0 : index
    %515 = vector.load %arg1[%c32_127, %c0_128] : memref<64x8xf32, #tpu.memory_space<vmem>>, vector<8x8xf32>
    %c32_129 = arith.constant 32 : index
    %c0_130 = arith.constant 0 : index
    %516 = vector.load %arg12[%c32_129, %c0_130] : memref<64x8xf32, #tpu.memory_space<vmem>>, vector<8x8xf32>
    %517 = arith.addf %515, %516 : vector<8x8xf32>
    %c40_131 = arith.constant 40 : index
    %c0_132 = arith.constant 0 : index
    %518 = vector.load %arg1[%c40_131, %c0_132] : memref<64x8xf32, #tpu.memory_space<vmem>>, vector<8x8xf32>
    %c40_133 = arith.constant 40 : index
    %c0_134 = arith.constant 0 : index
    %519 = vector.load %arg12[%c40_133, %c0_134] : memref<64x8xf32, #tpu.memory_space<vmem>>, vector<8x8xf32>
    %520 = arith.addf %518, %519 : vector<8x8xf32>
    %c48_135 = arith.constant 48 : index
    %c0_136 = arith.constant 0 : index
    %521 = vector.load %arg1[%c48_135, %c0_136] : memref<64x8xf32, #tpu.memory_space<vmem>>, vector<8x8xf32>
    %c48_137 = arith.constant 48 : index
    %c0_138 = arith.constant 0 : index
    %522 = vector.load %arg12[%c48_137, %c0_138] : memref<64x8xf32, #tpu.memory_space<vmem>>, vector<8x8xf32>
    %523 = arith.addf %521, %522 : vector<8x8xf32>
    %c56_139 = arith.constant 56 : index
    %c0_140 = arith.constant 0 : index
    %524 = vector.load %arg1[%c56_139, %c0_140] : memref<64x8xf32, #tpu.memory_space<vmem>>, vector<8x8xf32>
    %c56_141 = arith.constant 56 : index
    %c0_142 = arith.constant 0 : index
    %525 = vector.load %arg12[%c56_141, %c0_142] : memref<64x8xf32, #tpu.memory_space<vmem>>, vector<8x8xf32>
    %526 = arith.addf %524, %525 : vector<8x8xf32>
    %527 = arith.addf %505, %508 : vector<8x8xf32>
    %528 = arith.addf %527, %511 : vector<8x8xf32>
    %529 = arith.addf %528, %514 : vector<8x8xf32>
    %530 = arith.addf %529, %517 : vector<8x8xf32>
    %531 = arith.addf %530, %520 : vector<8x8xf32>
    %532 = arith.addf %531, %523 : vector<8x8xf32>
    %533 = arith.addf %532, %526 : vector<8x8xf32>
    %cst_143 = arith.constant 1.250000e-01 : f32
    %534 = vector.broadcast %cst_143 : f32 to vector<8x8xf32>
    %535 = arith.mulf %533, %534 : vector<8x8xf32>
    %536 = arith.subf %505, %535 : vector<8x8xf32>
    %537 = arith.subf %508, %535 : vector<8x8xf32>
    %538 = arith.subf %511, %535 : vector<8x8xf32>
    %539 = arith.subf %514, %535 : vector<8x8xf32>
    %540 = arith.subf %517, %535 : vector<8x8xf32>
    %541 = arith.subf %520, %535 : vector<8x8xf32>
    %542 = arith.subf %523, %535 : vector<8x8xf32>
    %543 = arith.subf %526, %535 : vector<8x8xf32>
    %544 = arith.mulf %536, %536 : vector<8x8xf32>
    %545 = arith.mulf %537, %537 : vector<8x8xf32>
    %546 = arith.addf %544, %545 : vector<8x8xf32>
    %547 = arith.mulf %538, %538 : vector<8x8xf32>
    %548 = arith.addf %546, %547 : vector<8x8xf32>
    %549 = arith.mulf %539, %539 : vector<8x8xf32>
    %550 = arith.addf %548, %549 : vector<8x8xf32>
    %551 = arith.mulf %540, %540 : vector<8x8xf32>
    %552 = arith.addf %550, %551 : vector<8x8xf32>
    %553 = arith.mulf %541, %541 : vector<8x8xf32>
    %554 = arith.addf %552, %553 : vector<8x8xf32>
    %555 = arith.mulf %542, %542 : vector<8x8xf32>
    %556 = arith.addf %554, %555 : vector<8x8xf32>
    %557 = arith.mulf %543, %543 : vector<8x8xf32>
    %558 = arith.addf %556, %557 : vector<8x8xf32>
    %cst_144 = arith.constant 1.250000e-01 : f32
    %559 = vector.broadcast %cst_144 : f32 to vector<8x8xf32>
    %560 = arith.mulf %558, %559 : vector<8x8xf32>
    %cst_145 = arith.constant 9.99999974E-6 : f32
    %561 = vector.broadcast %cst_145 : f32 to vector<8x8xf32>
    %562 = arith.addf %560, %561 : vector<8x8xf32>
    %563 = math.rsqrt %562 : vector<8x8xf32>
    %564 = arith.mulf %536, %563 : vector<8x8xf32>
    %c0_146 = arith.constant 0 : index
    %565 = memref.load %arg6[%c0_146] : memref<8xf32, #tpu.memory_space<smem>>
    %566 = vector.broadcast %565 : f32 to vector<8x8xf32>
    %567 = arith.mulf %564, %566 : vector<8x8xf32>
    %c0_147 = arith.constant 0 : index
    %568 = memref.load %arg7[%c0_147] : memref<8xf32, #tpu.memory_space<smem>>
    %569 = vector.broadcast %568 : f32 to vector<8x8xf32>
    %570 = arith.addf %567, %569 : vector<8x8xf32>
    %571 = arith.mulf %537, %563 : vector<8x8xf32>
    %c1 = arith.constant 1 : index
    %572 = memref.load %arg6[%c1] : memref<8xf32, #tpu.memory_space<smem>>
    %573 = vector.broadcast %572 : f32 to vector<8x8xf32>
    %574 = arith.mulf %571, %573 : vector<8x8xf32>
    %c1_148 = arith.constant 1 : index
    %575 = memref.load %arg7[%c1_148] : memref<8xf32, #tpu.memory_space<smem>>
    %576 = vector.broadcast %575 : f32 to vector<8x8xf32>
    %577 = arith.addf %574, %576 : vector<8x8xf32>
    %578 = arith.mulf %538, %563 : vector<8x8xf32>
    %c2 = arith.constant 2 : index
    %579 = memref.load %arg6[%c2] : memref<8xf32, #tpu.memory_space<smem>>
    %580 = vector.broadcast %579 : f32 to vector<8x8xf32>
    %581 = arith.mulf %578, %580 : vector<8x8xf32>
    %c2_149 = arith.constant 2 : index
    %582 = memref.load %arg7[%c2_149] : memref<8xf32, #tpu.memory_space<smem>>
    %583 = vector.broadcast %582 : f32 to vector<8x8xf32>
    %584 = arith.addf %581, %583 : vector<8x8xf32>
    %585 = arith.mulf %539, %563 : vector<8x8xf32>
    %c3 = arith.constant 3 : index
    %586 = memref.load %arg6[%c3] : memref<8xf32, #tpu.memory_space<smem>>
    %587 = vector.broadcast %586 : f32 to vector<8x8xf32>
    %588 = arith.mulf %585, %587 : vector<8x8xf32>
    %c3_150 = arith.constant 3 : index
    %589 = memref.load %arg7[%c3_150] : memref<8xf32, #tpu.memory_space<smem>>
    %590 = vector.broadcast %589 : f32 to vector<8x8xf32>
    %591 = arith.addf %588, %590 : vector<8x8xf32>
    %592 = arith.mulf %540, %563 : vector<8x8xf32>
    %c4 = arith.constant 4 : index
    %593 = memref.load %arg6[%c4] : memref<8xf32, #tpu.memory_space<smem>>
    %594 = vector.broadcast %593 : f32 to vector<8x8xf32>
    %595 = arith.mulf %592, %594 : vector<8x8xf32>
    %c4_151 = arith.constant 4 : index
    %596 = memref.load %arg7[%c4_151] : memref<8xf32, #tpu.memory_space<smem>>
    %597 = vector.broadcast %596 : f32 to vector<8x8xf32>
    %598 = arith.addf %595, %597 : vector<8x8xf32>
    %599 = arith.mulf %541, %563 : vector<8x8xf32>
    %c5 = arith.constant 5 : index
    %600 = memref.load %arg6[%c5] : memref<8xf32, #tpu.memory_space<smem>>
    %601 = vector.broadcast %600 : f32 to vector<8x8xf32>
    %602 = arith.mulf %599, %601 : vector<8x8xf32>
    %c5_152 = arith.constant 5 : index
    %603 = memref.load %arg7[%c5_152] : memref<8xf32, #tpu.memory_space<smem>>
    %604 = vector.broadcast %603 : f32 to vector<8x8xf32>
    %605 = arith.addf %602, %604 : vector<8x8xf32>
    %606 = arith.mulf %542, %563 : vector<8x8xf32>
    %c6 = arith.constant 6 : index
    %607 = memref.load %arg6[%c6] : memref<8xf32, #tpu.memory_space<smem>>
    %608 = vector.broadcast %607 : f32 to vector<8x8xf32>
    %609 = arith.mulf %606, %608 : vector<8x8xf32>
    %c6_153 = arith.constant 6 : index
    %610 = memref.load %arg7[%c6_153] : memref<8xf32, #tpu.memory_space<smem>>
    %611 = vector.broadcast %610 : f32 to vector<8x8xf32>
    %612 = arith.addf %609, %611 : vector<8x8xf32>
    %613 = arith.mulf %543, %563 : vector<8x8xf32>
    %c7 = arith.constant 7 : index
    %614 = memref.load %arg6[%c7] : memref<8xf32, #tpu.memory_space<smem>>
    %615 = vector.broadcast %614 : f32 to vector<8x8xf32>
    %616 = arith.mulf %613, %615 : vector<8x8xf32>
    %c7_154 = arith.constant 7 : index
    %617 = memref.load %arg7[%c7_154] : memref<8xf32, #tpu.memory_space<smem>>
    %618 = vector.broadcast %617 : f32 to vector<8x8xf32>
    %619 = arith.addf %616, %618 : vector<8x8xf32>
    %c0_155 = arith.constant 0 : index
    %c0_156 = arith.constant 0 : index
    %620 = vector.load %arg13[%c0_155, %c0_156] : memref<64x8xf32, #tpu.memory_space<vmem>>, vector<8x8xf32>
    tpu.vector_store %arg13[%c0_155, %c0_156], %570 {strides = array<i32>} : memref<64x8xf32, #tpu.memory_space<vmem>>, vector<8x8xf32>,
    %c8_157 = arith.constant 8 : index
    %c0_158 = arith.constant 0 : index
    %621 = vector.load %arg13[%c8_157, %c0_158] : memref<64x8xf32, #tpu.memory_space<vmem>>, vector<8x8xf32>
    tpu.vector_store %arg13[%c8_157, %c0_158], %577 {strides = array<i32>} : memref<64x8xf32, #tpu.memory_space<vmem>>, vector<8x8xf32>,
    %c16_159 = arith.constant 16 : index
    %c0_160 = arith.constant 0 : index
    %622 = vector.load %arg13[%c16_159, %c0_160] : memref<64x8xf32, #tpu.memory_space<vmem>>, vector<8x8xf32>
    tpu.vector_store %arg13[%c16_159, %c0_160], %584 {strides = array<i32>} : memref<64x8xf32, #tpu.memory_space<vmem>>, vector<8x8xf32>,
    %c24_161 = arith.constant 24 : index
    %c0_162 = arith.constant 0 : index
    %623 = vector.load %arg13[%c24_161, %c0_162] : memref<64x8xf32, #tpu.memory_space<vmem>>, vector<8x8xf32>
    tpu.vector_store %arg13[%c24_161, %c0_162], %591 {strides = array<i32>} : memref<64x8xf32, #tpu.memory_space<vmem>>, vector<8x8xf32>,
    %c32_163 = arith.constant 32 : index
    %c0_164 = arith.constant 0 : index
    %624 = vector.load %arg13[%c32_163, %c0_164] : memref<64x8xf32, #tpu.memory_space<vmem>>, vector<8x8xf32>
    tpu.vector_store %arg13[%c32_163, %c0_164], %598 {strides = array<i32>} : memref<64x8xf32, #tpu.memory_space<vmem>>, vector<8x8xf32>,
    %c40_165 = arith.constant 40 : index
    %c0_166 = arith.constant 0 : index
    %625 = vector.load %arg13[%c40_165, %c0_166] : memref<64x8xf32, #tpu.memory_space<vmem>>, vector<8x8xf32>
    tpu.vector_store %arg13[%c40_165, %c0_166], %605 {strides = array<i32>} : memref<64x8xf32, #tpu.memory_space<vmem>>, vector<8x8xf32>,
    %c48_167 = arith.constant 48 : index
    %c0_168 = arith.constant 0 : index
    %626 = vector.load %arg13[%c48_167, %c0_168] : memref<64x8xf32, #tpu.memory_space<vmem>>, vector<8x8xf32>
    tpu.vector_store %arg13[%c48_167, %c0_168], %612 {strides = array<i32>} : memref<64x8xf32, #tpu.memory_space<vmem>>, vector<8x8xf32>,
    %c56_169 = arith.constant 56 : index
    %c0_170 = arith.constant 0 : index
    %627 = vector.load %arg13[%c56_169, %c0_170] : memref<64x8xf32, #tpu.memory_space<vmem>>, vector<8x8xf32>
    tpu.vector_store %arg13[%c56_169, %c0_170], %619 {strides = array<i32>} : memref<64x8xf32, #tpu.memory_space<vmem>>, vector<8x8xf32>,
    %c0_171 = arith.constant 0 : index
    %c0_172 = arith.constant 0 : index
    %628 = vector.load %arg13[%c0_171, %c0_172] : memref<64x8xf32, #tpu.memory_space<vmem>>, vector<64x8xf32>
    %c0_173 = arith.constant 0 : index
    %c0_174 = arith.constant 0 : index
    %629 = vector.load %arg4[%c0_173, %c0_174] : memref<8x32xf32, #tpu.memory_space<vmem>>, vector<8x32xf32>
    %cst_175 = arith.constant dense<0.000000e+00> : vector<64x32xf32>
    %630 = tpu.matmul %628, %629, %cst_175 {dimension_numbers = #tpu.dot_dimension_numbers<[1], [0], [0], [1], [0, 0, 1, 1], [], []>} : vector<64x8xf32>, vector<8x32xf32>, vector<64x32xf32> -> vector<64x32xf32>
    %cst_176 = arith.constant 0.000000e+00 : f32
    %631 = vector.broadcast %cst_176 : f32 to vector<8x32xf32>
    %632 = vector.extract_strided_slice %630 {offsets = [0, 0], sizes = [8, 32], strides = [1, 1]} : vector<64x32xf32> to vector<8x32xf32>
    %cst_177 = arith.constant 1.000000e+00 : f32
    %633 = vector.broadcast %cst_177 : f32 to vector<8x32xf32>
    %634 = arith.cmpf ogt, %631, %633 : vector<8x32xf32>
    %635 = arith.extui %634 : vector<8x32xi1> to vector<8x32xi32>
    %636 = arith.sitofp %635 : vector<8x32xi32> to vector<8x32xf32>
    %cst_178 = arith.constant 0.899999976 : f32
    %637 = vector.broadcast %cst_178 : f32 to vector<8x32xf32>
    %638 = arith.mulf %637, %631 : vector<8x32xf32>
    %639 = arith.addf %638, %632 : vector<8x32xf32>
    %cst_179 = arith.constant 1.000000e+00 : f32
    %640 = vector.broadcast %cst_179 : f32 to vector<8x32xf32>
    %641 = arith.mulf %636, %640 : vector<8x32xf32>
    %642 = arith.subf %639, %641 : vector<8x32xf32>
    %cst_180 = arith.constant 1.000000e+00 : f32
    %643 = vector.broadcast %cst_180 : f32 to vector<8x32xf32>
    %644 = arith.cmpf ogt, %642, %643 : vector<8x32xf32>
    %645 = arith.extui %644 : vector<8x32xi1> to vector<8x32xi32>
    %646 = arith.sitofp %645 : vector<8x32xi32> to vector<8x32xf32>
    %c0_181 = arith.constant 0 : index
    %c0_182 = arith.constant 0 : index
    %647 = vector.load %arg14[%c0_181, %c0_182] : memref<64x32xf32, #tpu.memory_space<vmem>>, vector<8x32xf32>
    tpu.vector_store %arg14[%c0_181, %c0_182], %646 {strides = array<i32>} : memref<64x32xf32, #tpu.memory_space<vmem>>, vector<8x32xf32>,
    %648 = vector.extract_strided_slice %630 {offsets = [8, 0], sizes = [8, 32], strides = [1, 1]} : vector<64x32xf32> to vector<8x32xf32>
    %cst_183 = arith.constant 1.000000e+00 : f32
    %649 = vector.broadcast %cst_183 : f32 to vector<8x32xf32>
    %650 = arith.cmpf ogt, %642, %649 : vector<8x32xf32>
    %651 = arith.extui %650 : vector<8x32xi1> to vector<8x32xi32>
    %652 = arith.sitofp %651 : vector<8x32xi32> to vector<8x32xf32>
    %cst_184 = arith.constant 0.899999976 : f32
    %653 = vector.broadcast %cst_184 : f32 to vector<8x32xf32>
    %654 = arith.mulf %653, %642 : vector<8x32xf32>
    %655 = arith.addf %654, %648 : vector<8x32xf32>
    %cst_185 = arith.constant 1.000000e+00 : f32
    %656 = vector.broadcast %cst_185 : f32 to vector<8x32xf32>
    %657 = arith.mulf %652, %656 : vector<8x32xf32>
    %658 = arith.subf %655, %657 : vector<8x32xf32>
    %cst_186 = arith.constant 1.000000e+00 : f32
    %659 = vector.broadcast %cst_186 : f32 to vector<8x32xf32>
    %660 = arith.cmpf ogt, %658, %659 : vector<8x32xf32>
    %661 = arith.extui %660 : vector<8x32xi1> to vector<8x32xi32>
    %662 = arith.sitofp %661 : vector<8x32xi32> to vector<8x32xf32>
    %c8_187 = arith.constant 8 : index
    %c0_188 = arith.constant 0 : index
    %663 = vector.load %arg14[%c8_187, %c0_188] : memref<64x32xf32, #tpu.memory_space<vmem>>, vector<8x32xf32>
    tpu.vector_store %arg14[%c8_187, %c0_188], %662 {strides = array<i32>} : memref<64x32xf32, #tpu.memory_space<vmem>>, vector<8x32xf32>,
    %664 = vector.extract_strided_slice %630 {offsets = [16, 0], sizes = [8, 32], strides = [1, 1]} : vector<64x32xf32> to vector<8x32xf32>
    %cst_189 = arith.constant 1.000000e+00 : f32
    %665 = vector.broadcast %cst_189 : f32 to vector<8x32xf32>
    %666 = arith.cmpf ogt, %658, %665 : vector<8x32xf32>
    %667 = arith.extui %666 : vector<8x32xi1> to vector<8x32xi32>
    %668 = arith.sitofp %667 : vector<8x32xi32> to vector<8x32xf32>
    %cst_190 = arith.constant 0.899999976 : f32
    %669 = vector.broadcast %cst_190 : f32 to vector<8x32xf32>
    %670 = arith.mulf %669, %658 : vector<8x32xf32>
    %671 = arith.addf %670, %664 : vector<8x32xf32>
    %cst_191 = arith.constant 1.000000e+00 : f32
    %672 = vector.broadcast %cst_191 : f32 to vector<8x32xf32>
    %673 = arith.mulf %668, %672 : vector<8x32xf32>
    %674 = arith.subf %671, %673 : vector<8x32xf32>
    %cst_192 = arith.constant 1.000000e+00 : f32
    %675 = vector.broadcast %cst_192 : f32 to vector<8x32xf32>
    %676 = arith.cmpf ogt, %674, %675 : vector<8x32xf32>
    %677 = arith.extui %676 : vector<8x32xi1> to vector<8x32xi32>
    %678 = arith.sitofp %677 : vector<8x32xi32> to vector<8x32xf32>
    %c16_193 = arith.constant 16 : index
    %c0_194 = arith.constant 0 : index
    %679 = vector.load %arg14[%c16_193, %c0_194] : memref<64x32xf32, #tpu.memory_space<vmem>>, vector<8x32xf32>
    tpu.vector_store %arg14[%c16_193, %c0_194], %678 {strides = array<i32>} : memref<64x32xf32, #tpu.memory_space<vmem>>, vector<8x32xf32>,
    %680 = vector.extract_strided_slice %630 {offsets = [24, 0], sizes = [8, 32], strides = [1, 1]} : vector<64x32xf32> to vector<8x32xf32>
    %cst_195 = arith.constant 1.000000e+00 : f32
    %681 = vector.broadcast %cst_195 : f32 to vector<8x32xf32>
    %682 = arith.cmpf ogt, %674, %681 : vector<8x32xf32>
    %683 = arith.extui %682 : vector<8x32xi1> to vector<8x32xi32>
    %684 = arith.sitofp %683 : vector<8x32xi32> to vector<8x32xf32>
    %cst_196 = arith.constant 0.899999976 : f32
    %685 = vector.broadcast %cst_196 : f32 to vector<8x32xf32>
    %686 = arith.mulf %685, %674 : vector<8x32xf32>
    %687 = arith.addf %686, %680 : vector<8x32xf32>
    %cst_197 = arith.constant 1.000000e+00 : f32
    %688 = vector.broadcast %cst_197 : f32 to vector<8x32xf32>
    %689 = arith.mulf %684, %688 : vector<8x32xf32>
    %690 = arith.subf %687, %689 : vector<8x32xf32>
    %cst_198 = arith.constant 1.000000e+00 : f32
    %691 = vector.broadcast %cst_198 : f32 to vector<8x32xf32>
    %692 = arith.cmpf ogt, %690, %691 : vector<8x32xf32>
    %693 = arith.extui %692 : vector<8x32xi1> to vector<8x32xi32>
    %694 = arith.sitofp %693 : vector<8x32xi32> to vector<8x32xf32>
    %c24_199 = arith.constant 24 : index
    %c0_200 = arith.constant 0 : index
    %695 = vector.load %arg14[%c24_199, %c0_200] : memref<64x32xf32, #tpu.memory_space<vmem>>, vector<8x32xf32>
    tpu.vector_store %arg14[%c24_199, %c0_200], %694 {strides = array<i32>} : memref<64x32xf32, #tpu.memory_space<vmem>>, vector<8x32xf32>,
    %696 = vector.extract_strided_slice %630 {offsets = [32, 0], sizes = [8, 32], strides = [1, 1]} : vector<64x32xf32> to vector<8x32xf32>
    %cst_201 = arith.constant 1.000000e+00 : f32
    %697 = vector.broadcast %cst_201 : f32 to vector<8x32xf32>
    %698 = arith.cmpf ogt, %690, %697 : vector<8x32xf32>
    %699 = arith.extui %698 : vector<8x32xi1> to vector<8x32xi32>
    %700 = arith.sitofp %699 : vector<8x32xi32> to vector<8x32xf32>
    %cst_202 = arith.constant 0.899999976 : f32
    %701 = vector.broadcast %cst_202 : f32 to vector<8x32xf32>
    %702 = arith.mulf %701, %690 : vector<8x32xf32>
    %703 = arith.addf %702, %696 : vector<8x32xf32>
    %cst_203 = arith.constant 1.000000e+00 : f32
    %704 = vector.broadcast %cst_203 : f32 to vector<8x32xf32>
    %705 = arith.mulf %700, %704 : vector<8x32xf32>
    %706 = arith.subf %703, %705 : vector<8x32xf32>
    %cst_204 = arith.constant 1.000000e+00 : f32
    %707 = vector.broadcast %cst_204 : f32 to vector<8x32xf32>
    %708 = arith.cmpf ogt, %706, %707 : vector<8x32xf32>
    %709 = arith.extui %708 : vector<8x32xi1> to vector<8x32xi32>
    %710 = arith.sitofp %709 : vector<8x32xi32> to vector<8x32xf32>
    %c32_205 = arith.constant 32 : index
    %c0_206 = arith.constant 0 : index
    %711 = vector.load %arg14[%c32_205, %c0_206] : memref<64x32xf32, #tpu.memory_space<vmem>>, vector<8x32xf32>
    tpu.vector_store %arg14[%c32_205, %c0_206], %710 {strides = array<i32>} : memref<64x32xf32, #tpu.memory_space<vmem>>, vector<8x32xf32>,
    %712 = vector.extract_strided_slice %630 {offsets = [40, 0], sizes = [8, 32], strides = [1, 1]} : vector<64x32xf32> to vector<8x32xf32>
    %cst_207 = arith.constant 1.000000e+00 : f32
    %713 = vector.broadcast %cst_207 : f32 to vector<8x32xf32>
    %714 = arith.cmpf ogt, %706, %713 : vector<8x32xf32>
    %715 = arith.extui %714 : vector<8x32xi1> to vector<8x32xi32>
    %716 = arith.sitofp %715 : vector<8x32xi32> to vector<8x32xf32>
    %cst_208 = arith.constant 0.899999976 : f32
    %717 = vector.broadcast %cst_208 : f32 to vector<8x32xf32>
    %718 = arith.mulf %717, %706 : vector<8x32xf32>
    %719 = arith.addf %718, %712 : vector<8x32xf32>
    %cst_209 = arith.constant 1.000000e+00 : f32
    %720 = vector.broadcast %cst_209 : f32 to vector<8x32xf32>
    %721 = arith.mulf %716, %720 : vector<8x32xf32>
    %722 = arith.subf %719, %721 : vector<8x32xf32>
    %cst_210 = arith.constant 1.000000e+00 : f32
    %723 = vector.broadcast %cst_210 : f32 to vector<8x32xf32>
    %724 = arith.cmpf ogt, %722, %723 : vector<8x32xf32>
    %725 = arith.extui %724 : vector<8x32xi1> to vector<8x32xi32>
    %726 = arith.sitofp %725 : vector<8x32xi32> to vector<8x32xf32>
    %c40_211 = arith.constant 40 : index
    %c0_212 = arith.constant 0 : index
    %727 = vector.load %arg14[%c40_211, %c0_212] : memref<64x32xf32, #tpu.memory_space<vmem>>, vector<8x32xf32>
    tpu.vector_store %arg14[%c40_211, %c0_212], %726 {strides = array<i32>} : memref<64x32xf32, #tpu.memory_space<vmem>>, vector<8x32xf32>,
    %728 = vector.extract_strided_slice %630 {offsets = [48, 0], sizes = [8, 32], strides = [1, 1]} : vector<64x32xf32> to vector<8x32xf32>
    %cst_213 = arith.constant 1.000000e+00 : f32
    %729 = vector.broadcast %cst_213 : f32 to vector<8x32xf32>
    %730 = arith.cmpf ogt, %722, %729 : vector<8x32xf32>
    %731 = arith.extui %730 : vector<8x32xi1> to vector<8x32xi32>
    %732 = arith.sitofp %731 : vector<8x32xi32> to vector<8x32xf32>
    %cst_214 = arith.constant 0.899999976 : f32
    %733 = vector.broadcast %cst_214 : f32 to vector<8x32xf32>
    %734 = arith.mulf %733, %722 : vector<8x32xf32>
    %735 = arith.addf %734, %728 : vector<8x32xf32>
    %cst_215 = arith.constant 1.000000e+00 : f32
    %736 = vector.broadcast %cst_215 : f32 to vector<8x32xf32>
    %737 = arith.mulf %732, %736 : vector<8x32xf32>
    %738 = arith.subf %735, %737 : vector<8x32xf32>
    %cst_216 = arith.constant 1.000000e+00 : f32
    %739 = vector.broadcast %cst_216 : f32 to vector<8x32xf32>
    %740 = arith.cmpf ogt, %738, %739 : vector<8x32xf32>
    %741 = arith.extui %740 : vector<8x32xi1> to vector<8x32xi32>
    %742 = arith.sitofp %741 : vector<8x32xi32> to vector<8x32xf32>
    %c48_217 = arith.constant 48 : index
    %c0_218 = arith.constant 0 : index
    %743 = vector.load %arg14[%c48_217, %c0_218] : memref<64x32xf32, #tpu.memory_space<vmem>>, vector<8x32xf32>
    tpu.vector_store %arg14[%c48_217, %c0_218], %742 {strides = array<i32>} : memref<64x32xf32, #tpu.memory_space<vmem>>, vector<8x32xf32>,
    %744 = vector.extract_strided_slice %630 {offsets = [56, 0], sizes = [8, 32], strides = [1, 1]} : vector<64x32xf32> to vector<8x32xf32>
    %cst_219 = arith.constant 1.000000e+00 : f32
    %745 = vector.broadcast %cst_219 : f32 to vector<8x32xf32>
    %746 = arith.cmpf ogt, %738, %745 : vector<8x32xf32>
    %747 = arith.extui %746 : vector<8x32xi1> to vector<8x32xi32>
    %748 = arith.sitofp %747 : vector<8x32xi32> to vector<8x32xf32>
    %cst_220 = arith.constant 0.899999976 : f32
    %749 = vector.broadcast %cst_220 : f32 to vector<8x32xf32>
    %750 = arith.mulf %749, %738 : vector<8x32xf32>
    %751 = arith.addf %750, %744 : vector<8x32xf32>
    %cst_221 = arith.constant 1.000000e+00 : f32
    %752 = vector.broadcast %cst_221 : f32 to vector<8x32xf32>
    %753 = arith.mulf %748, %752 : vector<8x32xf32>
    %754 = arith.subf %751, %753 : vector<8x32xf32>
    %cst_222 = arith.constant 1.000000e+00 : f32
    %755 = vector.broadcast %cst_222 : f32 to vector<8x32xf32>
    %756 = arith.cmpf ogt, %754, %755 : vector<8x32xf32>
    %757 = arith.extui %756 : vector<8x32xi1> to vector<8x32xi32>
    %758 = arith.sitofp %757 : vector<8x32xi32> to vector<8x32xf32>
    %c56_223 = arith.constant 56 : index
    %c0_224 = arith.constant 0 : index
    %759 = vector.load %arg14[%c56_223, %c0_224] : memref<64x32xf32, #tpu.memory_space<vmem>>, vector<8x32xf32>
    tpu.vector_store %arg14[%c56_223, %c0_224], %758 {strides = array<i32>} : memref<64x32xf32, #tpu.memory_space<vmem>>, vector<8x32xf32>,
    %c0_225 = arith.constant 0 : index
    %c0_226 = arith.constant 0 : index
    %760 = vector.load %arg14[%c0_225, %c0_226] : memref<64x32xf32, #tpu.memory_space<vmem>>, vector<64x32xf32>
    %c0_227 = arith.constant 0 : index
    %c0_228 = arith.constant 0 : index
    %761 = vector.load %arg5[%c0_227, %c0_228] : memref<32x8xf32, #tpu.memory_space<vmem>>, vector<32x8xf32>
    %cst_229 = arith.constant dense<0.000000e+00> : vector<64x8xf32>
    %762 = tpu.matmul %760, %761, %cst_229 {dimension_numbers = #tpu.dot_dimension_numbers<[1], [0], [0], [1], [0, 0, 1, 1], [], []>} : vector<64x32xf32>, vector<32x8xf32>, vector<64x8xf32> -> vector<64x8xf32>
    %cst_230 = arith.constant 0.000000e+00 : f32
    %763 = vector.broadcast %cst_230 : f32 to vector<8x8xf32>
    %764 = vector.extract_strided_slice %762 {offsets = [0, 0], sizes = [8, 8], strides = [1, 1]} : vector<64x8xf32> to vector<8x8xf32>
    %cst_231 = arith.constant 1.000000e+00 : f32
    %765 = vector.broadcast %cst_231 : f32 to vector<8x8xf32>
    %766 = arith.cmpf ogt, %763, %765 : vector<8x8xf32>
    %767 = arith.extui %766 : vector<8x8xi1> to vector<8x8xi32>
    %768 = arith.sitofp %767 : vector<8x8xi32> to vector<8x8xf32>
    %cst_232 = arith.constant 0.899999976 : f32
    %769 = vector.broadcast %cst_232 : f32 to vector<8x8xf32>
    %770 = arith.mulf %769, %763 : vector<8x8xf32>
    %771 = arith.addf %770, %764 : vector<8x8xf32>
    %cst_233 = arith.constant 1.000000e+00 : f32
    %772 = vector.broadcast %cst_233 : f32 to vector<8x8xf32>
    %773 = arith.mulf %768, %772 : vector<8x8xf32>
    %774 = arith.subf %771, %773 : vector<8x8xf32>
    %cst_234 = arith.constant 1.000000e+00 : f32
    %775 = vector.broadcast %cst_234 : f32 to vector<8x8xf32>
    %776 = arith.cmpf ogt, %774, %775 : vector<8x8xf32>
    %777 = arith.extui %776 : vector<8x8xi1> to vector<8x8xi32>
    %778 = arith.sitofp %777 : vector<8x8xi32> to vector<8x8xf32>
    %c0_235 = arith.constant 0 : index
    %c0_236 = arith.constant 0 : index
    %779 = vector.load %arg15[%c0_235, %c0_236] : memref<64x8xf32, #tpu.memory_space<vmem>>, vector<8x8xf32>
    tpu.vector_store %arg15[%c0_235, %c0_236], %778 {strides = array<i32>} : memref<64x8xf32, #tpu.memory_space<vmem>>, vector<8x8xf32>,
    %780 = vector.extract_strided_slice %762 {offsets = [8, 0], sizes = [8, 8], strides = [1, 1]} : vector<64x8xf32> to vector<8x8xf32>
    %cst_237 = arith.constant 1.000000e+00 : f32
    %781 = vector.broadcast %cst_237 : f32 to vector<8x8xf32>
    %782 = arith.cmpf ogt, %774, %781 : vector<8x8xf32>
    %783 = arith.extui %782 : vector<8x8xi1> to vector<8x8xi32>
    %784 = arith.sitofp %783 : vector<8x8xi32> to vector<8x8xf32>
    %cst_238 = arith.constant 0.899999976 : f32
    %785 = vector.broadcast %cst_238 : f32 to vector<8x8xf32>
    %786 = arith.mulf %785, %774 : vector<8x8xf32>
    %787 = arith.addf %786, %780 : vector<8x8xf32>
    %cst_239 = arith.constant 1.000000e+00 : f32
    %788 = vector.broadcast %cst_239 : f32 to vector<8x8xf32>
    %789 = arith.mulf %784, %788 : vector<8x8xf32>
    %790 = arith.subf %787, %789 : vector<8x8xf32>
    %cst_240 = arith.constant 1.000000e+00 : f32
    %791 = vector.broadcast %cst_240 : f32 to vector<8x8xf32>
    %792 = arith.cmpf ogt, %790, %791 : vector<8x8xf32>
    %793 = arith.extui %792 : vector<8x8xi1> to vector<8x8xi32>
    %794 = arith.sitofp %793 : vector<8x8xi32> to vector<8x8xf32>
    %c8_241 = arith.constant 8 : index
    %c0_242 = arith.constant 0 : index
    %795 = vector.load %arg15[%c8_241, %c0_242] : memref<64x8xf32, #tpu.memory_space<vmem>>, vector<8x8xf32>
    tpu.vector_store %arg15[%c8_241, %c0_242], %794 {strides = array<i32>} : memref<64x8xf32, #tpu.memory_space<vmem>>, vector<8x8xf32>,
    %796 = vector.extract_strided_slice %762 {offsets = [16, 0], sizes = [8, 8], strides = [1, 1]} : vector<64x8xf32> to vector<8x8xf32>
    %cst_243 = arith.constant 1.000000e+00 : f32
    %797 = vector.broadcast %cst_243 : f32 to vector<8x8xf32>
    %798 = arith.cmpf ogt, %790, %797 : vector<8x8xf32>
    %799 = arith.extui %798 : vector<8x8xi1> to vector<8x8xi32>
    %800 = arith.sitofp %799 : vector<8x8xi32> to vector<8x8xf32>
    %cst_244 = arith.constant 0.899999976 : f32
    %801 = vector.broadcast %cst_244 : f32 to vector<8x8xf32>
    %802 = arith.mulf %801, %790 : vector<8x8xf32>
    %803 = arith.addf %802, %796 : vector<8x8xf32>
    %cst_245 = arith.constant 1.000000e+00 : f32
    %804 = vector.broadcast %cst_245 : f32 to vector<8x8xf32>
    %805 = arith.mulf %800, %804 : vector<8x8xf32>
    %806 = arith.subf %803, %805 : vector<8x8xf32>
    %cst_246 = arith.constant 1.000000e+00 : f32
    %807 = vector.broadcast %cst_246 : f32 to vector<8x8xf32>
    %808 = arith.cmpf ogt, %806, %807 : vector<8x8xf32>
    %809 = arith.extui %808 : vector<8x8xi1> to vector<8x8xi32>
    %810 = arith.sitofp %809 : vector<8x8xi32> to vector<8x8xf32>
    %c16_247 = arith.constant 16 : index
    %c0_248 = arith.constant 0 : index
    %811 = vector.load %arg15[%c16_247, %c0_248] : memref<64x8xf32, #tpu.memory_space<vmem>>, vector<8x8xf32>
    tpu.vector_store %arg15[%c16_247, %c0_248], %810 {strides = array<i32>} : memref<64x8xf32, #tpu.memory_space<vmem>>, vector<8x8xf32>,
    %812 = vector.extract_strided_slice %762 {offsets = [24, 0], sizes = [8, 8], strides = [1, 1]} : vector<64x8xf32> to vector<8x8xf32>
    %cst_249 = arith.constant 1.000000e+00 : f32
    %813 = vector.broadcast %cst_249 : f32 to vector<8x8xf32>
    %814 = arith.cmpf ogt, %806, %813 : vector<8x8xf32>
    %815 = arith.extui %814 : vector<8x8xi1> to vector<8x8xi32>
    %816 = arith.sitofp %815 : vector<8x8xi32> to vector<8x8xf32>
    %cst_250 = arith.constant 0.899999976 : f32
    %817 = vector.broadcast %cst_250 : f32 to vector<8x8xf32>
    %818 = arith.mulf %817, %806 : vector<8x8xf32>
    %819 = arith.addf %818, %812 : vector<8x8xf32>
    %cst_251 = arith.constant 1.000000e+00 : f32
    %820 = vector.broadcast %cst_251 : f32 to vector<8x8xf32>
    %821 = arith.mulf %816, %820 : vector<8x8xf32>
    %822 = arith.subf %819, %821 : vector<8x8xf32>
    %cst_252 = arith.constant 1.000000e+00 : f32
    %823 = vector.broadcast %cst_252 : f32 to vector<8x8xf32>
    %824 = arith.cmpf ogt, %822, %823 : vector<8x8xf32>
    %825 = arith.extui %824 : vector<8x8xi1> to vector<8x8xi32>
    %826 = arith.sitofp %825 : vector<8x8xi32> to vector<8x8xf32>
    %c24_253 = arith.constant 24 : index
    %c0_254 = arith.constant 0 : index
    %827 = vector.load %arg15[%c24_253, %c0_254] : memref<64x8xf32, #tpu.memory_space<vmem>>, vector<8x8xf32>
    tpu.vector_store %arg15[%c24_253, %c0_254], %826 {strides = array<i32>} : memref<64x8xf32, #tpu.memory_space<vmem>>, vector<8x8xf32>,
    %828 = vector.extract_strided_slice %762 {offsets = [32, 0], sizes = [8, 8], strides = [1, 1]} : vector<64x8xf32> to vector<8x8xf32>
    %cst_255 = arith.constant 1.000000e+00 : f32
    %829 = vector.broadcast %cst_255 : f32 to vector<8x8xf32>
    %830 = arith.cmpf ogt, %822, %829 : vector<8x8xf32>
    %831 = arith.extui %830 : vector<8x8xi1> to vector<8x8xi32>
    %832 = arith.sitofp %831 : vector<8x8xi32> to vector<8x8xf32>
    %cst_256 = arith.constant 0.899999976 : f32
    %833 = vector.broadcast %cst_256 : f32 to vector<8x8xf32>
    %834 = arith.mulf %833, %822 : vector<8x8xf32>
    %835 = arith.addf %834, %828 : vector<8x8xf32>
    %cst_257 = arith.constant 1.000000e+00 : f32
    %836 = vector.broadcast %cst_257 : f32 to vector<8x8xf32>
    %837 = arith.mulf %832, %836 : vector<8x8xf32>
    %838 = arith.subf %835, %837 : vector<8x8xf32>
    %cst_258 = arith.constant 1.000000e+00 : f32
    %839 = vector.broadcast %cst_258 : f32 to vector<8x8xf32>
    %840 = arith.cmpf ogt, %838, %839 : vector<8x8xf32>
    %841 = arith.extui %840 : vector<8x8xi1> to vector<8x8xi32>
    %842 = arith.sitofp %841 : vector<8x8xi32> to vector<8x8xf32>
    %c32_259 = arith.constant 32 : index
    %c0_260 = arith.constant 0 : index
    %843 = vector.load %arg15[%c32_259, %c0_260] : memref<64x8xf32, #tpu.memory_space<vmem>>, vector<8x8xf32>
    tpu.vector_store %arg15[%c32_259, %c0_260], %842 {strides = array<i32>} : memref<64x8xf32, #tpu.memory_space<vmem>>, vector<8x8xf32>,
    %844 = vector.extract_strided_slice %762 {offsets = [40, 0], sizes = [8, 8], strides = [1, 1]} : vector<64x8xf32> to vector<8x8xf32>
    %cst_261 = arith.constant 1.000000e+00 : f32
    %845 = vector.broadcast %cst_261 : f32 to vector<8x8xf32>
    %846 = arith.cmpf ogt, %838, %845 : vector<8x8xf32>
    %847 = arith.extui %846 : vector<8x8xi1> to vector<8x8xi32>
    %848 = arith.sitofp %847 : vector<8x8xi32> to vector<8x8xf32>
    %cst_262 = arith.constant 0.899999976 : f32
    %849 = vector.broadcast %cst_262 : f32 to vector<8x8xf32>
    %850 = arith.mulf %849, %838 : vector<8x8xf32>
    %851 = arith.addf %850, %844 : vector<8x8xf32>
    %cst_263 = arith.constant 1.000000e+00 : f32
    %852 = vector.broadcast %cst_263 : f32 to vector<8x8xf32>
    %853 = arith.mulf %848, %852 : vector<8x8xf32>
    %854 = arith.subf %851, %853 : vector<8x8xf32>
    %cst_264 = arith.constant 1.000000e+00 : f32
    %855 = vector.broadcast %cst_264 : f32 to vector<8x8xf32>
    %856 = arith.cmpf ogt, %854, %855 : vector<8x8xf32>
    %857 = arith.extui %856 : vector<8x8xi1> to vector<8x8xi32>
    %858 = arith.sitofp %857 : vector<8x8xi32> to vector<8x8xf32>
    %c40_265 = arith.constant 40 : index
    %c0_266 = arith.constant 0 : index
    %859 = vector.load %arg15[%c40_265, %c0_266] : memref<64x8xf32, #tpu.memory_space<vmem>>, vector<8x8xf32>
    tpu.vector_store %arg15[%c40_265, %c0_266], %858 {strides = array<i32>} : memref<64x8xf32, #tpu.memory_space<vmem>>, vector<8x8xf32>,
    %860 = vector.extract_strided_slice %762 {offsets = [48, 0], sizes = [8, 8], strides = [1, 1]} : vector<64x8xf32> to vector<8x8xf32>
    %cst_267 = arith.constant 1.000000e+00 : f32
    %861 = vector.broadcast %cst_267 : f32 to vector<8x8xf32>
    %862 = arith.cmpf ogt, %854, %861 : vector<8x8xf32>
    %863 = arith.extui %862 : vector<8x8xi1> to vector<8x8xi32>
    %864 = arith.sitofp %863 : vector<8x8xi32> to vector<8x8xf32>
    %cst_268 = arith.constant 0.899999976 : f32
    %865 = vector.broadcast %cst_268 : f32 to vector<8x8xf32>
    %866 = arith.mulf %865, %854 : vector<8x8xf32>
    %867 = arith.addf %866, %860 : vector<8x8xf32>
    %cst_269 = arith.constant 1.000000e+00 : f32
    %868 = vector.broadcast %cst_269 : f32 to vector<8x8xf32>
    %869 = arith.mulf %864, %868 : vector<8x8xf32>
    %870 = arith.subf %867, %869 : vector<8x8xf32>
    %cst_270 = arith.constant 1.000000e+00 : f32
    %871 = vector.broadcast %cst_270 : f32 to vector<8x8xf32>
    %872 = arith.cmpf ogt, %870, %871 : vector<8x8xf32>
    %873 = arith.extui %872 : vector<8x8xi1> to vector<8x8xi32>
    %874 = arith.sitofp %873 : vector<8x8xi32> to vector<8x8xf32>
    %c48_271 = arith.constant 48 : index
    %c0_272 = arith.constant 0 : index
    %875 = vector.load %arg15[%c48_271, %c0_272] : memref<64x8xf32, #tpu.memory_space<vmem>>, vector<8x8xf32>
    tpu.vector_store %arg15[%c48_271, %c0_272], %874 {strides = array<i32>} : memref<64x8xf32, #tpu.memory_space<vmem>>, vector<8x8xf32>,
    %876 = vector.extract_strided_slice %762 {offsets = [56, 0], sizes = [8, 8], strides = [1, 1]} : vector<64x8xf32> to vector<8x8xf32>
    %cst_273 = arith.constant 1.000000e+00 : f32
    %877 = vector.broadcast %cst_273 : f32 to vector<8x8xf32>
    %878 = arith.cmpf ogt, %870, %877 : vector<8x8xf32>
    %879 = arith.extui %878 : vector<8x8xi1> to vector<8x8xi32>
    %880 = arith.sitofp %879 : vector<8x8xi32> to vector<8x8xf32>
    %cst_274 = arith.constant 0.899999976 : f32
    %881 = vector.broadcast %cst_274 : f32 to vector<8x8xf32>
    %882 = arith.mulf %881, %870 : vector<8x8xf32>
    %883 = arith.addf %882, %876 : vector<8x8xf32>
    %cst_275 = arith.constant 1.000000e+00 : f32
    %884 = vector.broadcast %cst_275 : f32 to vector<8x8xf32>
    %885 = arith.mulf %880, %884 : vector<8x8xf32>
    %886 = arith.subf %883, %885 : vector<8x8xf32>
    %cst_276 = arith.constant 1.000000e+00 : f32
    %887 = vector.broadcast %cst_276 : f32 to vector<8x8xf32>
    %888 = arith.cmpf ogt, %886, %887 : vector<8x8xf32>
    %889 = arith.extui %888 : vector<8x8xi1> to vector<8x8xi32>
    %890 = arith.sitofp %889 : vector<8x8xi32> to vector<8x8xf32>
    %c56_277 = arith.constant 56 : index
    %c0_278 = arith.constant 0 : index
    %891 = vector.load %arg15[%c56_277, %c0_278] : memref<64x8xf32, #tpu.memory_space<vmem>>, vector<8x8xf32>
    tpu.vector_store %arg15[%c56_277, %c0_278], %890 {strides = array<i32>} : memref<64x8xf32, #tpu.memory_space<vmem>>, vector<8x8xf32>,
    %c0_279 = arith.constant 0 : index
    %c0_280 = arith.constant 0 : index
    %892 = vector.load %arg13[%c0_279, %c0_280] : memref<64x8xf32, #tpu.memory_space<vmem>>, vector<8x8xf32>
    %c0_281 = arith.constant 0 : index
    %c0_282 = arith.constant 0 : index
    %893 = vector.load %arg15[%c0_281, %c0_282] : memref<64x8xf32, #tpu.memory_space<vmem>>, vector<8x8xf32>
    %894 = arith.addf %892, %893 : vector<8x8xf32>
    %c8_283 = arith.constant 8 : index
    %c0_284 = arith.constant 0 : index
    %895 = vector.load %arg13[%c8_283, %c0_284] : memref<64x8xf32, #tpu.memory_space<vmem>>, vector<8x8xf32>
    %c8_285 = arith.constant 8 : index
    %c0_286 = arith.constant 0 : index
    %896 = vector.load %arg15[%c8_285, %c0_286] : memref<64x8xf32, #tpu.memory_space<vmem>>, vector<8x8xf32>
    %897 = arith.addf %895, %896 : vector<8x8xf32>
    %c16_287 = arith.constant 16 : index
    %c0_288 = arith.constant 0 : index
    %898 = vector.load %arg13[%c16_287, %c0_288] : memref<64x8xf32, #tpu.memory_space<vmem>>, vector<8x8xf32>
    %c16_289 = arith.constant 16 : index
    %c0_290 = arith.constant 0 : index
    %899 = vector.load %arg15[%c16_289, %c0_290] : memref<64x8xf32, #tpu.memory_space<vmem>>, vector<8x8xf32>
    %900 = arith.addf %898, %899 : vector<8x8xf32>
    %c24_291 = arith.constant 24 : index
    %c0_292 = arith.constant 0 : index
    %901 = vector.load %arg13[%c24_291, %c0_292] : memref<64x8xf32, #tpu.memory_space<vmem>>, vector<8x8xf32>
    %c24_293 = arith.constant 24 : index
    %c0_294 = arith.constant 0 : index
    %902 = vector.load %arg15[%c24_293, %c0_294] : memref<64x8xf32, #tpu.memory_space<vmem>>, vector<8x8xf32>
    %903 = arith.addf %901, %902 : vector<8x8xf32>
    %c32_295 = arith.constant 32 : index
    %c0_296 = arith.constant 0 : index
    %904 = vector.load %arg13[%c32_295, %c0_296] : memref<64x8xf32, #tpu.memory_space<vmem>>, vector<8x8xf32>
    %c32_297 = arith.constant 32 : index
    %c0_298 = arith.constant 0 : index
    %905 = vector.load %arg15[%c32_297, %c0_298] : memref<64x8xf32, #tpu.memory_space<vmem>>, vector<8x8xf32>
    %906 = arith.addf %904, %905 : vector<8x8xf32>
    %c40_299 = arith.constant 40 : index
    %c0_300 = arith.constant 0 : index
    %907 = vector.load %arg13[%c40_299, %c0_300] : memref<64x8xf32, #tpu.memory_space<vmem>>, vector<8x8xf32>
    %c40_301 = arith.constant 40 : index
    %c0_302 = arith.constant 0 : index
    %908 = vector.load %arg15[%c40_301, %c0_302] : memref<64x8xf32, #tpu.memory_space<vmem>>, vector<8x8xf32>
    %909 = arith.addf %907, %908 : vector<8x8xf32>
    %c48_303 = arith.constant 48 : index
    %c0_304 = arith.constant 0 : index
    %910 = vector.load %arg13[%c48_303, %c0_304] : memref<64x8xf32, #tpu.memory_space<vmem>>, vector<8x8xf32>
    %c48_305 = arith.constant 48 : index
    %c0_306 = arith.constant 0 : index
    %911 = vector.load %arg15[%c48_305, %c0_306] : memref<64x8xf32, #tpu.memory_space<vmem>>, vector<8x8xf32>
    %912 = arith.addf %910, %911 : vector<8x8xf32>
    %c56_307 = arith.constant 56 : index
    %c0_308 = arith.constant 0 : index
    %913 = vector.load %arg13[%c56_307, %c0_308] : memref<64x8xf32, #tpu.memory_space<vmem>>, vector<8x8xf32>
    %c56_309 = arith.constant 56 : index
    %c0_310 = arith.constant 0 : index
    %914 = vector.load %arg15[%c56_309, %c0_310] : memref<64x8xf32, #tpu.memory_space<vmem>>, vector<8x8xf32>
    %915 = arith.addf %913, %914 : vector<8x8xf32>
    %916 = arith.addf %894, %897 : vector<8x8xf32>
    %917 = arith.addf %916, %900 : vector<8x8xf32>
    %918 = arith.addf %917, %903 : vector<8x8xf32>
    %919 = arith.addf %918, %906 : vector<8x8xf32>
    %920 = arith.addf %919, %909 : vector<8x8xf32>
    %921 = arith.addf %920, %912 : vector<8x8xf32>
    %922 = arith.addf %921, %915 : vector<8x8xf32>
    %cst_311 = arith.constant 1.250000e-01 : f32
    %923 = vector.broadcast %cst_311 : f32 to vector<8x8xf32>
    %924 = arith.mulf %922, %923 : vector<8x8xf32>
    %925 = arith.subf %894, %924 : vector<8x8xf32>
    %926 = arith.subf %897, %924 : vector<8x8xf32>
    %927 = arith.subf %900, %924 : vector<8x8xf32>
    %928 = arith.subf %903, %924 : vector<8x8xf32>
    %929 = arith.subf %906, %924 : vector<8x8xf32>
    %930 = arith.subf %909, %924 : vector<8x8xf32>
    %931 = arith.subf %912, %924 : vector<8x8xf32>
    %932 = arith.subf %915, %924 : vector<8x8xf32>
    %933 = arith.mulf %925, %925 : vector<8x8xf32>
    %934 = arith.mulf %926, %926 : vector<8x8xf32>
    %935 = arith.addf %933, %934 : vector<8x8xf32>
    %936 = arith.mulf %927, %927 : vector<8x8xf32>
    %937 = arith.addf %935, %936 : vector<8x8xf32>
    %938 = arith.mulf %928, %928 : vector<8x8xf32>
    %939 = arith.addf %937, %938 : vector<8x8xf32>
    %940 = arith.mulf %929, %929 : vector<8x8xf32>
    %941 = arith.addf %939, %940 : vector<8x8xf32>
    %942 = arith.mulf %930, %930 : vector<8x8xf32>
    %943 = arith.addf %941, %942 : vector<8x8xf32>
    %944 = arith.mulf %931, %931 : vector<8x8xf32>
    %945 = arith.addf %943, %944 : vector<8x8xf32>
    %946 = arith.mulf %932, %932 : vector<8x8xf32>
    %947 = arith.addf %945, %946 : vector<8x8xf32>
    %cst_312 = arith.constant 1.250000e-01 : f32
    %948 = vector.broadcast %cst_312 : f32 to vector<8x8xf32>
    %949 = arith.mulf %947, %948 : vector<8x8xf32>
    %cst_313 = arith.constant 9.99999974E-6 : f32
    %950 = vector.broadcast %cst_313 : f32 to vector<8x8xf32>
    %951 = arith.addf %949, %950 : vector<8x8xf32>
    %952 = math.rsqrt %951 : vector<8x8xf32>
    %953 = arith.mulf %925, %952 : vector<8x8xf32>
    %c0_314 = arith.constant 0 : index
    %954 = memref.load %arg8[%c0_314] : memref<8xf32, #tpu.memory_space<smem>>
    %955 = vector.broadcast %954 : f32 to vector<8x8xf32>
    %956 = arith.mulf %953, %955 : vector<8x8xf32>
    %c0_315 = arith.constant 0 : index
    %957 = memref.load %arg9[%c0_315] : memref<8xf32, #tpu.memory_space<smem>>
    %958 = vector.broadcast %957 : f32 to vector<8x8xf32>
    %959 = arith.addf %956, %958 : vector<8x8xf32>
    %960 = arith.mulf %926, %952 : vector<8x8xf32>
    %c1_316 = arith.constant 1 : index
    %961 = memref.load %arg8[%c1_316] : memref<8xf32, #tpu.memory_space<smem>>
    %962 = vector.broadcast %961 : f32 to vector<8x8xf32>
    %963 = arith.mulf %960, %962 : vector<8x8xf32>
    %c1_317 = arith.constant 1 : index
    %964 = memref.load %arg9[%c1_317] : memref<8xf32, #tpu.memory_space<smem>>
    %965 = vector.broadcast %964 : f32 to vector<8x8xf32>
    %966 = arith.addf %963, %965 : vector<8x8xf32>
    %967 = arith.mulf %927, %952 : vector<8x8xf32>
    %c2_318 = arith.constant 2 : index
    %968 = memref.load %arg8[%c2_318] : memref<8xf32, #tpu.memory_space<smem>>
    %969 = vector.broadcast %968 : f32 to vector<8x8xf32>
    %970 = arith.mulf %967, %969 : vector<8x8xf32>
    %c2_319 = arith.constant 2 : index
    %971 = memref.load %arg9[%c2_319] : memref<8xf32, #tpu.memory_space<smem>>
    %972 = vector.broadcast %971 : f32 to vector<8x8xf32>
    %973 = arith.addf %970, %972 : vector<8x8xf32>
    %974 = arith.mulf %928, %952 : vector<8x8xf32>
    %c3_320 = arith.constant 3 : index
    %975 = memref.load %arg8[%c3_320] : memref<8xf32, #tpu.memory_space<smem>>
    %976 = vector.broadcast %975 : f32 to vector<8x8xf32>
    %977 = arith.mulf %974, %976 : vector<8x8xf32>
    %c3_321 = arith.constant 3 : index
    %978 = memref.load %arg9[%c3_321] : memref<8xf32, #tpu.memory_space<smem>>
    %979 = vector.broadcast %978 : f32 to vector<8x8xf32>
    %980 = arith.addf %977, %979 : vector<8x8xf32>
    %981 = arith.mulf %929, %952 : vector<8x8xf32>
    %c4_322 = arith.constant 4 : index
    %982 = memref.load %arg8[%c4_322] : memref<8xf32, #tpu.memory_space<smem>>
    %983 = vector.broadcast %982 : f32 to vector<8x8xf32>
    %984 = arith.mulf %981, %983 : vector<8x8xf32>
    %c4_323 = arith.constant 4 : index
    %985 = memref.load %arg9[%c4_323] : memref<8xf32, #tpu.memory_space<smem>>
    %986 = vector.broadcast %985 : f32 to vector<8x8xf32>
    %987 = arith.addf %984, %986 : vector<8x8xf32>
    %988 = arith.mulf %930, %952 : vector<8x8xf32>
    %c5_324 = arith.constant 5 : index
    %989 = memref.load %arg8[%c5_324] : memref<8xf32, #tpu.memory_space<smem>>
    %990 = vector.broadcast %989 : f32 to vector<8x8xf32>
    %991 = arith.mulf %988, %990 : vector<8x8xf32>
    %c5_325 = arith.constant 5 : index
    %992 = memref.load %arg9[%c5_325] : memref<8xf32, #tpu.memory_space<smem>>
    %993 = vector.broadcast %992 : f32 to vector<8x8xf32>
    %994 = arith.addf %991, %993 : vector<8x8xf32>
    %995 = arith.mulf %931, %952 : vector<8x8xf32>
    %c6_326 = arith.constant 6 : index
    %996 = memref.load %arg8[%c6_326] : memref<8xf32, #tpu.memory_space<smem>>
    %997 = vector.broadcast %996 : f32 to vector<8x8xf32>
    %998 = arith.mulf %995, %997 : vector<8x8xf32>
    %c6_327 = arith.constant 6 : index
    %999 = memref.load %arg9[%c6_327] : memref<8xf32, #tpu.memory_space<smem>>
    %1000 = vector.broadcast %999 : f32 to vector<8x8xf32>
    %1001 = arith.addf %998, %1000 : vector<8x8xf32>
    %1002 = arith.mulf %932, %952 : vector<8x8xf32>
    %c7_328 = arith.constant 7 : index
    %1003 = memref.load %arg8[%c7_328] : memref<8xf32, #tpu.memory_space<smem>>
    %1004 = vector.broadcast %1003 : f32 to vector<8x8xf32>
    %1005 = arith.mulf %1002, %1004 : vector<8x8xf32>
    %c7_329 = arith.constant 7 : index
    %1006 = memref.load %arg9[%c7_329] : memref<8xf32, #tpu.memory_space<smem>>
    %1007 = vector.broadcast %1006 : f32 to vector<8x8xf32>
    %1008 = arith.addf %1005, %1007 : vector<8x8xf32>
    %1009 = tpu.concatenate %959, %966, %973, %980, %987, %994, %1001, %1008 in 1 : vector<8x8xf32>, vector<8x8xf32>, vector<8x8xf32>, vector<8x8xf32>, vector<8x8xf32>, vector<8x8xf32>, vector<8x8xf32>, vector<8x8xf32> -> vector<8x64xf32>
    %c0_330 = arith.constant 0 : index
    %c0_331 = arith.constant 0 : index
    %1010 = vector.load %arg10[%c0_330, %c0_331] : memref<8x64xf32, #tpu.memory_space<vmem>>, vector<8x64xf32>
    tpu.vector_store %arg10[%c0_330, %c0_331], %1009 {strides = array<i32>} : memref<8x64xf32, #tpu.memory_space<vmem>>, vector<8x64xf32>,
    return
  }
  func.func @transform_0(%arg0: i32) -> (i32, i32) {
    %c0_i32 = arith.constant 0 : i32
    %c0_i32_0 = arith.constant 0 : i32
    %c0_i32_1 = arith.constant 0 : i32
    return %c0_i32, %c0_i32_0 : i32, i32
  }
  func.func @transform_1(%arg0: i32) -> (i32, i32) {
    %c0_i32 = arith.constant 0 : i32
    %c0_i32_0 = arith.constant 0 : i32
    %c0_i32_1 = arith.constant 0 : i32
    return %c0_i32, %c0_i32_0 : i32, i32
  }
  func.func @transform_2(%arg0: i32) -> (i32, i32) {
    %c0_i32 = arith.constant 0 : i32
    %c0_i32_0 = arith.constant 0 : i32
    %c0_i32_1 = arith.constant 0 : i32
    return %c0_i32, %c0_i32_0 : i32, i32
  }
  func.func @transform_3(%arg0: i32) -> (i32, i32) {
    %c0_i32 = arith.constant 0 : i32
    %c0_i32_0 = arith.constant 0 : i32
    %c0_i32_1 = arith.constant 0 : i32
    return %c0_i32, %c0_i32_0 : i32, i32
  }
  func.func @transform_4(%arg0: i32) -> (i32, i32) {
    %c0_i32 = arith.constant 0 : i32
    %c0_i32_0 = arith.constant 0 : i32
    %c0_i32_1 = arith.constant 0 : i32
    return %c0_i32, %c0_i32_0 : i32, i32
  }
  func.func @transform_5(%arg0: i32) -> i32 {
    %c0_i32 = arith.constant 0 : i32
    %c0_i32_0 = arith.constant 0 : i32
    return %c0_i32 : i32
  }
  func.func @transform_6(%arg0: i32) -> i32 {
    %c0_i32 = arith.constant 0 : i32
    %c0_i32_0 = arith.constant 0 : i32
    return %c0_i32 : i32
  }
  func.func @transform_7(%arg0: i32) -> i32 {
    %c0_i32 = arith.constant 0 : i32
    %c0_i32_0 = arith.constant 0 : i32
    return %c0_i32 : i32
  }
  func.func @transform_8(%arg0: i32) -> i32 {
    %c0_i32 = arith.constant 0 : i32
    %c0_i32_0 = arith.constant 0 : i32
    return %c0_i32 : i32
  }
  func.func @transform_9(%arg0: i32) -> (i32, i32) {
    %c0_i32 = arith.constant 0 : i32
    %c0_i32_0 = arith.constant 0 : i32
    %c0_i32_1 = arith.constant 0 : i32
    return %c0_i32, %c0_i32_0 : i32, i32
  }
}

</mosaic_0001>

<bundles_post_ra>
// kernel: spiking_transformer_layer.1
= control target key start
LH: loop header
LB: loop body
LE: loop exit
PB: predicated region body
PF: predicated region fallthrough
CT: control target
= control target key end

     0   :  { %14 = vsyncpa [#allocation8], 0  ;;  %s4513_s0 = inlined_call_operand.vmem [shape: f32[64,8], index: 0, kind: input, shape index: {}]   ;;  %s4514_s1 = inlined_call_operand.vmem [shape: f32[8,24], index: 1, kind: input, shape index: {}]   ;;  %s4515_s2 = inlined_call_operand.vmem [shape: f32[8,8], index: 2, kind: input, shape index: {}]   ;;  %s4516_s3 = inlined_call_operand.vmem [shape: f32[8,32], index: 3, kind: input, shape index: {}]   ;;  %s4517_s4 = inlined_call_operand.vmem [shape: f32[32,8], index: 4, kind: input, shape index: {}]   ;;  %s4518_s5 = inlined_call_operand.vmem [shape: f32[8], index: 5, kind: input, shape index: {}]   ;;  %s4519_s6 = inlined_call_operand.vmem [shape: f32[8], index: 6, kind: input, shape index: {}]   ;;  %s4520_s7 = inlined_call_operand.vmem [shape: f32[8], index: 7, kind: input, shape index: {}]   ;;  %s4521_s8 = inlined_call_operand.vmem [shape: f32[8], index: 8, kind: input, shape index: {}]   ;;  %s4522_s9 = inlined_call_operand.vmem [shape: f32[8,64], index: 9, kind: output, shape index: {}]  }
   0x1   :  { %15 = vsyncpa [#allocation10], 0  ;;  %s43_s11 = sshll.u32 %s4519_s6, 4  ;;  %s44_s11 = int_to_ptr.vmem [resolvable:$true] %s43_s11 }
   0x2   :  { %16 = vsyncpa [#allocation13], 0  ;;  %s33_s14 = sshll.u32 %s4518_s5, 4  ;;  %s2872_s15 = scalar_lea.vmem %s44_s11, 16  ;;  %s34_s14 = int_to_ptr.vmem [resolvable:$true] %s33_s14 }
   0x3   :  { %p2873_p0 = scmp.ne.s32.totalorder %s44_s11, %s2872_s15  ;;  %p2877_p1 = scmp.lt.s32.totalorder %s44_s11, %s44_s11 }
   0x4   :  { %p2878_p2 = scmp.lt.s32.totalorder %s2872_s15, %s2872_s15 }
   0x6   :  { %p2879_p3 = por %p2878_p2, %p2877_p1 }
   0x8   :  { %p2880_p4 = pnand %p2879_p3, %p2873_p0 }
   0xa   :  { %2883 = shalt.err (!%p2880_p4)
}
   0xb   :  { %s2926_s16 = smov [#allocation9]   ;;  %s2884_s17 = scalar_lea.vmem %s34_s14, 16 }
   0xc   :  { %46 = dma.vmem_to_smem %s44_s11, 16, %s2926_s16, [#allocation10]  }
   0xd   :  { %p2885_p5 = scmp.ne.s32.totalorder %s34_s14, %s2884_s17  ;;  %p2889_p6 = scmp.lt.s32.totalorder %s34_s14, %s34_s14 }
   0xe   :  { %p2890_p7 = scmp.lt.s32.totalorder %s2884_s17, %s2884_s17 }
  0x10   :  { %p2891_p8 = por %p2890_p7, %p2889_p6 }
  0x12   :  { %p2892_p9 = pnand %p2891_p8, %p2885_p5 }
  0x14   :  { %2895 = shalt.err (!%p2892_p9)
}
  0x15   :  { %s2927_s6 = smov [#allocation7]   ;;  %s53_s19 = sshll.u32 %s4520_s7, 4  ;;  %s54_s19 = int_to_ptr.vmem [resolvable:$true] %s53_s19 }
  0x16   :  { %36 = dma.vmem_to_smem %s34_s14, 16, %s2927_s6, [#allocation8]  }
  0x17   :  { %s63_s22 = sshll.u32 %s4521_s8, 4  ;;  %s2896_s23 = scalar_lea.vmem %s54_s19, 16  ;;  %s64_s22 = int_to_ptr.vmem [resolvable:$true] %s63_s22 }
  0x18   :  { %p2897_p10 = scmp.ne.s32.totalorder %s54_s19, %s2896_s23  ;;  %p2901_p11 = scmp.lt.s32.totalorder %s54_s19, %s54_s19 }
  0x19   :  { %p2902_p12 = scmp.lt.s32.totalorder %s2896_s23, %s2896_s23 }
  0x1b   :  { %p2903_p13 = por %p2902_p12, %p2901_p11 }
  0x1d   :  { %p2904_p0 = pnand %p2903_p13, %p2897_p10 }
  0x1f   :  { %2907 = shalt.err (!%p2904_p0)
}
  0x20   :  { %s2928_s24 = smov [#allocation11]   ;;  %s2908_s25 = scalar_lea.vmem %s64_s22, 16 }
  0x21   :  { %56 = dma.vmem_to_smem %s54_s19, 16, %s2928_s24, [#allocation10]  }
  0x22   :  { %p2909_p1 = scmp.ne.s32.totalorder %s64_s22, %s2908_s25  ;;  %p2913_p2 = scmp.lt.s32.totalorder %s64_s22, %s64_s22 }
  0x23   :  { %p2914_p3 = scmp.lt.s32.totalorder %s2908_s25, %s2908_s25 }
  0x25   :  { %p2915_p4 = por %p2914_p3, %p2913_p2 }
  0x27   :  { %p2916_p5 = pnand %p2915_p4, %p2909_p1 }
  0x29   :  { %2919 = shalt.err (!%p2916_p5)
}
  0x2a   :  { %s2929_s7 = smov [#allocation12]  }
  0x2b   :  { %66 = dma.vmem_to_smem %s64_s22, 16, %s2929_s7, [#allocation13]  }
  0x2c   :  { %2920 = dma.done.wait [#allocation8], 16  }
  0x2d   :  { %2921 = vsyncadd [#allocation8], 4294967280 }
  0x2e   :  { %2922 = dma.done.wait [#allocation10], 32  }
  0x2f   :  { %2923 = vsyncadd [#allocation10], 4294967264 }
  0x30   :  { %2924 = dma.done.wait [#allocation13], 16  }
  0x31   :  { %2925 = vsyncadd [#allocation13], 4294967280 }
  0x32   :  { %79 = sfence }
  0x33   :  { %v88_v0 = vld [vmem:[%s4514_s1] sm:$0xff]  ;;  %vm89_vm0 = vcmask 64512   ;;  %v81_v2 = vld [vmem:[%s4513_s0 + $0x8] sm:$0xff]  ;;  %v82_v3 = vld [vmem:[%s4513_s0 + $0x10] sm:$0xff]  ;;  %vm227_vm1 = vcmask 195584   ;;  %v4523_v12 = vmov 0.0  }
  0x34   :  { %v80_v1 = vld [vmem:[%s4513_s0] sm:$0xff]  ;;  %2741 = vmatprep.subr.mxu0 %v88_v0  ;;  %v83_v4 = vld [vmem:[%s4513_s0 + $0x18] sm:$0xff]  ;;  %v85_v6 = vld [vmem:[%s4513_s0 + $0x28] sm:$0xff]  ;;  %s2931_s19 = smov 6   ;;  %s2932_s20 = smov 120   ;;  %vm366_vm10 = vcmask 15360  }
  0x35   :  { %2743 = vmatprep.mubr.msk.f32.mxu0 %vm89_vm0, %v80_v1  ;;  %2742 = vmatpush3.msra.mxu0 %v88_v0  ;;  %v84_v5 = vld [vmem:[%s4513_s0 + $0x20] sm:$0xff]  ;;  %v86_v7 = vld [vmem:[%s4513_s0 + $0x30] sm:$0xff]  ;;  %v87_v8 = vld [vmem:[%s4513_s0 + $0x38] sm:$0xff]  ;;  %s2933_s21 = smov 126   ;;  %s2934_s22 = smov 2   ;;  %vm375_vm11 = vcmask 31744  }
  0x36   :  { %2744 = vmatmul.mubr.msk.f32.vlgmr.msra.gmra.mxu0 %vm89_vm0, %v81_v2  ;;  %s2935_s23 = smov 124   ;;  %s2936_s24 = smov 4   ;;  %vm384_vm12 = vcmask 48128   ;;  %vm511_vm13 = vcmask 7168   ;;  %vm514_vm14 = vcmask 23552  }
  0x37   :  { %2746 = vmatprep.mubr.msk.f32.mxu0 %vm89_vm0, %v82_v3  ;;  %s2937_s25 = smov 122   ;;  %s2938_s7 = smov 127  }
  0x38   :  { %s2939_s8 = smov 125   ;;  %s2944_s28 = smov 114  }
  0x39   :  { %s2945_s29 = smov 112   ;;  %s2947_s30 = smov 118  }
  0x3a   :  { %2747 = vmatmul.mubr.msk.f32.gmra.mxu0 %vm89_vm0, %v83_v4  ;;  %s4348_s26 = sld [smem:[#allocation9 + $0x2]] }
  0x3b   :  { %2749 = vmatprep.mubr.msk.f32.mxu0 %vm89_vm0, %v84_v5  ;;  %s4350_s27 = sld [smem:[#allocation7 + $0x3]] }
  0x3c   :  { %s4360_s10 = sld [smem:[#allocation9 + $0x5]] }
  0x3d   :  { %s4362_s11 = sld [smem:[#allocation7 + $0x6]] }
  0x3e   :  { %2750 = vmatmul.mubr.msk.f32.gmra.mxu0 %vm89_vm0, %v85_v6  ;;  %s4366_s1 = sld [smem:[#allocation7 + $0x7]] }
  0x3f   :  { %2752 = vmatprep.mubr.msk.f32.mxu0 %vm89_vm0, %v86_v7  ;;  %s4368_s12 = sld [smem:[#allocation9 + $0x7]] }
  0x40   :  { %s2510_s13 = sld [smem:[#allocation12]] }
  0x42   :  { %2753 = vmatmul.mubr.msk.f32.gmra.mxu0 %vm89_vm0, %v87_v8 }
  0xf6   :  { %v2745_v9 = vpop.f32.mrf.mxu0 }
  0xf8   :  { %v180_v10 = vpop.f32.mrf.mxu0 }
  0xf9   :  { %vm224_vm2 = vcmp.gt.f32.partialorder %v180_v10, 1.0  ;;  %v229_v11 = vmul.f32 0.9, %v180_v10 }
  0xfa   :  { %v2618_v13 = vsel %vm224_vm2, 1.0, %v4523_v12  ;;  %v2748_v14 = vpop.f32.mrf.mxu0 }
  0xfb   :  { %228 = vst.msk [vmem:[#allocation2] sm:$0xff] %vm227_vm1, %v2618_v13  ;;  %v230_v15 = vadd.f32 %v2745_v9, %v229_v11 }
  0xfc   :  { %v190_v17 = vpop.f32.mrf.mxu0 }
  0xfd   :  { %v231_v16 = vsub.f32 %v230_v15, %v2618_v13 }
  0xfe   :  { %v2751_v24 = vpop.f32.mrf.mxu0 }
  0xff   :  { %vm232_vm3 = vcmp.gt.f32.partialorder %v231_v16, 1.0  ;;  %v236_v18 = vmul.f32 0.9, %v231_v16 }
 0x100   :  { %v2619_v19 = vsel %vm232_vm3, 1.0, %v4523_v12  ;;  %v200_v28 = vpop.f32.mrf.mxu0 }
 0x101   :  { %235 = vst.msk [vmem:[#allocation2 + $0x8] sm:$0xff] %vm227_vm1, %v2619_v19  ;;  %v237_v20 = vadd.f32 %v236_v18, %v190_v17  ;;  %v441_v18 = vlaneseq }
 0x102   :  { %v3056_v21 = vld [vmem:[#allocation2] sm:$0xff]  ;;  %v2754_v35 = vpop.f32.mrf.mxu0 }
 0x103   :  { %v238_v22 = vsub.f32 %v237_v20, %v2619_v19  ;;  %342 = vrot.lane.b32.xlu1 %v3056_v21, %s2931_s19  ;;  %393 = vrot.lane.b32.xlu0 %v3056_v21, %s2932_s20 }
 0x104   :  { %v210_v39 = vpop.f32.mrf.mxu0 }
 0x105   :  { %vm239_vm4 = vcmp.gt.f32.partialorder %v238_v22, 1.0  ;;  %v243_v23 = vmul.f32 0.9, %v238_v22  ;;  %v442_v22 = vshrl.u32 %v441_v18, 7 }
 0x106   :  { %v2620_v25 = vsel %vm239_vm4, 1.0, %v4523_v12 }
 0x107   :  { %531 = vrot.lane.b32.xlu1 %v3056_v21, %s2933_s21  ;;  %294 = vrot.lane.b32.xlu0 %v3056_v21, %s2934_s22  ;;  %242 = vst.msk [vmem:[#allocation2 + $0x10] sm:$0xff] %vm227_vm1, %v2620_v25  ;;  %v244_v26 = vadd.f32 %v2748_v14, %v243_v23 }
 0x108   :  { %v3074_v32 = vld [vmem:[#allocation2 + $0x8] sm:$0xff] }
 0x109   :  { %v245_v27 = vsub.f32 %v244_v26, %v2620_v25  ;;  %4530 = vst [vmem:[#allocation17_spill] sm:$0xff] %v3074_v32 }
 0x10b   :  { %667 = vrot.lane.b32.xlu1 %v3056_v21, %s2935_s23  ;;  %318 = vrot.lane.b32.xlu0 %v3056_v21, %s2936_s24  ;;  %vm246_vm5 = vcmp.gt.f32.partialorder %v245_v27, 1.0  ;;  %v250_v29 = vmul.f32 0.9, %v245_v27 }
 0x10c   :  { %v2621_v30 = vsel %vm246_vm5, 1.0, %v4523_v12 }
 0x10d   :  { %249 = vst.msk [vmem:[#allocation2 + $0x18] sm:$0xff] %vm227_vm1, %v2621_v30  ;;  %v251_v31 = vadd.f32 %v250_v29, %v200_v28  ;;  %v3241_v29 = vsub.s32 0, %v442_v22 }
 0x10e   :  { %v3092_v43 = vld [vmem:[#allocation2 + $0x10] sm:$0xff] }
 0x10f   :  { %v252_v33 = vsub.f32 %v251_v31, %v2621_v30  ;;  %296 = vrot.lane.b32.xlu1 %v3074_v32, %s2934_s22  ;;  %395 = vrot.lane.b32.xlu0 %v3074_v32, %s2932_s20 }
 0x111   :  { %vm253_vm6 = vcmp.gt.f32.partialorder %v252_v33, 1.0  ;;  %v257_v34 = vmul.f32 0.9, %v252_v33 }
 0x112   :  { %v2622_v36 = vsel %vm253_vm6, 1.0, %v4523_v12 }
 0x113   :  { %320 = vrot.lane.b32.xlu1 %v3074_v32, %s2936_s24  ;;  %344 = vrot.lane.b32.xlu0 %v3074_v32, %s2931_s19  ;;  %256 = vst.msk [vmem:[#allocation2 + $0x20] sm:$0xff] %vm227_vm1, %v2622_v36  ;;  %v258_v37 = vadd.f32 %v2751_v24, %v257_v34 }
 0x114   :  { %v3104_v49 = vld [vmem:[#allocation2 + $0x18] sm:$0xff] }
 0x115   :  { %v259_v38 = vsub.f32 %v258_v37, %v2622_v36 }
 0x117   :  { %669 = vrot.lane.b32.xlu1 %v3074_v32, %s2935_s23  ;;  %533 = vrot.lane.b32.xlu0 %v3074_v32, %s2933_s21  ;;  %vm260_vm7 = vcmp.gt.f32.partialorder %v259_v38, 1.0  ;;  %v264_v40 = vmul.f32 0.9, %v259_v38 }
 0x118   :  { %v2623_v41 = vsel %vm260_vm7, 1.0, %v4523_v12 }
 0x119   :  { %263 = vst.msk [vmem:[#allocation2 + $0x28] sm:$0xff] %vm227_vm1, %v2623_v41  ;;  %v265_v42 = vadd.f32 %v264_v40, %v210_v39  ;;  %v3257_v40 = vsub.s32 1, %v442_v22 }
 0x11a   :  { %v3120_v51 = vld [vmem:[#allocation2 + $0x20] sm:$0xff] }
 0x11b   :  { %v266_v44 = vsub.f32 %v265_v42, %v2623_v41  ;;  %535 = vrot.lane.b32.xlu1 %v3092_v43, %s2933_s21  ;;  %397 = vrot.lane.b32.xlu0 %v3092_v43, %s2932_s20  ;;  %4531 = vst [vmem:[#allocation18_spill] sm:$0xff] %v3120_v51 }
 0x11d   :  { %vm267_vm8 = vcmp.gt.f32.partialorder %v266_v44, 1.0  ;;  %v271_v45 = vmul.f32 0.9, %v266_v44  ;;  %v3262_v44 = vsub.s32 2, %v442_v22 }
 0x11e   :  { %v2624_v46 = vsel %vm267_vm8, 1.0, %v4523_v12 }
 0x11f   :  { %270 = vst.msk [vmem:[#allocation2 + $0x30] sm:$0xff] %vm227_vm1, %v2624_v46  ;;  %v272_v47 = vadd.f32 %v2754_v35, %v271_v45  ;;  %346 = vrot.lane.b32.xlu1 %v3092_v43, %s2931_s19  ;;  %298 = vrot.lane.b32.xlu0 %v3092_v43, %s2934_s22  ;;  %v3264_v45 = vsub.s32 3, %v442_v22 }
 0x120   :  { %v3126_v52 = vld [vmem:[#allocation2 + $0x28] sm:$0xff] }
 0x121   :  { %v273_v48 = vsub.f32 %v272_v47, %v2624_v46  ;;  %4532 = vst [vmem:[#allocation19_spill] sm:$0xff] %v3126_v52 }
 0x123   :  { %vm274_vm9 = vcmp.gt.f32.partialorder %v273_v48, 1.0  ;;  %399 = vrot.lane.b32.xlu1 %v3104_v49, %s2932_s20  ;;  %671 = vrot.lane.b32.xlu0 %v3092_v43, %s2935_s23 }
 0x124   :  { %v2625_v50 = vsel %vm274_vm9, 1.0, %v4523_v12  ;;  %vm2201_vm9 = vcmask 261120  }
 0x125   :  { %277 = vst.msk [vmem:[#allocation2 + $0x38] sm:$0xff] %vm227_vm1, %v2625_v50 }
 0x126   :  { %v3148_v53 = vld [vmem:[#allocation2 + $0x30] sm:$0xff] }
 0x127   :  { %673 = vrot.lane.b32.xlu1 %v3104_v49, %s2935_s23  ;;  %791 = vrot.lane.b32.xlu0 %v3092_v43, %s2937_s25 }
 0x12b   :  { %793 = vrot.lane.b32.xlu1 %v3104_v49, %s2937_s25  ;;  %322 = vrot.lane.b32.xlu0 %v3092_v43, %s2936_s24 }
 0x12c   :  { %v3166_v54 = vld [vmem:[#allocation2 + $0x38] sm:$0xff] }
 0x12f   :  { %537 = vrot.lane.b32.xlu0 %v3104_v49, %s2933_s21  ;;  %795 = vrot.lane.b32.xlu1 %v3120_v51, %s2937_s25 }
 0x133   :  { %300 = vrot.lane.b32.xlu0 %v3104_v49, %s2934_s22  ;;  %403 = vrot.lane.b32.xlu1 %v3126_v52, %s2932_s20 }
 0x137   :  { %324 = vrot.lane.b32.xlu0 %v3104_v49, %s2936_s24  ;;  %541 = vrot.lane.b32.xlu1 %v3126_v52, %s2933_s21 }
 0x13b   :  { %348 = vrot.lane.b32.xlu0 %v3104_v49, %s2931_s19  ;;  %661 = vrot.lane.b32.xlu1 %v3126_v52, %s2935_s23 }
 0x13f   :  { %304 = vrot.lane.b32.xlu1 %v3126_v52, %s2934_s22  ;;  %401 = vrot.lane.b32.xlu0 %v3120_v51, %s2932_s20 }
 0x143   :  { %797 = vrot.lane.b32.xlu1 %v3126_v52, %s2937_s25  ;;  %539 = vrot.lane.b32.xlu0 %v3120_v51, %s2933_s21 }
 0x147   :  { %659 = vrot.lane.b32.xlu0 %v3120_v51, %s2935_s23  ;;  %405 = vrot.lane.b32.xlu1 %v3148_v53, %s2932_s20 }
 0x14b   :  { %302 = vrot.lane.b32.xlu0 %v3120_v51, %s2934_s22  ;;  %330 = vrot.lane.b32.xlu1 %v3148_v53, %s2936_s24 }
 0x14f   :  { %326 = vrot.lane.b32.xlu0 %v3120_v51, %s2936_s24  ;;  %663 = vrot.lane.b32.xlu1 %v3148_v53, %s2935_s23 }
 0x153   :  { %350 = vrot.lane.b32.xlu0 %v3120_v51, %s2931_s19  ;;  %799 = vrot.lane.b32.xlu1 %v3148_v53, %s2937_s25 }
 0x157   :  { %328 = vrot.lane.b32.xlu0 %v3126_v52, %s2936_s24  ;;  %407 = vrot.lane.b32.xlu1 %v3166_v54, %s2932_s20  ;;  %s2688_s20 = sld [smem:[#allocation11 + $0x1]] }
 0x15b   :  { %527 = vrot.lane.b32.xlu0 %v3148_v53, %s2933_s21  ;;  %529 = vrot.lane.b32.xlu1 %v3166_v54, %s2933_s21 }
 0x15f   :  { %306 = vrot.lane.b32.xlu0 %v3148_v53, %s2934_s22  ;;  %308 = vrot.lane.b32.xlu1 %v3166_v54, %s2934_s22  ;;  %s2694_s22 = sld [smem:[#allocation11 + $0x4]] }
 0x163   :  { %332 = vrot.lane.b32.xlu0 %v3166_v54, %s2936_s24  ;;  %665 = vrot.lane.b32.xlu1 %v3166_v54, %s2935_s23  ;;  %s4340_s24 = sld [smem:[#allocation9]] }
 0x167   :  { %352 = vrot.lane.b32.xlu0 %v3126_v52, %s2931_s19  ;;  %803 = vrot.lane.b32.xlu1 %v3056_v21, %s2937_s25 }
 0x16b   :  { %354 = vrot.lane.b32.xlu0 %v3148_v53, %s2931_s19  ;;  %801 = vrot.lane.b32.xlu1 %v3166_v54, %s2937_s25 }
 0x16f   :  { %356 = vrot.lane.b32.xlu0 %v3166_v54, %s2931_s19  ;;  %805 = vrot.lane.b32.xlu1 %v3074_v32, %s2937_s25  ;;  %s2691_s19 = sld [smem:[#allocation12 + $0x2]] }
 0x175   :  { %v343_v55 = vpop.permute.xlu1 %342  ;;  %v3196_v56 = vpop.permute.xlu0 %393 }
 0x179   :  { %v3198_v57 = vpop.permute.xlu1 %531  ;;  %v295_v58 = vpop.permute.xlu0 %294 }
 0x17a   :  { %v553_v26 = vsel %vm366_vm10, %v3198_v57, %v3056_v21  ;;  %v367_v27 = vsel %vm366_vm10, %v3056_v21, %v295_v58 }
 0x17b   :  { %v561_v41 = vsel %vm375_vm11, %v553_v26, %v295_v58 }
 0x17d   :  { %v3200_v59 = vpop.permute.xlu1 %667  ;;  %v319_v60 = vpop.permute.xlu0 %318 }
 0x17e   :  { %v687_v23 = vsel %vm366_vm10, %v3200_v59, %v3198_v57  ;;  %v376_v31 = vsel %vm375_vm11, %v367_v27, %v319_v60  ;;  %v3273_v48 = vsel %vm384_vm12, %v561_v41, %v319_v60 }
 0x17f   :  { %v695_v30 = vsel %vm375_vm11, %v687_v23, %v3056_v21  ;;  %v3270_v47 = vsel %vm384_vm12, %v376_v31, %v343_v55 }
 0x180   :  { %v3267_v46 = vsel %vm384_vm12, %v695_v30, %v295_v58 }
 0x181   :  { %v3202_v61 = vpop.permute.xlu1 %296  ;;  %v3204_v62 = vpop.permute.xlu0 %395 }
 0x182   :  { %v368_v33 = vsel %vm366_vm10, %v3074_v32, %v3202_v61 }
 0x185   :  { %v321_v63 = vpop.permute.xlu1 %320  ;;  %v345_v0 = vpop.permute.xlu0 %344 }
 0x186   :  { %v377_v35 = vsel %vm375_vm11, %v368_v33, %v321_v63 }
 0x189   :  { %v3206_v1 = vpop.permute.xlu1 %669  ;;  %v3208_v2 = vpop.permute.xlu0 %533 }
 0x18a   :  { %v554_v28 = vsel %vm366_vm10, %v3208_v2, %v3074_v32  ;;  %v688_v34 = vsel %vm366_vm10, %v3206_v1, %v3208_v2 }
 0x18b   :  { %v562_v42 = vsel %vm375_vm11, %v554_v28, %v3202_v61  ;;  %v696_v50 = vsel %vm375_vm11, %v688_v34, %v3074_v32 }
 0x18c   :  { %v3286_v55 = vsel %vm384_vm12, %v562_v42, %v321_v63  ;;  %v3293_v27 = vsel %vm384_vm12, %v696_v50, %v3202_v61 }
 0x18d   :  { %v536_v3 = vpop.permute.xlu1 %535  ;;  %v3210_v4 = vpop.permute.xlu0 %397 }
 0x18e   :  { %v555_v28 = vsel %vm366_vm10, %v536_v3, %v3092_v43  ;;  %v419_v63 = vsel %vm366_vm10, %v3210_v4, %v3196_v56 }
 0x191   :  { %v3212_v5 = vpop.permute.xlu1 %346  ;;  %v299_v6 = vpop.permute.xlu0 %298 }
 0x192   :  { %v369_v58 = vsel %vm366_vm10, %v3092_v43, %v299_v6 }
 0x195   :  { %v3214_v7 = vpop.permute.xlu1 %399  ;;  %v672_v8 = vpop.permute.xlu0 %671 }
 0x196   :  { %v689_v36 = vsel %vm366_vm10, %v672_v8, %v536_v3 }
 0x199   :  { %v674_v9 = vpop.permute.xlu1 %673  ;;  %v792_v10 = vpop.permute.xlu0 %791 }
 0x19a   :  { %v815_v37 = vsel %vm366_vm10, %v792_v10, %v672_v8  ;;  %v3278_v8 = vsel %vm384_vm12, %v377_v35, %v345_v0  ;;  %v697_v10 = vsel %vm375_vm11, %v689_v36, %v3092_v43 }
 0x19b   :  { %v823_v18 = vsel %vm375_vm11, %v815_v37, %v536_v3  ;;  %v563_v3 = vsel %vm375_vm11, %v555_v28, %v299_v6 }
 0x19c   :  { %v3311_v61 = vsel %vm384_vm12, %v823_v18, %v3092_v43 }
 0x19d   :  { %v794_v11 = vpop.permute.xlu1 %793  ;;  %v323_v13 = vpop.permute.xlu0 %322 }
 0x19e   :  { %v816_v60 = vsel %vm366_vm10, %v794_v11, %v674_v9  ;;  %v378_v22 = vsel %vm375_vm11, %v369_v58, %v323_v13  ;;  %v3304_v11 = vsel %vm366_vm10, %v3214_v7, %v3204_v62  ;;  %v3319_v33 = vsel %vm384_vm12, %v563_v3, %v323_v13 }
 0x19f   :  { %v3316_v31 = vsel %vm384_vm12, %v378_v22, %v3212_v5 }
 0x1a1   :  { %v538_v14 = vpop.permute.xlu0 %537  ;;  %v3216_v15 = vpop.permute.xlu1 %795 }
 0x1a2   :  { %v690_v23 = vsel %vm366_vm10, %v674_v9, %v538_v14  ;;  %v824_v30 = vsel %vm375_vm11, %v816_v60, %v538_v14  ;;  %v3307_v9 = vsel %vm384_vm12, %v697_v10, %v299_v6  ;;  %v556_v43 = vsel %vm366_vm10, %v538_v14, %v3104_v49 }
 0x1a3   :  { %v698_v34 = vsel %vm375_vm11, %v690_v23, %v3104_v49  ;;  %v3330_v6 = vsel %vm384_vm12, %v824_v30, %v3104_v49 }
 0x1a5   :  { %v3218_v16 = vpop.permute.xlu0 %300  ;;  %v3220_v17 = vpop.permute.xlu1 %403 }
 0x1a6   :  { %v422_v35 = vsel %vm366_vm10, %v3220_v17, %v3214_v7  ;;  %v3334_v5 = vsel %vm384_vm12, %v698_v34, %v3218_v16  ;;  %v370_v13 = vsel %vm366_vm10, %v3104_v49, %v3218_v16  ;;  %v564_v41 = vsel %vm375_vm11, %v556_v43, %v3218_v16 }
 0x1a7   :  { %v3353_v58 = vsel %vm375_vm11, %v422_v35, %v3204_v62 }
 0x1a9   :  { %v3222_v19 = vpop.permute.xlu0 %324  ;;  %v3224_v20 = vpop.permute.xlu1 %541 }
 0x1aa   :  { %v379_v10 = vsel %vm375_vm11, %v370_v13, %v3222_v19  ;;  %v3357_v16 = vsel %vm384_vm12, %v564_v41, %v3222_v19  ;;  %v558_v28 = vsel %vm366_vm10, %v3224_v20, %v3126_v52 }
 0x1ad   :  { %v3229_v24 = vpop.permute.xlu0 %348  ;;  %v3231_v25 = vpop.permute.xlu1 %661 }
 0x1ae   :  { %v684_v14 = vsel %vm366_vm10, %v3231_v25, %v3224_v20 }
 0x1af   :  { %v692_v19 = vsel %vm375_vm11, %v684_v14, %v3126_v52 }
 0x1b1   :  { %v3255_v38 = vpop.permute.xlu1 %304  ;;  %v402_v39 = vpop.permute.xlu0 %401 }
 0x1b2   :  { %v421_v60 = vsel %vm366_vm10, %v402_v39, %v3210_v4 }
 0x1b3   :  { %v429_v14 = vsel %vm375_vm11, %v421_v60, %v3196_v56 }
 0x1b5   :  { %v798_v26 = vpop.permute.xlu1 %797  ;;  %v540_v0 = vpop.permute.xlu0 %539 }
 0x1b6   :  { %v818_v35 = vsel %vm366_vm10, %v798_v26, %v3231_v25  ;;  %v557_v13 = vsel %vm366_vm10, %v540_v0, %v3120_v51 }
 0x1b9   :  { %v660_v36 = vpop.permute.xlu0 %659  ;;  %v406_v37 = vpop.permute.xlu1 %405 }
 0x1ba   :  { %v417_v42 = vsel %vm366_vm10, %v3196_v56, %v406_v37  ;;  %v423_v50 = vsel %vm366_vm10, %v406_v37, %v402_v39  ;;  %v427_v49 = vsel %vm375_vm11, %v419_v63, %v406_v37  ;;  %v683_v22 = vsel %vm366_vm10, %v660_v36, %v540_v0 }
 0x1bb   :  { %v425_v18 = vsel %vm375_vm11, %v417_v42, %v402_v39  ;;  %v817_v23 = vsel %vm366_vm10, %v3216_v15, %v660_v36  ;;  %v3369_v63 = vsel %vm384_vm12, %v379_v10, %v3229_v24  ;;  %v431_v30 = vsel %vm375_vm11, %v423_v50, %v3210_v4 }
 0x1bc   :  { %v3379_v15 = vsel %vm384_vm12, %v692_v19, %v3255_v38  ;;  %v3384_v43 = vsel %vm384_vm12, %v427_v49, %v402_v39  ;;  %v3388_v24 = vsel %vm384_vm12, %v425_v18, %v3210_v4  ;;  %v691_v36 = vsel %vm375_vm11, %v683_v22, %v3120_v51 }
 0x1bd   :  { %v303_v3 = vpop.permute.xlu0 %302  ;;  %v3375_v34 = vpop.permute.xlu1 %330  ;;  %v825_v41 = vsel %vm375_vm11, %v817_v23, %v540_v0  ;;  %v3398_v25 = vsel %vm384_vm12, %v429_v14, %v406_v37  ;;  %v444_v39 = vrot.slane %v3388_v24, %v3241_v29  ;;  %v710_v4 = vrot.slane %v3388_v24, %v3262_v44 }
 0x1be   :  { %v3406_v26 = vsel %vm384_vm12, %v431_v30, %v3196_v56  ;;  %v826_v42 = vsel %vm375_vm11, %v818_v35, %v3224_v20  ;;  %v850_v0 = vrot.slane %v3384_v43, %v3264_v45  ;;  %v699_v50 = vsel %vm384_vm12, %v691_v36, %v303_v3 }
 0x1bf   :  { %v565_v37 = vsel %vm375_vm11, %v557_v13, %v303_v3  ;;  %v833_v49 = vsel %vm384_vm12, %v825_v41, %v3120_v51  ;;  %v452_v60 = vrot.slane %v3384_v43, %v3241_v29  ;;  %v372_v20 = vsel %vm366_vm10, %v3126_v52, %v3255_v38 }
 0x1c0   :  { %v594_v22 = vrot.slane %v3398_v25, %v3257_v40  ;;  %v602_v23 = vrot.slane %v3406_v26, %v3257_v40  ;;  %v566_v19 = vsel %vm375_vm11, %v558_v28, %v3255_v38  ;;  %v586_v30 = vrot.slane %v3384_v43, %v3257_v40 }
 0x1c1   :  { %v327_v10 = vpop.permute.xlu0 %326  ;;  %v664_v18 = vpop.permute.xlu1 %663  ;;  %v3432_v35 = vsel %vm384_vm12, %v826_v42, %v3126_v52  ;;  %v739_v13 = vmul.f32 %v710_v4, %v699_v50  ;;  %v842_v36 = vrot.slane %v3388_v24, %v3264_v45  ;;  %v473_v41 = vmul.f32 %v444_v39, %v3270_v47 }
 0x1c2   :  { %v573_v56 = vsel %vm384_vm12, %v565_v37, %v327_v10  ;;  %v726_v14 = vrot.slane %v3398_v25, %v3262_v44  ;;  %v3439_v37 = vmul.f32 %v850_v0, %v833_v49  ;;  %v371_v38 = vsel %vm366_vm10, %v3120_v51, %v303_v3 }
 0x1c3   :  { %v613_v28 = vmul.f32 %v602_v23, %v573_v56  ;;  %v380_v42 = vsel %vm375_vm11, %v371_v38, %v327_v10  ;;  %v460_v4 = vrot.slane %v3398_v25, %v3241_v29  ;;  %v475_v47 = vmul.f32 %v452_v60, %v3316_v31 }
 0x1c4   :  { %v578_v0 = vrot.slane %v3388_v24, %v3257_v40  ;;  %v609_v3 = vmul.f32 %v586_v30, %v3273_v48  ;;  %v611_v49 = vmul.f32 %v594_v22, %v3319_v33  ;;  %v3455_v56 = vsel %vm89_vm0, %v739_v13, 0.0 }
 0x1c5   :  { %v351_v12 = vpop.permute.xlu0 %350  ;;  %v800_v32 = vpop.permute.xlu1 %799  ;;  %v871_v10 = vmul.f32 %v842_v36, %v3311_v61  ;;  %v718_v23 = vrot.slane %v3384_v43, %v3262_v44  ;;  %v3461_v38 = vsel %vm89_vm0, %v473_v41, 0.0  ;;  %v734_v33 = vrot.slane %v3406_v26, %v3262_v44 }
 0x1c6   :  { %v389_v39 = vsel %vm384_vm12, %v380_v42, %v351_v12  ;;  %v3464_v12 = vsel %vm89_vm0, %v613_v28, 0.0  ;;  %v743_v60 = vmul.f32 %v726_v14, %v3267_v46  ;;  %v819_v22 = vsel %vm366_vm10, %v800_v32, %v664_v18 }
 0x1c7   :  { %v477_v61 = vmul.f32 %v460_v4, %v389_v39  ;;  %v3475_v30 = vsel %vm89_vm0, %v475_v47, 0.0  ;;  %v3482_v41 = vsel %vm89_vm0, %v609_v3, 0.0  ;;  %v3485_v46 = vsel %vm89_vm0, %v611_v49, 0.0 }
 0x1c8   :  { %v3506_v39 = vmul.f32 %v734_v33, %v3307_v9  ;;  %v3509_v3 = vsel %vm89_vm0, %v743_v60, 0.0  ;;  %v3512_v49 = vsel %vm89_vm0, %v871_v10, 0.0 }
 0x1c9   :  { %v329_v31 = vpop.permute.xlu0 %328  ;;  %v408_v24 = vpop.permute.xlu1 %407 }
 0x1ca   :  { %v418_v43 = vsel %vm366_vm10, %v3204_v62, %v408_v24  ;;  %v428_v36 = vsel %vm375_vm11, %v3304_v11, %v408_v24  ;;  %v424_v32 = vsel %vm366_vm10, %v408_v24, %v3220_v17  ;;  %v3499_v11 = vsel %vm384_vm12, %v3353_v58, %v408_v24 }
 0x1cb   :  { %v426_v13 = vsel %vm375_vm11, %v418_v43, %v3220_v17  ;;  %v3495_v28 = vsel %vm384_vm12, %v428_v36, %v3220_v17  ;;  %v3515_v17 = vsel %vm89_vm0, %v477_v61, 0.0  ;;  %v381_v58 = vsel %vm375_vm11, %v372_v20, %v329_v31 }
 0x1cc   :  { %v3491_v14 = vsel %vm384_vm12, %v426_v13, %v3214_v7  ;;  %v3519_v24 = vsel %vm384_vm12, %v566_v19, %v329_v31  ;;  %v432_v9 = vsel %vm375_vm11, %v424_v32, %v3214_v7  ;;  %v590_v33 = vrot.slane %v3495_v28, %v3257_v40 }
 0x1cd   :  { %v448_v42 = vrot.slane %v3491_v14, %v3241_v29  ;;  %v528_v4 = vpop.permute.xlu0 %527  ;;  %v3503_v47 = vpop.permute.xlu1 %529  ;;  %v714_v60 = vrot.slane %v3491_v14, %v3262_v44 }
 0x1ce   :  { %v685_v43 = vsel %vm366_vm10, %v664_v18, %v528_v4  ;;  %v827_v7 = vsel %vm375_vm11, %v819_v22, %v528_v4  ;;  %v551_v31 = vsel %vm366_vm10, %v528_v4, %v3148_v53  ;;  %v552_v19 = vsel %vm366_vm10, %v3503_v47, %v3166_v54 }
 0x1cf   :  { %v693_v13 = vsel %vm375_vm11, %v685_v43, %v3148_v53  ;;  %v740_v36 = vmul.f32 %v714_v60, %v3379_v15  ;;  %v474_v50 = vmul.f32 %v448_v42, %v3278_v8  ;;  %v456_v4 = vrot.slane %v3495_v28, %v3241_v29 }
 0x1d0   :  { %v3552_v20 = vsel %vm384_vm12, %v827_v7, %v3148_v53  ;;  %v582_v8 = vrot.slane %v3491_v14, %v3257_v40  ;;  %v610_v42 = vmul.f32 %v590_v33, %v3286_v55  ;;  %v3574_v33 = vsel %vm384_vm12, %v432_v9, %v3204_v62 }
 0x1d1   :  { %v307_v61 = vpop.permute.xlu0 %306  ;;  %v309_v32 = vpop.permute.xlu1 %308  ;;  %v748_v48 = vsel %vm89_vm0, %v740_v36, 0.0 }
 0x1d2   :  { %v559_v18 = vsel %vm375_vm11, %v551_v31, %v307_v61  ;;  %v701_v22 = vsel %vm384_vm12, %v693_v13, %v307_v61  ;;  %v722_v31 = vrot.slane %v3495_v28, %v3262_v44  ;;  %v464_v13 = vrot.slane %v3499_v11, %v3241_v29 }
 0x1d3   :  { %v567_v15 = vsel %vm384_vm12, %v559_v18, %v3375_v34  ;;  %v741_v60 = vmul.f32 %v718_v23, %v701_v22  ;;  %v560_v10 = vsel %vm375_vm11, %v552_v19, %v309_v32  ;;  %v482_v18 = vsel %vm89_vm0, %v474_v50, 0.0 }
 0x1d4   :  { %v607_v43 = vmul.f32 %v578_v0, %v567_v15  ;;  %v373_v55 = vsel %vm366_vm10, %v3148_v53, %v307_v61  ;;  %v476_v23 = vmul.f32 %v456_v4, %v3369_v63  ;;  %v374_v19 = vsel %vm366_vm10, %v3166_v54, %v309_v32 }
 0x1d5   :  { %v333_v7 = vpop.permute.xlu0 %332  ;;  %v666_v52 = vpop.permute.xlu1 %665  ;;  %v483_v22 = vadd.f32 %v482_v18, %v3461_v38  ;;  %v749_v15 = vadd.f32 %v748_v48, %v3455_v56  ;;  %v750_v61 = vsel %vm89_vm0, %v741_v60, 0.0  ;;  %v606_v38 = vrot.slane %v3574_v33, %v3257_v40 }
 0x1d6   :  { %v568_v0 = vsel %vm384_vm12, %v560_v10, %v333_v7  ;;  %v686_v50 = vsel %vm366_vm10, %v666_v52, %v3503_v47  ;;  %v615_v10 = vsel %vm89_vm0, %v607_v43, 0.0  ;;  %v486_v43 = vsel %vm89_vm0, %v476_v23, 0.0 }
 0x1d7   :  { %v608_v36 = vmul.f32 %v582_v8, %v568_v0  ;;  %v694_v63 = vsel %vm375_vm11, %v686_v50, %v3166_v54  ;;  %v485_v8 = vadd.f32 %v3475_v30, %v483_v22  ;;  %v620_v60 = vsel %vm89_vm0, %v610_v42, 0.0 }
 0x1d8   :  { %v702_v9 = vsel %vm384_vm12, %v694_v63, %v309_v32  ;;  %v382_v32 = vsel %vm375_vm11, %v373_v55, %v3375_v34  ;;  %v383_v30 = vsel %vm375_vm11, %v374_v19, %v333_v7  ;;  %v4533_v42 = vrot.slane %v3499_v11, %v3257_v40 }
 0x1d9   :  { %v616_v62 = vsel %vm89_vm0, %v608_v36, 0.0  ;;  %v353_v4 = vpop.permute.xlu0 %352  ;;  %v804_v0 = vpop.permute.xlu1 %803  ;;  %v742_v56 = vmul.f32 %v722_v31, %v702_v9  ;;  %v487_v51 = vadd.f32 %v486_v43, %v485_v8  ;;  %v751_v36 = vadd.f32 %v750_v61, %v749_v15 }
 0x1da   :  { %v617_v18 = vadd.f32 %v616_v62, %v615_v10  ;;  %v390_v48 = vsel %vm384_vm12, %v381_v58, %v353_v4  ;;  %v821_v10 = vsel %vm366_vm10, %v804_v0, %v3200_v59  ;;  %v614_v23 = vmul.f32 %v606_v38, %v3519_v24 }
 0x1db   :  { %v478_v50 = vmul.f32 %v464_v13, %v390_v48  ;;  %v752_v31 = vsel %vm89_vm0, %v742_v56, 0.0  ;;  %v612_v13 = vmul.f32 %v4533_v42, %v3357_v16  ;;  %v738_v34 = vrot.slane %v3574_v33, %v3262_v44 }
 0x1dc   :  { %v619_v22 = vadd.f32 %v3482_v41, %v617_v18  ;;  %v489_v19 = vadd.f32 %v3515_v17, %v487_v51  ;;  %v829_v15 = vsel %vm375_vm11, %v821_v10, %v3198_v57  ;;  %v4534_v40 = vrot.slane %v3406_v26, %v3241_v29 }
 0x1dd   :  { %v355_v58 = vpop.permute.xlu0 %354  ;;  %v802_v63 = vpop.permute.xlu1 %801  ;;  %v490_v41 = vsel %vm89_vm0, %v478_v50, 0.0  ;;  %v472_v24 = vrot.slane %v3574_v33, %v3241_v29  ;;  %v753_v17 = vadd.f32 %v752_v31, %v751_v36  ;;  %v624_v0 = vsel %vm89_vm0, %v612_v13, 0.0  ;;  %v4540_v13 = vld [vmem:[#allocation17_spill] sm:$0xff] }
 0x1de   :  { %v621_v7 = vadd.f32 %v620_v60, %v619_v22  ;;  %v391_v55 = vsel %vm384_vm12, %v382_v32, %v355_v58  ;;  %v820_v59 = vsel %vm366_vm10, %v802_v63, %v666_v52  ;;  %v4535_v52 = vrot.slane %v3499_v11, %v3262_v44 }
 0x1df   :  { %v479_v16 = vmul.f32 %v4534_v40, %v391_v55  ;;  %v828_v61 = vsel %vm375_vm11, %v820_v59, %v3503_v47  ;;  %v491_v9 = vadd.f32 %v490_v41, %v489_v19  ;;  %v628_v29 = vsel %vm89_vm0, %v614_v23, 0.0 }
 0x1e0   :  { %v623_v62 = vadd.f32 %v3485_v46, %v621_v7  ;;  %v744_v51 = vmul.f32 %v4535_v52, %v3293_v27  ;;  %v746_v18 = vmul.f32 %v738_v34, %v3334_v5  ;;  %v836_v44 = vsel %vm384_vm12, %v828_v61, %v3166_v54 }
 0x1e1   :  { %v492_v57 = vsel %vm89_vm0, %v479_v16, 0.0  ;;  %v357_v4 = vpop.permute.xlu0 %356  ;;  %v806_v8 = vpop.permute.xlu1 %805  ;;  %v755_v56 = vadd.f32 %v3509_v3, %v753_v17  ;;  %v4536_v48 = vrot.slane %v3491_v14, %v3264_v45  ;;  %v4537_v3 = vrot.slane %v3495_v28, %v3264_v45 }
 0x1e2   :  { %v392_v38 = vsel %vm384_vm12, %v383_v30, %v357_v4  ;;  %v822_v46 = vsel %vm366_vm10, %v806_v8, %v3206_v1  ;;  %v625_v47 = vadd.f32 %v624_v0, %v623_v62  ;;  %v493_v60 = vadd.f32 %v492_v57, %v491_v9 }
 0x1e3   :  { %v480_v27 = vmul.f32 %v472_v24, %v392_v38  ;;  %v872_v43 = vmul.f32 %v4536_v48, %v3330_v6  ;;  %v830_v50 = vsel %vm375_vm11, %v822_v46, %v3208_v2  ;;  %v756_v32 = vsel %vm89_vm0, %v744_v51, 0.0 }
 0x1e4   :  { %v627_v1 = vadd.f32 %v3464_v12, %v625_v47  ;;  %v757_v36 = vadd.f32 %v756_v32, %v755_v56  ;;  %v874_v30 = vmul.f32 %v4537_v3, %v3432_v35  ;;  %v758_v10 = vsel %vm89_vm0, %v3506_v39, 0.0 }
 0x1e5   :  { %v494_v5 = vsel %vm89_vm0, %v480_v27, 0.0  ;;  %v880_v22 = vsel %vm89_vm0, %v872_v43, 0.0  ;;  %v4538_v12 = vrot.slane %v3398_v25, %v3264_v45  ;;  %v4539_v58 = vrot.slane %v3499_v11, %v3264_v45 }
 0x1e6   :  { %v629_v14 = vadd.f32 %v628_v29, %v627_v1  ;;  %v495_v6 = vadd.f32 %v494_v5, %v493_v60  ;;  %v881_v2 = vadd.f32 %v880_v22, %v3512_v49  ;;  %v759_v28 = vadd.f32 %v758_v10, %v757_v36 }
 0x1e7   :  { %v875_v31 = vmul.f32 %v4538_v12, %v3552_v20  ;;  %v876_v63 = vmul.f32 %v4539_v58, %v836_v44  ;;  %v882_v35 = vsel %vm89_vm0, %v3439_v37, 0.0  ;;  %v837_v42 = vsel %vm384_vm12, %v829_v15, %v3056_v21 }
 0x1e8   :  { %v838_v39 = vsel %vm384_vm12, %v830_v50, %v4540_v13  ;;  %631 = vrot.lane.b32.xlu1 %v629_v14, %s2938_s7  ;;  %497 = vrot.lane.b32.xlu0 %v495_v6, %s2938_s7  ;;  %v883_v25 = vadd.f32 %v882_v35, %v881_v2  ;;  %v866_v11 = vrot.slane %v3406_v26, %v3264_v45  ;;  %v760_v49 = vsel %vm89_vm0, %v746_v18, 0.0 }
 0x1e9   :  { %v870_v37 = vrot.slane %v3574_v33, %v3264_v45  ;;  %v884_v20 = vsel %vm89_vm0, %v874_v30, 0.0  ;;  %v761_v21 = vadd.f32 %v760_v49, %v759_v28  ;;  %v886_v41 = vsel %vm89_vm0, %v875_v31, 0.0 }
 0x1ea   :  { %v885_v23 = vadd.f32 %v884_v20, %v883_v25  ;;  %v877_v34 = vmul.f32 %v866_v11, %v837_v42  ;;  %v888_v55 = vsel %vm89_vm0, %v876_v63, 0.0 }
 0x1eb   :  { %v878_v7 = vmul.f32 %v870_v37, %v838_v39 }
 0x1ec   :  { %763 = vrot.lane.b32.xlu0 %v761_v21, %s2938_s7  ;;  %v887_v59 = vadd.f32 %v886_v41, %v885_v23  ;;  %v890_v26 = vsel %vm89_vm0, %v877_v34, 0.0 }
 0x1ed   :  { %v892_v15 = vsel %vm89_vm0, %v878_v7, 0.0 }
 0x1ee   :  { %v889_v19 = vadd.f32 %v888_v55, %v887_v59  ;;  %v2940_v59 = vmov 1  }
 0x1ef   :  { %2832 = vset.pattern.permute.xlu1 %v2940_v59  ;;  %2833 = vset.pattern.permute.xlu0 %v2940_v59 }
 0x1f0   :  { %v891_v40 = vadd.f32 %v890_v26, %v889_v19 }
 0x1f2   :  { %v893_v45 = vadd.f32 %v892_v15, %v891_v40 }
 0x1f4   :  { %895 = vrot.lane.b32.xlu1 %v893_v45, %s2938_s7 }
 0x25a   :  { %v498_v33 = vpop.permute.xlu0 %497  ;;  %v632_v16 = vpop.permute.xlu1 %631 }
 0x25b   :  { %v500_v24 = vadd.f32 %v498_v33, %v495_v6  ;;  %v634_v61 = vadd.f32 %v632_v16, %v629_v14 }
 0x25d   :  { %502 = vrot.lane.b32.xlu0 %v500_v24, %s2938_s7  ;;  %636 = vrot.lane.b32.xlu1 %v634_v61, %s2938_s7 }
 0x25e   :  { %v764_v62 = vpop.permute.xlu0 %763 }
 0x25f   :  { %v766_v52 = vadd.f32 %v764_v62, %v761_v21 }
 0x261   :  { %505 = vrot.lane.b32.xlu0 %v500_v24, %s2933_s21  ;;  %639 = vrot.lane.b32.xlu1 %v634_v61, %s2933_s21 }
 0x265   :  { %768 = vrot.lane.b32.xlu0 %v766_v52, %s2938_s7  ;;  %508 = vrot.lane.b32.xlu1 %v500_v24, %s2939_s8 }
 0x266   :  { %v896_v51 = vpop.permute.xlu1 %895 }
 0x267   :  { %v898_v17 = vadd.f32 %v896_v51, %v893_v45  ;;  %v2942_v51 = vmov 2  }
 0x269   :  { %642 = vrot.lane.b32.xlu0 %v634_v61, %s2939_s8  ;;  %771 = vrot.lane.b32.xlu1 %v766_v52, %s2933_s21 }
 0x26d   :  { %774 = vrot.lane.b32.xlu1 %v766_v52, %s2939_s8  ;;  %900 = vrot.lane.b32.xlu0 %v898_v17, %s2938_s7  ;;  %s4344_s7 = sld [smem:[#allocation9 + $0x1]] }
 0x271   :  { %906 = vrot.lane.b32.xlu1 %v898_v17, %s2939_s8  ;;  %903 = vrot.lane.b32.xlu0 %v898_v17, %s2933_s21  ;;  %s4346_s8 = sld [smem:[#allocation7 + $0x2]] }
 0x2cf   :  { %v503_v9 = vpop.permute.xlu0 %502  ;;  %v637_v57 = vpop.permute.xlu1 %636 }
 0x2d0   :  { %v512_v0 = vsel %vm511_vm13, %v500_v24, %v503_v9  ;;  %v645_v44 = vsel %vm511_vm13, %v634_v61, %v637_v57 }
 0x2d3   :  { %v506_v4 = vpop.permute.xlu0 %505  ;;  %v640_v8 = vpop.permute.xlu1 %639 }
 0x2d4   :  { %v513_v29 = vsel %vm366_vm10, %v512_v0, %v506_v4  ;;  %v646_v27 = vsel %vm366_vm10, %v645_v44, %v640_v8 }
 0x2d7   :  { %v769_v38 = vpop.permute.xlu0 %768  ;;  %v509_v46 = vpop.permute.xlu1 %508 }
 0x2d8   :  { %v515_v47 = vsel %vm514_vm14, %v513_v29, %v509_v46  ;;  %v777_v50 = vsel %vm511_vm13, %v766_v52, %v769_v38  ;;  %v2941_v52 = vmov 3  }
 0x2d9   :  { %v516_v18 = vsel %vm375_vm11, %v515_v47, -inf }
 0x2da   :  { %517 = vmax.xlane.f32.xlu0 %v516_v18 }
 0x2db   :  { %v643_v56 = vpop.permute.xlu0 %642  ;;  %v772_v48 = vpop.permute.xlu1 %771 }
 0x2dc   :  { %v647_v43 = vsel %vm514_vm14, %v646_v27, %v643_v56  ;;  %v778_v1 = vsel %vm366_vm10, %v777_v50, %v772_v48  ;;  %v4541_v27 = vld [vmem:[#allocation18_spill] sm:$0xff] }
 0x2dd   :  { %v648_v60 = vsel %vm375_vm11, %v647_v43, -inf }
 0x2de   :  { %649 = vmax.xlane.f32.xlu1 %v648_v60 }
 0x2df   :  { %v901_v32 = vpop.permute.xlu0 %900  ;;  %v775_v5 = vpop.permute.xlu1 %774 }
 0x2e0   :  { %v779_v36 = vsel %vm514_vm14, %v778_v1, %v775_v5  ;;  %v909_v30 = vsel %vm511_vm13, %v898_v17, %v901_v32  ;;  %v2943_v17 = vmov 0   ;;  %v4542_v1 = vld [vmem:[#allocation19_spill] sm:$0xff] }
 0x2e1   :  { %v780_v3 = vsel %vm375_vm11, %v779_v36, -inf }
 0x2e2   :  { %781 = vmax.xlane.f32.xlu0 %v780_v3 }
 0x2e3   :  { %v904_v22 = vpop.permute.xlu0 %903  ;;  %v907_v14 = vpop.permute.xlu1 %906 }
 0x2e4   :  { %v910_v6 = vsel %vm366_vm10, %v909_v30, %v904_v22 }
 0x2e5   :  { %v911_v10 = vsel %vm514_vm14, %v910_v6, %v907_v14  ;;  %v3763_v14 = vld [vmem:[#allocation2 + $0x10] sm:$0xff] }
 0x2e6   :  { %v912_v2 = vsel %vm375_vm11, %v911_v10, -inf }
 0x2e7   :  { %913 = vmax.xlane.f32.xlu0 %v912_v2  ;;  %v3770_v2 = vld [vmem:[#allocation2 + $0x28] sm:$0xff] }
 0x363   :  { %v518_v12 = vpop.xlane.xlu0 %517 }
 0x364   :  { %v519_v31 = vsub.f32 %v515_v47, %v518_v12 }
 0x366   :  { %v520_v58 = vmul.f32 1.442695, %v519_v31 }
 0x367   :  { %v650_v63 = vpop.xlane.xlu1 %649 }
 0x368   :  { %2844 = vpow2.f32 %v520_v58  ;;  %v651_v28 = vsub.f32 %v647_v43, %v650_v63  ;;  %v3780_v58 = vld [vmem:[#allocation2 + $0x18] sm:$0xff] }
 0x36a   :  { %v652_v35 = vmul.f32 1.442695, %v651_v28 }
 0x36b   :  { %v782_v42 = vpop.xlane.xlu0 %781 }
 0x36c   :  { %2846 = vpow2.f32 %v652_v35  ;;  %v783_v13 = vsub.f32 %v779_v36, %v782_v42  ;;  %v3786_v35 = vld [vmem:[#allocation2 + $0x20] sm:$0xff] }
 0x36e   :  { %v784_v39 = vmul.f32 1.442695, %v783_v13 }
 0x370   :  { %2848 = vpow2.f32 %v784_v39  ;;  %v914_v25 = vpop.xlane.xlu0 %913 }
 0x371   :  { %v915_v11 = vsub.f32 %v911_v10, %v914_v25 }
 0x373   :  { %v916_v49 = vmul.f32 1.442695, %v915_v11 }
 0x375   :  { %v2845_v37 = vpop.eup %2844  ;;  %2850 = vpow2.f32 %v916_v49 }
 0x376   :  { %v522_v20 = vsel %vm375_vm11, %v2845_v37, 0.0 }
 0x377   :  { %523 = vadd.xlane.f32.xlu1 %v522_v20 }
 0x379   :  { %v2847_v21 = vpop.eup %2846 }
 0x37a   :  { %v654_v23 = vsel %vm375_vm11, %v2847_v21, 0.0 }
 0x37b   :  { %655 = vadd.xlane.f32.xlu0 %v654_v23 }
 0x37d   :  { %v2849_v34 = vpop.eup %2848 }
 0x37e   :  { %v786_v7 = vsel %vm375_vm11, %v2849_v34, 0.0 }
 0x37f   :  { %787 = vadd.xlane.f32.xlu1 %v786_v7  ;;  %v3820_v7 = vld [vmem:[#allocation2 + $0x8] sm:$0xff] }
 0x382   :  { %v2851_v41 = vpop.eup %2850 }
 0x383   :  { %v918_v55 = vsel %vm375_vm11, %v2851_v41, 0.0 }
 0x384   :  { %919 = vadd.xlane.f32.xlu0 %v918_v55 }
 0x400   :  { %v524_v19 = vpop.xlane.xlu1 %523 }
 0x401   :  { %2852 = vrcp.f32 %v524_v19 }
 0x404   :  { %v656_v26 = vpop.xlane.xlu0 %655 }
 0x405   :  { %2854 = vrcp.f32 %v656_v26 }
 0x408   :  { %v788_v15 = vpop.xlane.xlu1 %787 }
 0x409   :  { %2856 = vrcp.f32 %v788_v15 }
 0x40d   :  { %v920_v16 = vpop.xlane.xlu0 %919 }
 0x40e   :  { %v2853_v40 = vpop.eup %2852  ;;  %2858 = vrcp.f32 %v920_v16 }
 0x40f   :  { %v526_v45 = vmul.f32 %v2853_v40, %v2845_v37 }
 0x411   :  { %937 = vperm.xlu1 %2832, %v526_v45  }
 0x412   :  { %v2855_v33 = vpop.eup %2854 }
 0x413   :  { %v658_v24 = vmul.f32 %v2855_v33, %v2847_v21  ;;  %v3812_v21 = vld [vmem:[#allocation2] sm:$0xff] }
 0x415   :  { %1106 = vperm.xlu0 %2833, %v658_v24  }
 0x416   :  { %v2857_v61 = vpop.eup %2856 }
 0x417   :  { %v790_v62 = vmul.f32 %v2857_v61, %v2849_v34 }
 0x419   :  { %2839 = vset.pattern.permute.xlu0 %v2941_v52  ;;  %1275 = vperm.xlu1 %2832, %v790_v62  }
 0x41a   :  { %1379 = vperm.xlu0 %2839, %v790_v62  }
 0x41b   :  { %v2859_v9 = vpop.eup %2858 }
 0x41c   :  { %v922_v57 = vmul.f32 %v2859_v9, %v2851_v41 }
 0x41d   :  { %2834 = vset.pattern.permute.xlu1 %v2942_v51 }
 0x41e   :  { %2842 = vset.pattern.permute.xlu0 %v2943_v17  ;;  %989 = vperm.xlu1 %2834, %v526_v45  }
 0x41f   :  { %1094 = vperm.xlu0 %2842, %v658_v24  }
 0x422   :  { %1158 = vperm.xlu1 %2834, %v658_v24  }
 0x423   :  { %2843 = vset.pattern.permute.xlu0 %v2941_v52 }
 0x426   :  { %2835 = vset.pattern.permute.xlu1 %v2940_v59  ;;  %v3828_v59 = vld [vmem:[#allocation2 + $0x30] sm:$0xff] }
 0x427   :  { %1444 = vperm.xlu1 %2835, %v922_v57  }
 0x42b   :  { %2836 = vset.pattern.permute.xlu1 %v2942_v51 }
 0x42c   :  { %1327 = vperm.xlu1 %2836, %v790_v62  }
 0x430   :  { %2837 = vset.pattern.permute.xlu1 %v2941_v52 }
 0x431   :  { %1041 = vperm.xlu1 %2837, %v526_v45  }
 0x435   :  { %1210 = vperm.xlu1 %2837, %v658_v24  }
 0x439   :  { %2838 = vset.pattern.permute.xlu1 %v2942_v51 }
 0x43a   :  { %1496 = vperm.xlu1 %2838, %v922_v57  }
 0x43e   :  { %2840 = vset.pattern.permute.xlu1 %v2941_v52 }
 0x43f   :  { %1548 = vperm.xlu1 %2840, %v922_v57  }
 0x443   :  { %2841 = vset.pattern.permute.xlu1 %v2943_v17 }
 0x444   :  { %925 = vperm.xlu1 %2841, %v526_v45   ;;  %v3842_v45 = vld [vmem:[#allocation2 + $0x38] sm:$0xff] }
 0x448   :  { %1263 = vperm.xlu1 %2841, %v790_v62  }
 0x44c   :  { %1432 = vperm.xlu1 %2841, %v922_v57  }
 0x48c   :  { %v3708_v4 = vpop.permute.xlu1 %937 }
 0x48d   :  { %v940_v8 = vmul.f32 %v3708_v4, %v3148_v53  ;;  %v941_v38 = vmul.f32 %v3708_v4, %v3166_v54  ;;  %v942_v34 = vmul.f32 %v3812_v21, %v3708_v4  ;;  %v943_v55 = vmul.f32 %v3820_v7, %v3708_v4 }
 0x48f   :  { %956 = vrot.lane.b32.xlu0 %v940_v8, %s2933_s21 }
 0x490   :  { %v3713_v0 = vpop.permute.xlu0 %1106 }
 0x491   :  { %v1109_v29 = vmul.f32 %v3713_v0, %v3148_v53  ;;  %v1110_v47 = vmul.f32 %v3713_v0, %v3166_v54  ;;  %v1111_v23 = vmul.f32 %v3812_v21, %v3713_v0  ;;  %v1112_v41 = vmul.f32 %v3820_v7, %v3713_v0 }
 0x493   :  { %1125 = vrot.lane.b32.xlu1 %v1109_v29, %s2933_s21  ;;  %958 = vrot.lane.b32.xlu0 %v941_v38, %s2933_s21 }
 0x494   :  { %v3721_v46 = vpop.permute.xlu1 %1275 }
 0x495   :  { %v1278_v18 = vmul.f32 %v3721_v46, %v3148_v53  ;;  %v1279_v43 = vmul.f32 %v3721_v46, %v3166_v54  ;;  %v3784_v28 = vpop.permute.xlu0 %1379  ;;  %v1280_v26 = vmul.f32 %v3812_v21, %v3721_v46  ;;  %v1281_v15 = vmul.f32 %v3820_v7, %v3721_v46 }
 0x496   :  { %v1382_v13 = vmul.f32 %v3763_v14, %v3784_v28  ;;  %v1383_v25 = vmul.f32 %v3780_v58, %v3784_v28  ;;  %v1384_v8 = vmul.f32 %v3786_v35, %v3784_v28  ;;  %v1385_v38 = vmul.f32 %v3770_v2, %v3784_v28 }
 0x497   :  { %1127 = vrot.lane.b32.xlu1 %v1110_v47, %s2933_s21  ;;  %1294 = vrot.lane.b32.xlu0 %v1278_v18, %s2933_s21 }
 0x499   :  { %v3729_v44 = vpop.permute.xlu1 %989 }
 0x49a   :  { %v992_v56 = vmul.f32 %v3729_v44, %v4541_v27  ;;  %v993_v32 = vmul.f32 %v3729_v44, %v4542_v1  ;;  %v994_v19 = vmul.f32 %v3828_v59, %v3729_v44  ;;  %v995_v33 = vmul.f32 %v3842_v45, %v3729_v44 }
 0x49c   :  { %1008 = vrot.lane.b32.xlu1 %v992_v56, %s2935_s23 }
 0x49d   :  { %v3734_v48 = vpop.permute.xlu1 %1158 }
 0x49e   :  { %v1161_v60 = vmul.f32 %v3734_v48, %v4541_v27  ;;  %v1162_v3 = vmul.f32 %v3734_v48, %v4542_v1  ;;  %v1163_v40 = vmul.f32 %v3828_v59, %v3734_v48  ;;  %v1164_v61 = vmul.f32 %v3842_v45, %v3734_v48 }
 0x49f   :  { %v1114_v1 = vmul.f32 %v3780_v58, %v3713_v0 }
 0x4a0   :  { %1296 = vrot.lane.b32.xlu1 %v1279_v43, %s2933_s21  ;;  %1177 = vrot.lane.b32.xlu0 %v1161_v60, %s2935_s23  ;;  %v1113_v43 = vmul.f32 %v3763_v14, %v3713_v0  ;;  %v944_v60 = vmul.f32 %v3763_v14, %v3708_v4 }
 0x4a2   :  { %v3742_v50 = vpop.permute.xlu1 %1444 }
 0x4a3   :  { %v1447_v5 = vmul.f32 %v3742_v50, %v3148_v53  ;;  %v1448_v22 = vmul.f32 %v3742_v50, %v3166_v54  ;;  %v1449_v16 = vmul.f32 %v3812_v21, %v3742_v50  ;;  %v1450_v52 = vmul.f32 %v3820_v7, %v3742_v50 }
 0x4a4   :  { %1010 = vrot.lane.b32.xlu1 %v993_v32, %s2935_s23  ;;  %v945_v32 = vmul.f32 %v3780_v58, %v3708_v4 }
 0x4a5   :  { %1463 = vrot.lane.b32.xlu0 %v1447_v5, %s2933_s21 }
 0x4a7   :  { %v3750_v36 = vpop.permute.xlu1 %1327 }
 0x4a8   :  { %v1330_v30 = vmul.f32 %v3750_v36, %v4541_v27  ;;  %v1331_v12 = vmul.f32 %v3770_v2, %v3750_v36  ;;  %v1332_v24 = vmul.f32 %v3828_v59, %v3750_v36  ;;  %v1333_v51 = vmul.f32 %v3842_v45, %v3750_v36 }
 0x4a9   :  { %1179 = vrot.lane.b32.xlu0 %v1162_v3, %s2935_s23  ;;  %v996_v3 = vmul.f32 %v3812_v21, %v3729_v44 }
 0x4aa   :  { %1346 = vrot.lane.b32.xlu1 %v1330_v30, %s2935_s23  ;;  %v3910_v30 = vpop.permute.xlu0 %1094 }
 0x4ac   :  { %v3760_v53 = vpop.permute.xlu1 %1041 }
 0x4ad   :  { %1465 = vrot.lane.b32.xlu0 %v1448_v22, %s2933_s21  ;;  %v1044_v6 = vmul.f32 %v3763_v14, %v3760_v53  ;;  %v1045_v63 = vmul.f32 %v3780_v58, %v3760_v53  ;;  %v1046_v62 = vmul.f32 %v3786_v35, %v3760_v53  ;;  %v1047_v9 = vmul.f32 %v3770_v2, %v3760_v53 }
 0x4ae   :  { %v1282_v22 = vmul.f32 %v3763_v14, %v3721_v46 }
 0x4af   :  { %1060 = vrot.lane.b32.xlu1 %v1044_v6, %s2937_s25 }
 0x4b0   :  { %v3768_v10 = vpop.permute.xlu1 %1210 }
 0x4b1   :  { %v1213_v54 = vmul.f32 %v3763_v14, %v3768_v10  ;;  %v1214_v39 = vmul.f32 %v3780_v58, %v3768_v10  ;;  %v1215_v17 = vmul.f32 %v3786_v35, %v3768_v10  ;;  %v1216_v29 = vmul.f32 %v3770_v2, %v3768_v10 }
 0x4b3   :  { %1348 = vrot.lane.b32.xlu1 %v1331_v12, %s2935_s23  ;;  %1229 = vrot.lane.b32.xlu0 %v1213_v54, %s2937_s25  ;;  %v1283_v12 = vmul.f32 %v3780_v58, %v3721_v46 }
 0x4b5   :  { %v3778_v31 = vpop.permute.xlu1 %1496 }
 0x4b6   :  { %v1499_v42 = vmul.f32 %v3786_v35, %v3778_v31  ;;  %v1500_v49 = vmul.f32 %v3770_v2, %v3778_v31  ;;  %v1501_v57 = vmul.f32 %v3828_v59, %v3778_v31  ;;  %v1502_v47 = vmul.f32 %v3842_v45, %v3778_v31 }
 0x4b7   :  { %1062 = vrot.lane.b32.xlu1 %v1045_v63, %s2937_s25  ;;  %v1165_v63 = vmul.f32 %v3812_v21, %v3734_v48 }
 0x4b8   :  { %1515 = vrot.lane.b32.xlu0 %v1499_v42, %s2935_s23 }
 0x4ba   :  { %v3800_v11 = vpop.permute.xlu1 %1548 }
 0x4bb   :  { %1398 = vrot.lane.b32.xlu1 %v1382_v13, %s2937_s25  ;;  %v1552_v37 = vmul.f32 %v3780_v58, %v3800_v11  ;;  %v1551_v20 = vmul.f32 %v3763_v14, %v3800_v11  ;;  %v1554_v18 = vmul.f32 %v3770_v2, %v3800_v11  ;;  %v1553_v27 = vmul.f32 %v3786_v35, %v3800_v11 }
 0x4bc   :  { %1231 = vrot.lane.b32.xlu0 %v1214_v39, %s2937_s25  ;;  %v997_v13 = vmul.f32 %v3820_v7, %v3729_v44  ;;  %v1451_v39 = vmul.f32 %v3763_v14, %v3742_v50 }
 0x4bf   :  { %1400 = vrot.lane.b32.xlu1 %v1383_v25, %s2937_s25  ;;  %v3892_v56 = vpop.permute.xlu1 %925 }
 0x4c0   :  { %1517 = vrot.lane.b32.xlu0 %v1500_v49, %s2935_s23 }
 0x4c3   :  { %1569 = vrot.lane.b32.xlu1 %v1552_v37, %s2937_s25  ;;  %v3904_v5 = vpop.permute.xlu1 %1263  ;;  %v1334_v37 = vmul.f32 %v3812_v21, %v3750_v36 }
 0x4c4   :  { %1567 = vrot.lane.b32.xlu0 %v1551_v20, %s2937_s25  ;;  %v1166_v20 = vmul.f32 %v3820_v7, %v3734_v48 }
 0x4c7   :  { %1129 = vrot.lane.b32.xlu1 %v1111_v23, %s2933_s21  ;;  %v3916_v6 = vpop.permute.xlu1 %1432  ;;  %v1048_v23 = vmul.f32 %v3828_v59, %v3760_v53 }
 0x4c8   :  { %960 = vrot.lane.b32.xlu0 %v942_v34, %s2933_s21 }
 0x4cb   :  { %1131 = vrot.lane.b32.xlu1 %v1112_v41, %s2933_s21 }
 0x4cc   :  { %962 = vrot.lane.b32.xlu0 %v943_v55, %s2933_s21  ;;  %v1452_v55 = vmul.f32 %v3780_v58, %v3742_v50 }
 0x4cf   :  { %1012 = vrot.lane.b32.xlu1 %v994_v19, %s2935_s23  ;;  %v1335_v19 = vmul.f32 %v3820_v7, %v3750_v36 }
 0x4d0   :  { %1298 = vrot.lane.b32.xlu0 %v1280_v26, %s2933_s21 }
 0x4d3   :  { %1300 = vrot.lane.b32.xlu1 %v1281_v15, %s2933_s21 }
 0x4d4   :  { %1181 = vrot.lane.b32.xlu0 %v1163_v40, %s2935_s23  ;;  %v1217_v40 = vmul.f32 %v3828_v59, %v3768_v10 }
 0x4d7   :  { %1014 = vrot.lane.b32.xlu1 %v995_v33, %s2935_s23  ;;  %v1049_v33 = vmul.f32 %v3842_v45, %v3760_v53 }
 0x4d8   :  { %1467 = vrot.lane.b32.xlu0 %v1449_v16, %s2933_s21  ;;  %v1503_v16 = vmul.f32 %v3812_v21, %v3778_v31 }
 0x4db   :  { %1350 = vrot.lane.b32.xlu1 %v1332_v24, %s2935_s23 }
 0x4dc   :  { %1183 = vrot.lane.b32.xlu0 %v1164_v61, %s2935_s23 }
 0x4df   :  { %1064 = vrot.lane.b32.xlu1 %v1046_v62, %s2937_s25  ;;  %v1386_v62 = vmul.f32 %v3828_v59, %v3784_v28 }
 0x4e0   :  { %1469 = vrot.lane.b32.xlu0 %v1450_v52, %s2933_s21  ;;  %v1218_v52 = vmul.f32 %v3842_v45, %v3768_v10 }
 0x4e3   :  { %1352 = vrot.lane.b32.xlu1 %v1333_v51, %s2935_s23 }
 0x4e4   :  { %1233 = vrot.lane.b32.xlu0 %v1215_v17, %s2937_s25 }
 0x4e7   :  { %1066 = vrot.lane.b32.xlu1 %v1047_v9, %s2937_s25  ;;  %v1387_v9 = vmul.f32 %v3842_v45, %v3784_v28 }
 0x4e8   :  { %1519 = vrot.lane.b32.xlu0 %v1501_v57, %s2935_s23  ;;  %v1504_v57 = vmul.f32 %v3820_v7, %v3778_v31 }
 0x4eb   :  { %1402 = vrot.lane.b32.xlu1 %v1384_v8, %s2937_s25 }
 0x4ec   :  { %1235 = vrot.lane.b32.xlu0 %v1216_v29, %s2937_s25 }
 0x4ef   :  { %1404 = vrot.lane.b32.xlu1 %v1385_v38, %s2937_s25  ;;  %v1556_v38 = vmul.f32 %v3842_v45, %v3800_v11 }
 0x4f0   :  { %1521 = vrot.lane.b32.xlu0 %v1502_v47, %s2935_s23  ;;  %v1555_v47 = vmul.f32 %v3828_v59, %v3800_v11 }
 0x4f3   :  { %1573 = vrot.lane.b32.xlu1 %v1554_v18, %s2937_s25 }
 0x4f4   :  { %1571 = vrot.lane.b32.xlu0 %v1553_v27, %s2937_s25 }
 0x4f7   :  { %1133 = vrot.lane.b32.xlu1 %v1113_v43, %s2933_s21  ;;  %v1115_v43 = vmul.f32 %v3786_v35, %v3713_v0 }
 0x4f8   :  { %964 = vrot.lane.b32.xlu0 %v944_v60, %s2933_s21  ;;  %v946_v60 = vmul.f32 %v3786_v35, %v3708_v4 }
 0x4fb   :  { %1135 = vrot.lane.b32.xlu1 %v1114_v1, %s2933_s21 }
 0x4fc   :  { %966 = vrot.lane.b32.xlu0 %v945_v32, %s2933_s21  ;;  %v1116_v32 = vmul.f32 %v3770_v2, %v3713_v0 }
 0x4ff   :  { %1016 = vrot.lane.b32.xlu1 %v996_v3, %s2935_s23 }
 0x500   :  { %1302 = vrot.lane.b32.xlu0 %v1282_v22, %s2933_s21  ;;  %v947_v22 = vmul.f32 %v3770_v2, %v3708_v4  ;;  %v1285_v4 = vmul.f32 %v3770_v2, %v3721_v46 }
 0x501   :  { %v3920_v54 = vpop.permute.xlu0 %956 }
 0x503   :  { %1304 = vrot.lane.b32.xlu1 %v1283_v12, %s2933_s21 }
 0x504   :  { %1185 = vrot.lane.b32.xlu0 %v1165_v63, %s2935_s23  ;;  %v998_v63 = vmul.f32 %v3763_v14, %v3729_v44 }
 0x505   :  { %v3926_v42 = vpop.permute.xlu1 %1125  ;;  %v3933_v25 = vpop.permute.xlu0 %958 }
 0x507   :  { %1018 = vrot.lane.b32.xlu1 %v997_v13, %s2935_s23 }
 0x508   :  { %1471 = vrot.lane.b32.xlu0 %v1451_v39, %s2933_s21  ;;  %v1284_v39 = vmul.f32 %v3786_v35, %v3721_v46 }
 0x509   :  { %v3936_v49 = vpop.permute.xlu1 %1127  ;;  %v3946_v34 = vpop.permute.xlu0 %1294 }
 0x50b   :  { %1354 = vrot.lane.b32.xlu1 %v1334_v37, %s2935_s23 }
 0x50c   :  { %1187 = vrot.lane.b32.xlu0 %v1166_v20, %s2935_s23  ;;  %v1167_v20 = vmul.f32 %v3763_v14, %v3734_v48 }
 0x50e   :  { %v3948_v41 = vpop.permute.xlu1 %1008 }
 0x50f   :  { %1068 = vrot.lane.b32.xlu1 %v1048_v23, %s2937_s25 }
 0x510   :  { %1473 = vrot.lane.b32.xlu0 %v1452_v55, %s2933_s21  ;;  %v999_v55 = vmul.f32 %v3780_v58, %v3729_v44 }
 0x512   :  { %v3956_v26 = vpop.permute.xlu0 %1177  ;;  %v3958_v15 = vpop.permute.xlu1 %1296 }
 0x513   :  { %1356 = vrot.lane.b32.xlu1 %v1335_v19, %s2935_s23 }
 0x514   :  { %1237 = vrot.lane.b32.xlu0 %v1217_v40, %s2937_s25  ;;  %v1453_v40 = vmul.f32 %v3786_v35, %v3742_v50 }
 0x516   :  { %v3971_v61 = vpop.permute.xlu1 %1010 }
 0x517   :  { %v3968_v24 = vpop.permute.xlu0 %1463  ;;  %1070 = vrot.lane.b32.xlu1 %v1049_v33, %s2937_s25  ;;  %v1336_v33 = vmul.f32 %v3763_v14, %v3750_v36 }
 0x518   :  { %1523 = vrot.lane.b32.xlu0 %v1503_v16, %s2935_s23 }
 0x51b   :  { %v3978_v51 = vpop.permute.xlu0 %1179  ;;  %1406 = vrot.lane.b32.xlu1 %v1386_v62, %s2937_s25  ;;  %v1168_v62 = vmul.f32 %v3780_v58, %v3734_v48  ;;  %v1337_v48 = vmul.f32 %v3780_v58, %v3750_v36 }
 0x51c   :  { %1239 = vrot.lane.b32.xlu0 %v1218_v52, %s2937_s25  ;;  %v3982_v17 = vpop.permute.xlu1 %1346  ;;  %v1050_v52 = vmul.f32 %v3812_v21, %v3760_v53 }
 0x51f   :  { %1408 = vrot.lane.b32.xlu1 %v1387_v9, %s2937_s25  ;;  %v3990_v8 = vpop.permute.xlu0 %1465 }
 0x520   :  { %1525 = vrot.lane.b32.xlu0 %v1504_v57, %s2935_s23  ;;  %v1454_v57 = vmul.f32 %v3770_v2, %v3742_v50  ;;  %v1051_v50 = vmul.f32 %v3820_v7, %v3760_v53 }
 0x521   :  { %v3992_v29 = vpop.permute.xlu1 %1060 }
 0x523   :  { %1577 = vrot.lane.b32.xlu1 %v1556_v38, %s2937_s25 }
 0x524   :  { %1575 = vrot.lane.b32.xlu0 %v1555_v47, %s2937_s25 }
 0x525   :  { %v4000_v18 = vpop.permute.xlu0 %1229  ;;  %v4002_v27 = vpop.permute.xlu1 %1348 }
 0x527   :  { %1137 = vrot.lane.b32.xlu1 %v1115_v43, %s2933_s21  ;;  %v1219_v43 = vmul.f32 %v3812_v21, %v3768_v10 }
 0x528   :  { %968 = vrot.lane.b32.xlu0 %v946_v60, %s2933_s21 }
 0x529   :  { %v4010_v1 = vpop.permute.xlu1 %1062 }
 0x52a   :  { %v4014_v3 = vpop.permute.xlu0 %1515 }
 0x52b   :  { %1139 = vrot.lane.b32.xlu1 %v1116_v32, %s2933_s21 }
 0x52c   :  { %970 = vrot.lane.b32.xlu0 %v947_v22, %s2933_s21  ;;  %v1505_v22 = vmul.f32 %v3763_v14, %v3778_v31 }
 0x52d   :  { %v4020_v12 = vpop.permute.xlu1 %1398 }
 0x52e   :  { %v4024_v13 = vpop.permute.xlu0 %1231 }
 0x52f   :  { %1020 = vrot.lane.b32.xlu1 %v998_v63, %s2935_s23  ;;  %v1388_v63 = vmul.f32 %v3812_v21, %v3784_v28 }
 0x530   :  { %1306 = vrot.lane.b32.xlu0 %v1284_v39, %s2933_s21 }
 0x531   :  { %v4030_v0 = vpop.permute.xlu1 %1400 }
 0x532   :  { %v4034_v37 = vpop.permute.xlu0 %1517 }
 0x533   :  { %1308 = vrot.lane.b32.xlu1 %v1285_v4, %s2933_s21  ;;  %v1220_v4 = vmul.f32 %v3820_v7, %v3768_v10  ;;  %v928_v10 = vmul.f32 %v3812_v21, %v3892_v56 }
 0x534   :  { %1189 = vrot.lane.b32.xlu0 %v1167_v20, %s2935_s23  ;;  %v1389_v20 = vmul.f32 %v3820_v7, %v3784_v28  ;;  %v1558_v28 = vmul.f32 %v3820_v7, %v3800_v11 }
 0x535   :  { %v4040_v23 = vpop.permute.xlu1 %1569 }
 0x536   :  { %v4044_v19 = vpop.permute.xlu0 %1567 }
 0x537   :  { %1022 = vrot.lane.b32.xlu1 %v999_v55, %s2935_s23 }
 0x538   :  { %1475 = vrot.lane.b32.xlu0 %v1453_v40, %s2933_s21  ;;  %v1506_v40 = vmul.f32 %v3780_v58, %v3778_v31 }
 0x539   :  { %v4050_v46 = vpop.permute.xlu1 %1129 }
 0x53a   :  { %v4054_v16 = vpop.permute.xlu0 %960 }
 0x53b   :  { %1358 = vrot.lane.b32.xlu1 %v1336_v33, %s2935_s23  ;;  %v1097_v33 = vmul.f32 %v3812_v21, %v3910_v30 }
 0x53c   :  { %1191 = vrot.lane.b32.xlu0 %v1168_v62, %s2935_s23 }
 0x53d   :  { %v4060_v44 = vpop.permute.xlu1 %1131  ;;  %v1149_v62 = vadd.f32 %v3926_v42, %v1097_v33  ;;  %v929_v42 = vmul.f32 %v3820_v7, %v3892_v56 }
 0x53e   :  { %v4064_v9 = vpop.permute.xlu0 %962 }
 0x53f   :  { %1072 = vrot.lane.b32.xlu1 %v1050_v52, %s2937_s25 }
 0x540   :  { %1477 = vrot.lane.b32.xlu0 %v1454_v57, %s2933_s21  ;;  %v980_v57 = vadd.f32 %v3920_v54, %v928_v10  ;;  %s2689_s21 = sld [smem:[#allocation12 + $0x1]] }
 0x541   :  { %v4070_v38 = vpop.permute.xlu1 %1012 }
 0x542   :  { %v4074_v47 = vpop.permute.xlu0 %1298 }
 0x543   :  { %1360 = vrot.lane.b32.xlu1 %v1337_v48, %s2935_s23  ;;  %v1557_v48 = vmul.f32 %v3812_v21, %v3800_v11  ;;  %v981_v11 = vadd.f32 %v3933_v25, %v929_v42 }
 0x544   :  { %1241 = vrot.lane.b32.xlu0 %v1219_v43, %s2937_s25  ;;  %v1098_v43 = vmul.f32 %v3820_v7, %v3910_v30 }
 0x545   :  { %v4080_v60 = vpop.permute.xlu1 %1300  ;;  %v1033_v25 = vadd.f32 %v3971_v61, %v981_v11 }
 0x546   :  { %v4084_v32 = vpop.permute.xlu0 %1181  ;;  %v1150_v54 = vadd.f32 %v3936_v49, %v1098_v43  ;;  %v1266_v49 = vmul.f32 %v3812_v21, %v3904_v5 }
 0x547   :  { %1074 = vrot.lane.b32.xlu1 %v1051_v50, %s2937_s25  ;;  %v1201_v50 = vadd.f32 %v3956_v26, %v1149_v62 }
 0x548   :  { %1527 = vrot.lane.b32.xlu0 %v1505_v22, %s2935_s23  ;;  %v1032_v22 = vadd.f32 %v3948_v41, %v980_v57  ;;  %v1267_v41 = vmul.f32 %v3820_v7, %v3904_v5  ;;  %v1202_v33 = vadd.f32 %v3978_v51, %v1150_v54  ;;  %v1318_v62 = vadd.f32 %v3946_v34, %v1266_v49 }
 0x549   :  { %v4090_v36 = vpop.permute.xlu1 %1014  ;;  %v1100_v54 = vmul.f32 %v3780_v58, %v3910_v30 }
 0x54a   :  { %v4094_v39 = vpop.permute.xlu0 %1467  ;;  %v1254_v51 = vadd.f32 %v4024_v13, %v1202_v33 }
 0x54b   :  { %1410 = vrot.lane.b32.xlu1 %v1388_v63, %s2937_s25  ;;  %v1253_v63 = vadd.f32 %v4000_v18, %v1201_v50  ;;  %v1436_v18 = vmul.f32 %v3820_v7, %v3916_v6  ;;  %v1370_v7 = vadd.f32 %v3982_v17, %v1318_v62  ;;  %v930_v17 = vmul.f32 %v3763_v14, %v3892_v56 }
 0x54c   :  { %1243 = vrot.lane.b32.xlu0 %v1220_v4, %s2937_s25 }
 0x54d   :  { %v4100_v53 = vpop.permute.xlu1 %1350  ;;  %v1488_v61 = vadd.f32 %v3990_v8, %v1436_v18  ;;  %v1422_v8 = vadd.f32 %v4020_v12, %v1370_v7  ;;  %v982_v42 = vadd.f32 %v4054_v16, %v930_v17 }
 0x54e   :  { %v4104_v55 = vpop.permute.xlu0 %1183 }
 0x54f   :  { %1412 = vrot.lane.b32.xlu1 %v1389_v20, %s2937_s25  ;;  %v1084_v20 = vadd.f32 %v3992_v29, %v1032_v22  ;;  %v1319_v29 = vadd.f32 %v3958_v15, %v1267_v41  ;;  %v1435_v15 = vmul.f32 %v3812_v21, %v3916_v6  ;;  %v1540_v34 = vadd.f32 %v4034_v37, %v1488_v61 }
 0x550   :  { %1529 = vrot.lane.b32.xlu0 %v1506_v40, %s2935_s23  ;;  %v1751_v40 = vld [vmem:[%s4515_s2] sm:$0xff]  ;;  %s2946_s2 = smov 116   ;;  %s2692_s23 = sld [smem:[#allocation11 + $0x3]] }
 0x551   :  { %v4115_v52 = vpop.permute.xlu1 %1064  ;;  %2755 = vmatprep.subr.mxu1 %v1751_v40  ;;  %v1487_v43 = vadd.f32 %v3968_v24, %v1435_v15 }
 0x552   :  { %v4120_v31 = vpop.permute.xlu0 %1469  ;;  %2756 = vmatpush3.msra.mxu1 %v1751_v40 }
 0x553   :  { %1581 = vrot.lane.b32.xlu1 %v1558_v28, %s2937_s25  ;;  %v1085_v28 = vadd.f32 %v4010_v1, %v1033_v25  ;;  %v1539_v21 = vadd.f32 %v4014_v3, %v1487_v43 }
 0x554   :  { %1579 = vrot.lane.b32.xlu0 %v1557_v48, %s2937_s25  ;;  %v1371_v48 = vadd.f32 %v4002_v27, %v1319_v29  ;;  %v1099_v27 = vmul.f32 %v3763_v14, %v3910_v30  ;;  %s4342_s25 = sld [smem:[#allocation7 + $0x1]] }
 0x555   :  { %v4134_v4 = vpop.permute.xlu1 %1352  ;;  %v1591_v12 = vadd.f32 %v4044_v19, %v1539_v21  ;;  %v1152_v19 = vadd.f32 %v4060_v44, %v1100_v54  ;;  %v1270_v54 = vmul.f32 %v3786_v35, %v3904_v5 }
 0x556   :  { %v1234_v26 = vpop.permute.xlu0 %1233  ;;  %v1423_v13 = vadd.f32 %v4030_v0, %v1371_v48  ;;  %v1592_v0 = vadd.f32 %v4040_v23, %v1540_v34  ;;  %v1151_v24 = vadd.f32 %v4050_v46, %v1099_v27  ;;  %v1034_v23 = vadd.f32 %v4070_v38, %v982_v42 }
 0x557   :  { %1639 = vrot.lane.b32.xlu1 %v1253_v63, %s2944_s28  ;;  %v931_v63 = vmul.f32 %v3780_v58, %v3892_v56  ;;  %v1204_v41 = vadd.f32 %v4104_v55, %v1152_v19  ;;  %v1268_v38 = vmul.f32 %v3763_v14, %v3904_v5 }
 0x558   :  { %1607 = vrot.lane.b32.xlu0 %v1084_v20, %s2945_s29  ;;  %v1203_v3 = vadd.f32 %v4084_v32, %v1151_v24  ;;  %v1086_v20 = vadd.f32 %v4115_v52, %v1034_v23  ;;  %v1269_v32 = vmul.f32 %v3780_v58, %v3904_v5 }
 0x559   :  { %v1067_v10 = vpop.permute.xlu1 %1066  ;;  %v983_v11 = vadd.f32 %v4064_v9, %v931_v63  ;;  %v1438_v9 = vmul.f32 %v3780_v58, %v3916_v6  ;;  %v1320_v49 = vadd.f32 %v4074_v47, %v1268_v38  ;;  %v1102_v63 = vmul.f32 %v3770_v2, %v3910_v30 }
 0x55a   :  { %v4155_v57 = vpop.permute.xlu0 %1519  ;;  %v1255_v46 = vadd.f32 %v1234_v26, %v1203_v3  ;;  %v1321_v44 = vadd.f32 %v4080_v60, %v1269_v32 }
 0x55b   :  { %1641 = vrot.lane.b32.xlu1 %v1254_v51, %s2944_s28  ;;  %v1035_v33 = vadd.f32 %v4090_v36, %v983_v11  ;;  %v1490_v29 = vadd.f32 %v4120_v31, %v1438_v9  ;;  %v1437_v36 = vmul.f32 %v3763_v14, %v3916_v6  ;;  %v1372_v60 = vadd.f32 %v4100_v53, %v1320_v49 }
 0x55c   :  { %1609 = vrot.lane.b32.xlu0 %v1085_v28, %s2945_s29  ;;  %v1373_v18 = vadd.f32 %v4134_v4, %v1321_v44  ;;  %v1440_v9 = vmul.f32 %v3770_v2, %v3916_v6  ;;  %v1439_v49 = vmul.f32 %v3786_v35, %v3916_v6 }
 0x55d   :  { %v1403_v1 = vpop.permute.xlu1 %1402  ;;  %v1087_v25 = vadd.f32 %v1067_v10, %v1035_v33  ;;  %v1489_v47 = vadd.f32 %v4094_v39, %v1437_v36 }
 0x55e   :  { %v1236_v50 = vpop.permute.xlu0 %1235  ;;  %v1424_v10 = vadd.f32 %v1403_v1, %v1372_v60 }
 0x55f   :  { %1673 = vrot.lane.b32.xlu1 %v1423_v13, %s2946_s2  ;;  %v1256_v52 = vadd.f32 %v1236_v50, %v1204_v41  ;;  %v1541_v31 = vadd.f32 %v4155_v57, %v1489_v47  ;;  %v932_v13 = vmul.f32 %v3786_v35, %v3892_v56 }
 0x560   :  { %1671 = vrot.lane.b32.xlu0 %v1422_v8, %s2946_s2  ;;  %v1101_v8 = vmul.f32 %v3786_v35, %v3910_v30 }
 0x561   :  { %v1405_v37 = vpop.permute.xlu1 %1404 }
 0x562   :  { %v1522_v22 = vpop.permute.xlu0 %1521  ;;  %v1425_v58 = vadd.f32 %v1405_v37, %v1373_v18 }
 0x563   :  { %1705 = vrot.lane.b32.xlu1 %v1592_v0, %s2947_s30  ;;  %v1542_v51 = vadd.f32 %v1522_v22, %v1490_v29  ;;  %v933_v0 = vmul.f32 %v3770_v2, %v3892_v56 }
 0x564   :  { %1703 = vrot.lane.b32.xlu0 %v1591_v12, %s2947_s30 }
 0x565   :  { %v1574_v16 = vpop.permute.xlu1 %1573 }
 0x566   :  { %v1572_v40 = vpop.permute.xlu0 %1571  ;;  %v1594_v4 = vadd.f32 %v1574_v16, %v1542_v51 }
 0x567   :  { %1643 = vrot.lane.b32.xlu1 %v1255_v46, %s2944_s28  ;;  %v1593_v14 = vadd.f32 %v1572_v40, %v1541_v31 }
 0x568   :  { %1611 = vrot.lane.b32.xlu0 %v1086_v20, %s2945_s29  ;;  %v1271_v20 = vmul.f32 %v3770_v2, %v3904_v5 }
 0x569   :  { %v1134_v26 = vpop.permute.xlu1 %1133 }
 0x56a   :  { %v965_v55 = vpop.permute.xlu0 %964  ;;  %v1153_v17 = vadd.f32 %v1134_v26, %v1101_v8 }
 0x56b   :  { %1645 = vrot.lane.b32.xlu1 %v1256_v52, %s2944_s28  ;;  %v984_v1 = vadd.f32 %v965_v55, %v932_v13 }
 0x56c   :  { %1613 = vrot.lane.b32.xlu0 %v1087_v25, %s2945_s29 }
 0x56d   :  { %v1136_v62 = vpop.permute.xlu1 %1135 }
 0x56e   :  { %v967_v28 = vpop.permute.xlu0 %966  ;;  %v1154_v11 = vadd.f32 %v1136_v62, %v1102_v63 }
 0x56f   :  { %1677 = vrot.lane.b32.xlu1 %v1425_v58, %s2946_s2  ;;  %v985_v12 = vadd.f32 %v967_v28, %v933_v0 }
 0x570   :  { %1675 = vrot.lane.b32.xlu0 %v1424_v10, %s2946_s2 }
 0x571   :  { %v1017_v61 = vpop.permute.xlu1 %1016 }
 0x572   :  { %v1303_v48 = vpop.permute.xlu0 %1302  ;;  %v1036_v43 = vadd.f32 %v1017_v61, %v984_v1 }
 0x573   :  { %1709 = vrot.lane.b32.xlu1 %v1594_v4, %s2947_s30  ;;  %v1322_v19 = vadd.f32 %v1303_v48, %v1270_v54  ;;  %v1104_v54 = vmul.f32 %v3842_v45, %v3910_v30 }
 0x574   :  { %1707 = vrot.lane.b32.xlu0 %v1593_v14, %s2947_s30 }
 0x575   :  { %v1305_v53 = vpop.permute.xlu1 %1304 }
 0x576   :  { %v1186_v15 = vpop.permute.xlu0 %1185  ;;  %v1323_v38 = vadd.f32 %v1305_v53, %v1271_v20 }
 0x577   :  { %v1205_v24 = vadd.f32 %v1186_v15, %v1153_v17 }
 0x579   :  { %v1019_v7 = vpop.permute.xlu1 %1018 }
 0x57a   :  { %v1472_v39 = vpop.permute.xlu0 %1471  ;;  %v1037_v3 = vadd.f32 %v1019_v7, %v985_v12  ;;  %v934_v7 = vmul.f32 %v3828_v59, %v3892_v56 }
 0x57b   :  { %v1491_v36 = vadd.f32 %v1472_v39, %v1439_v49 }
 0x57d   :  { %v1355_v34 = vpop.permute.xlu1 %1354 }
 0x57e   :  { %v1188_v57 = vpop.permute.xlu0 %1187  ;;  %v1374_v40 = vadd.f32 %v1355_v34, %v1322_v19 }
 0x57f   :  { %v1206_v32 = vadd.f32 %v1188_v57, %v1154_v11  ;;  %v1103_v57 = vmul.f32 %v3828_v59, %v3910_v30  ;;  %v1442_v30 = vmul.f32 %v3842_v45, %v3916_v6 }
 0x581   :  { %v1069_v50 = vpop.permute.xlu1 %1068 }
 0x582   :  { %v1088_v27 = vadd.f32 %v1069_v50, %v1036_v43  ;;  %v1474_v21 = vpop.permute.xlu0 %1473 }
 0x583   :  { %v1492_v25 = vadd.f32 %v1474_v21, %v1440_v9  ;;  %v935_v21 = vmul.f32 %v3842_v45, %v3892_v56 }
 0x584   :  { %1615 = vrot.lane.b32.xlu0 %v1088_v27, %s2945_s29 }
 0x585   :  { %v1357_v37 = vpop.permute.xlu1 %1356 }
 0x586   :  { %v1238_v42 = vpop.permute.xlu0 %1237  ;;  %v1375_v26 = vadd.f32 %v1357_v37, %v1323_v38 }
 0x587   :  { %v1257_v22 = vadd.f32 %v1238_v42, %v1205_v24  ;;  %v1272_v42 = vmul.f32 %v3828_v59, %v3904_v5 }
 0x589   :  { %1647 = vrot.lane.b32.xlu1 %v1257_v22, %s2944_s28  ;;  %v1071_v23 = vpop.permute.xlu1 %1070 }
 0x58a   :  { %v1089_v46 = vadd.f32 %v1071_v23, %v1037_v3  ;;  %v1524_v16 = vpop.permute.xlu0 %1523 }
 0x58b   :  { %v1543_v58 = vadd.f32 %v1524_v16, %v1491_v36 }
 0x58c   :  { %1617 = vrot.lane.b32.xlu0 %v1089_v46, %s2945_s29  ;;  %v1273_v46 = vmul.f32 %v3842_v45, %v3904_v5 }
 0x58d   :  { %v1407_v41 = vpop.permute.xlu1 %1406 }
 0x58e   :  { %v1426_v33 = vadd.f32 %v1407_v41, %v1374_v40  ;;  %v1240_v44 = vpop.permute.xlu0 %1239 }
 0x58f   :  { %v1258_v52 = vadd.f32 %v1240_v44, %v1206_v32  ;;  %v1441_v44 = vmul.f32 %v3828_v59, %v3916_v6 }
 0x590   :  { %1679 = vrot.lane.b32.xlu0 %v1426_v33, %s2946_s2 }
 0x591   :  { %1649 = vrot.lane.b32.xlu1 %v1258_v52, %s2944_s28  ;;  %v1409_v55 = vpop.permute.xlu1 %1408 }
 0x592   :  { %v1427_v29 = vadd.f32 %v1409_v55, %v1375_v26  ;;  %v1526_v18 = vpop.permute.xlu0 %1525 }
 0x593   :  { %v1544_v60 = vadd.f32 %v1526_v18, %v1492_v25 }
 0x595   :  { %1681 = vrot.lane.b32.xlu1 %v1427_v29, %s2946_s2  ;;  %v1578_v51 = vpop.permute.xlu1 %1577 }
 0x596   :  { %v1596_v2 = vadd.f32 %v1578_v51, %v1544_v60  ;;  %v1576_v62 = vpop.permute.xlu0 %1575 }
 0x597   :  { %v1595_v47 = vadd.f32 %v1576_v62, %v1543_v58 }
 0x599   :  { %1711 = vrot.lane.b32.xlu0 %v1595_v47, %s2947_s30  ;;  %1713 = vrot.lane.b32.xlu1 %v1596_v2, %s2947_s30  ;;  %v1138_v35 = vpop.permute.xlu1 %1137 }
 0x59a   :  { %v969_v10 = vpop.permute.xlu0 %968  ;;  %v1155_v27 = vadd.f32 %v1138_v35, %v1103_v57 }
 0x59b   :  { %v986_v13 = vadd.f32 %v969_v10, %v934_v7 }
 0x59d   :  { %v1140_v28 = vpop.permute.xlu1 %1139 }
 0x59e   :  { %v971_v31 = vpop.permute.xlu0 %970  ;;  %v1156_v19 = vadd.f32 %v1140_v28, %v1104_v54 }
 0x59f   :  { %v987_v24 = vadd.f32 %v971_v31, %v935_v21 }
 0x5a1   :  { %v1021_v4 = vpop.permute.xlu1 %1020 }
 0x5a2   :  { %v1307_v61 = vpop.permute.xlu0 %1306  ;;  %v1038_v1 = vadd.f32 %v1021_v4, %v986_v13 }
 0x5a3   :  { %v1324_v63 = vadd.f32 %v1307_v61, %v1272_v42 }
 0x5a5   :  { %v1309_v14 = vpop.permute.xlu1 %1308 }
 0x5a6   :  { %v1190_v48 = vpop.permute.xlu0 %1189  ;;  %v1325_v40 = vadd.f32 %v1309_v14, %v1273_v46 }
 0x5a7   :  { %v1207_v17 = vadd.f32 %v1190_v48, %v1155_v27 }
 0x5a9   :  { %v1023_v53 = vpop.permute.xlu1 %1022 }
 0x5aa   :  { %v1476_v15 = vpop.permute.xlu0 %1475  ;;  %v1039_v22 = vadd.f32 %v1023_v53, %v987_v24 }
 0x5ab   :  { %v1493_v49 = vadd.f32 %v1476_v15, %v1441_v44 }
 0x5ad   :  { %v1359_v39 = vpop.permute.xlu1 %1358 }
 0x5ae   :  { %v1192_v34 = vpop.permute.xlu0 %1191  ;;  %v1376_v16 = vadd.f32 %v1359_v39, %v1324_v63 }
 0x5af   :  { %v1208_v11 = vadd.f32 %v1192_v34, %v1156_v19 }
 0x5b1   :  { %v1073_v43 = vpop.permute.xlu1 %1072 }
 0x5b2   :  { %v1090_v8 = vadd.f32 %v1073_v43, %v1038_v1  ;;  %v1478_v50 = vpop.permute.xlu0 %1477 }
 0x5b3   :  { %v1494_v9 = vadd.f32 %v1478_v50, %v1442_v30 }
 0x5b4   :  { %1619 = vrot.lane.b32.xlu0 %v1090_v8, %s2945_s29 }
 0x5b5   :  { %v1361_v0 = vpop.permute.xlu1 %1360 }
 0x5b6   :  { %v1242_v37 = vpop.permute.xlu0 %1241  ;;  %v1377_v33 = vadd.f32 %v1361_v0, %v1325_v40 }
 0x5b7   :  { %v1259_v12 = vadd.f32 %v1242_v37, %v1207_v17 }
 0x5b9   :  { %1651 = vrot.lane.b32.xlu1 %v1259_v12, %s2944_s28  ;;  %v1075_v3 = vpop.permute.xlu1 %1074 }
 0x5ba   :  { %v1091_v23 = vadd.f32 %v1075_v3, %v1039_v22  ;;  %v1528_v56 = vpop.permute.xlu0 %1527 }
 0x5bb   :  { %v1545_v55 = vadd.f32 %v1528_v56, %v1493_v49 }
 0x5bc   :  { %1621 = vrot.lane.b32.xlu0 %v1091_v23, %s2945_s29  ;;  %s4354_s29 = sld [smem:[#allocation7 + $0x4]] }
 0x5bd   :  { %v1411_v20 = vpop.permute.xlu1 %1410 }
 0x5be   :  { %v1428_v32 = vadd.f32 %v1411_v20, %v1376_v16  ;;  %v1244_v41 = vpop.permute.xlu0 %1243 }
 0x5bf   :  { %v1260_v38 = vadd.f32 %v1244_v41, %v1208_v11 }
 0x5c0   :  { %1683 = vrot.lane.b32.xlu0 %v1428_v32, %s2946_s2 }
 0x5c1   :  { %1653 = vrot.lane.b32.xlu1 %v1260_v38, %s2944_s28  ;;  %v1413_v5 = vpop.permute.xlu1 %1412  ;;  %s4352_s28 = sld [smem:[#allocation9 + $0x3]] }
 0x5c2   :  { %v1429_v52 = vadd.f32 %v1413_v5, %v1377_v33  ;;  %v1530_v26 = vpop.permute.xlu0 %1529 }
 0x5c3   :  { %v1546_v25 = vadd.f32 %v1530_v26, %v1494_v9 }
 0x5c5   :  { %1685 = vrot.lane.b32.xlu1 %v1429_v52, %s2946_s2  ;;  %v1582_v29 = vpop.permute.xlu1 %1581  ;;  %s4356_s2 = sld [smem:[#allocation9 + $0x4]] }
 0x5c6   :  { %v1598_v45 = vadd.f32 %v1582_v29, %v1546_v25  ;;  %v1580_v18 = vpop.permute.xlu0 %1579 }
 0x5c7   :  { %v1597_v36 = vadd.f32 %v1580_v18, %v1545_v55  ;;  %v4543_v55 = vmov 0.0  }
 0x5c9   :  { %1715 = vrot.lane.b32.xlu0 %v1597_v36, %s2947_s30  ;;  %1717 = vrot.lane.b32.xlu1 %v1598_v45, %s2947_s30  ;;  %v1640_v59 = vpop.permute.xlu1 %1639  ;;  %s4358_s30 = sld [smem:[#allocation7 + $0x5]] }
 0x5ca   :  { %v1608_v6 = vpop.permute.xlu0 %1607 }
 0x5cb   :  { %v1727_v62 = vsel %vm366_vm10, %v1608_v6, %v1640_v59 }
 0x5cd   :  { %v1642_v60 = vpop.permute.xlu1 %1641 }
 0x5ce   :  { %v1610_v58 = vpop.permute.xlu0 %1609 }
 0x5cf   :  { %v1728_v35 = vsel %vm366_vm10, %v1610_v58, %v1642_v60 }
 0x5d1   :  { %v1674_v51 = vpop.permute.xlu1 %1673 }
 0x5d2   :  { %v1672_v2 = vpop.permute.xlu0 %1671  ;;  %v1736_v31 = vsel %vm375_vm11, %v1728_v35, %v1674_v51 }
 0x5d3   :  { %v1735_v10 = vsel %vm375_vm11, %v1727_v62, %v1672_v2 }
 0x5d5   :  { %v1706_v47 = vpop.permute.xlu1 %1705 }
 0x5d6   :  { %v1704_v28 = vpop.permute.xlu0 %1703  ;;  %v1744_v61 = vsel %vm384_vm12, %v1736_v31, %v1706_v47  ;;  %v2066_v47 = vld [vmem:[%s4516_s3] sm:$0xff]  ;;  %s4364_s3 = sld [smem:[#allocation9 + $0x6]] }
 0x5d7   :  { %v1743_v4 = vsel %vm384_vm12, %v1735_v10, %v1704_v28  ;;  %2769 = vmatprep.subr.mxu0 %v2066_v47 }
 0x5d8   :  { %2757 = vmatprep.mubr.msk.f32.mxu1 %vm89_vm0, %v1743_v4  ;;  %2770 = vmatpush3.msra.mxu0 %v2066_v47 }
 0x5d9   :  { %2758 = vmatmul.mubr.msk.f32.vlgmr.msra.gmra.mxu1 %vm89_vm0, %v1744_v61  ;;  %v1644_v14 = vpop.permute.xlu1 %1643 }
 0x5da   :  { %v1612_v48 = vpop.permute.xlu0 %1611 }
 0x5db   :  { %v1729_v13 = vsel %vm366_vm10, %v1612_v48, %v1644_v14 }
 0x5dd   :  { %v1646_v53 = vpop.permute.xlu1 %1645 }
 0x5de   :  { %v1614_v15 = vpop.permute.xlu0 %1613 }
 0x5df   :  { %v1730_v1 = vsel %vm366_vm10, %v1614_v15, %v1646_v53 }
 0x5e1   :  { %v1678_v7 = vpop.permute.xlu1 %1677 }
 0x5e2   :  { %v1676_v39 = vpop.permute.xlu0 %1675  ;;  %v1738_v8 = vsel %vm375_vm11, %v1730_v1, %v1678_v7 }
 0x5e3   :  { %v1737_v57 = vsel %vm375_vm11, %v1729_v13, %v1676_v39 }
 0x5e5   :  { %v1710_v34 = vpop.permute.xlu1 %1709 }
 0x5e6   :  { %v1708_v43 = vpop.permute.xlu0 %1707  ;;  %v1746_v27 = vsel %vm384_vm12, %v1738_v8, %v1710_v34 }
 0x5e7   :  { %v1745_v50 = vsel %vm384_vm12, %v1737_v57, %v1708_v43 }
 0x5e8   :  { %2760 = vmatprep.mubr.msk.f32.mxu1 %vm89_vm0, %v1745_v50  ;;  %v1939_v50 = vld [vmem:[%s4513_s0 + $0x8] sm:$0xff] }
 0x5e9   :  { %2761 = vmatmul.mubr.msk.f32.gmra.mxu1 %vm89_vm0, %v1746_v27 }
 0x5f6   :  { %v1616_v21 = vpop.permute.xlu0 %1615 }
 0x5fb   :  { %v1648_v17 = vpop.permute.xlu1 %1647 }
 0x5fc   :  { %v1731_v42 = vsel %vm366_vm10, %v1616_v21, %v1648_v17  ;;  %v1936_v21 = vld [vmem:[%s4513_s0] sm:$0xff] }
 0x5fe   :  { %v1618_v0 = vpop.permute.xlu0 %1617 }
 0x602   :  { %v1680_v37 = vpop.permute.xlu0 %1679 }
 0x603   :  { %v1650_v24 = vpop.permute.xlu1 %1649  ;;  %v1739_v54 = vsel %vm375_vm11, %v1731_v42, %v1680_v37 }
 0x604   :  { %v1732_v22 = vsel %vm366_vm10, %v1618_v0, %v1650_v24  ;;  %v1942_v24 = vld [vmem:[%s4513_s0 + $0x10] sm:$0xff] }
 0x607   :  { %v1682_v12 = vpop.permute.xlu1 %1681 }
 0x608   :  { %v1740_v3 = vsel %vm375_vm11, %v1732_v22, %v1682_v12 }
 0x60b   :  { %v1712_v63 = vpop.permute.xlu0 %1711  ;;  %v1714_v23 = vpop.permute.xlu1 %1713 }
 0x60c   :  { %v1747_v56 = vsel %vm384_vm12, %v1739_v54, %v1712_v63  ;;  %v1748_v19 = vsel %vm384_vm12, %v1740_v3, %v1714_v23  ;;  %v1945_v54 = vld [vmem:[%s4513_s0 + $0x18] sm:$0xff] }
 0x60d   :  { %2763 = vmatprep.mubr.msk.f32.mxu1 %vm89_vm0, %v1747_v56 }
 0x60e   :  { %2764 = vmatmul.mubr.msk.f32.gmra.mxu1 %vm89_vm0, %v1748_v19  ;;  %v1948_v19 = vld [vmem:[%s4513_s0 + $0x20] sm:$0xff] }
 0x626   :  { %v1620_v46 = vpop.permute.xlu0 %1619 }
 0x62b   :  { %v1652_v16 = vpop.permute.xlu1 %1651 }
 0x62c   :  { %v1733_v41 = vsel %vm366_vm10, %v1620_v46, %v1652_v16 }
 0x62e   :  { %v1622_v11 = vpop.permute.xlu0 %1621 }
 0x632   :  { %v1684_v40 = vpop.permute.xlu0 %1683 }
 0x633   :  { %v1654_v20 = vpop.permute.xlu1 %1653  ;;  %v1741_v38 = vsel %vm375_vm11, %v1733_v41, %v1684_v40  ;;  %v1951_v40 = vld [vmem:[%s4513_s0 + $0x28] sm:$0xff] }
 0x634   :  { %v1734_v30 = vsel %vm366_vm10, %v1622_v11, %v1654_v20 }
 0x637   :  { %v1686_v32 = vpop.permute.xlu1 %1685 }
 0x638   :  { %v1742_v33 = vsel %vm375_vm11, %v1734_v30, %v1686_v32 }
 0x63b   :  { %v1716_v44 = vpop.permute.xlu0 %1715  ;;  %v1718_v9 = vpop.permute.xlu1 %1717 }
 0x63c   :  { %v1749_v5 = vsel %vm384_vm12, %v1741_v38, %v1716_v44  ;;  %v1750_v52 = vsel %vm384_vm12, %v1742_v33, %v1718_v9  ;;  %v1954_v38 = vld [vmem:[%s4513_s0 + $0x30] sm:$0xff] }
 0x63d   :  { %2766 = vmatprep.mubr.msk.f32.mxu1 %vm89_vm0, %v1749_v5 }
 0x63e   :  { %2767 = vmatmul.mubr.msk.f32.gmra.mxu1 %vm89_vm0, %v1750_v52 }
 0x699   :  { %v2759_v26 = vpop.f32.mrf.mxu1 }
 0x69b   :  { %v1842_v49 = vpop.f32.mrf.mxu1 }
 0x69c   :  { %vm1883_vm15 = vcmp.gt.f32.partialorder %v1842_v49, 1.0  ;;  %v1887_v25 = vmul.f32 0.9, %v1842_v49 }
 0x69d   :  { %v2634_v29 = vsel %vm1883_vm15, 1.0, %v4543_v55 }
 0x69e   :  { %1886 = vst.msk [vmem:[#allocation3] sm:$0xff] %vm89_vm0, %v2634_v29  ;;  %v1888_v45 = vadd.f32 %v2759_v26, %v1887_v25  ;;  %v1957_v26 = vld [vmem:[%s4513_s0 + $0x38] sm:$0xff]  ;;  %s4338_s0 = sld [smem:[#allocation7]] }
 0x6a0   :  { %v1889_v18 = vsub.f32 %v1888_v45, %v2634_v29 }
 0x6a2   :  { %vm1890_vm2 = vcmp.gt.f32.partialorder %v1889_v18, 1.0  ;;  %v1894_v6 = vmul.f32 0.9, %v1889_v18 }
 0x6a3   :  { %v2635_v36 = vsel %vm1890_vm2, 1.0, %v4543_v55 }
 0x6a4   :  { %1893 = vst.msk [vmem:[#allocation3 + $0x8] sm:$0xff] %vm89_vm0, %v2635_v36 }
 0x6a5   :  { %v1937_v0 = vld [vmem:[#allocation3] sm:$0xff] }
 0x6a6   :  { %v1938_v63 = vadd.f32 %v1937_v0, %v1936_v21  ;;  %v2006_v21 = vstv %s4344_s7  ;;  %v2013_v0 = vstv %s4348_s26  ;;  %s4492_s7 = sld [smem:[#allocation11 + $0x5]] }
 0x6a7   :  { %s4496_s26 = sld [smem:[#allocation12 + $0x5]] }
 0x6a9   :  { %v2762_v59 = vpop.f32.mrf.mxu1 }
 0x6ab   :  { %v1852_v60 = vpop.f32.mrf.mxu1  ;;  %v1940_v27 = vld [vmem:[#allocation3 + $0x8] sm:$0xff] }
 0x6ac   :  { %v1895_v58 = vadd.f32 %v1894_v6, %v1852_v60  ;;  %v1941_v42 = vadd.f32 %v1940_v27, %v1939_v50  ;;  %v1999_v50 = vstv %s4340_s24  ;;  %v2003_v27 = vstv %s4342_s25  ;;  %s4488_s24 = sld [smem:[#allocation12 + $0x3]] }
 0x6ad   :  { %s4490_s25 = sld [smem:[#allocation11 + $0x6]] }
 0x6ae   :  { %v1896_v51 = vsub.f32 %v1895_v58, %v2635_v36  ;;  %v1960_v16 = vadd.f32 %v1941_v42, %v1938_v63 }
 0x6b0   :  { %vm1897_vm3 = vcmp.gt.f32.partialorder %v1896_v51, 1.0  ;;  %v1901_v2 = vmul.f32 0.9, %v1896_v51 }
 0x6b1   :  { %v2636_v62 = vsel %vm1897_vm3, 1.0, %v4543_v55 }
 0x6b2   :  { %1900 = vst.msk [vmem:[#allocation3 + $0x10] sm:$0xff] %vm89_vm0, %v2636_v62  ;;  %v1902_v35 = vadd.f32 %v2762_v59, %v1901_v2 }
 0x6b4   :  { %v1903_v10 = vsub.f32 %v1902_v35, %v2636_v62 }
 0x6b6   :  { %vm1904_vm4 = vcmp.gt.f32.partialorder %v1903_v10, 1.0  ;;  %v1908_v4 = vmul.f32 0.9, %v1903_v10 }
 0x6b7   :  { %v2637_v28 = vsel %vm1904_vm4, 1.0, %v4543_v55 }
 0x6b8   :  { %1907 = vst.msk [vmem:[#allocation3 + $0x18] sm:$0xff] %vm89_vm0, %v2637_v28 }
 0x6b9   :  { %v1943_v37 = vld [vmem:[#allocation3 + $0x10] sm:$0xff] }
 0x6ba   :  { %v1944_v23 = vadd.f32 %v1943_v37, %v1942_v24  ;;  %v2017_v24 = vstv %s4350_s27  ;;  %v2020_v37 = vstv %s4352_s28  ;;  %s4498_s27 = sld [smem:[#allocation11 + $0x7]] }
 0x6bb   :  { %s2701_s28 = sld [smem:[#allocation12 + $0x7]] }
 0x6bc   :  { %v1961_v41 = vadd.f32 %v1960_v16, %v1944_v23 }
 0x6bf   :  { %v1946_v3 = vld [vmem:[#allocation3 + $0x18] sm:$0xff] }
 0x6c0   :  { %v1947_v11 = vadd.f32 %v1946_v3, %v1945_v54  ;;  %v2034_v54 = vstv %s4360_s10  ;;  %s2951_s10 = smov 24  }
 0x6c2   :  { %v1962_v44 = vadd.f32 %v1961_v41, %v1947_v11 }
 0x6ce   :  { %v2765_v31 = vpop.f32.mrf.mxu1 }
 0x6d0   :  { %v1862_v61 = vpop.f32.mrf.mxu1 }
 0x6d1   :  { %v1909_v14 = vadd.f32 %v1908_v4, %v1862_v61 }
 0x6d3   :  { %v1910_v48 = vsub.f32 %v1909_v14, %v2637_v28 }
 0x6d5   :  { %vm1911_vm5 = vcmp.gt.f32.partialorder %v1910_v48, 1.0  ;;  %v1915_v53 = vmul.f32 0.9, %v1910_v48 }
 0x6d6   :  { %v2638_v15 = vsel %vm1911_vm5, 1.0, %v4543_v55 }
 0x6d7   :  { %1914 = vst.msk [vmem:[#allocation3 + $0x20] sm:$0xff] %vm89_vm0, %v2638_v15  ;;  %v1916_v7 = vadd.f32 %v2765_v31, %v1915_v53 }
 0x6d9   :  { %v1917_v39 = vsub.f32 %v1916_v7, %v2638_v15 }
 0x6db   :  { %vm1918_vm6 = vcmp.gt.f32.partialorder %v1917_v39, 1.0  ;;  %v1922_v1 = vmul.f32 0.9, %v1917_v39 }
 0x6dc   :  { %v2639_v13 = vsel %vm1918_vm6, 1.0, %v4543_v55 }
 0x6dd   :  { %1921 = vst.msk [vmem:[#allocation3 + $0x28] sm:$0xff] %vm89_vm0, %v2639_v13 }
 0x6de   :  { %v1949_v46 = vld [vmem:[#allocation3 + $0x20] sm:$0xff] }
 0x6df   :  { %v1950_v30 = vadd.f32 %v1949_v46, %v1948_v19  ;;  %v2048_v19 = vstv %s4368_s12  ;;  %s2507_s12 = sld [smem:[#allocation11]] }
 0x6e1   :  { %v1963_v52 = vadd.f32 %v1962_v44, %v1950_v30 }
 0x6e4   :  { %v1952_v32 = vld [vmem:[#allocation3 + $0x28] sm:$0xff] }
 0x6e5   :  { %v1953_v9 = vadd.f32 %v1952_v32, %v1951_v40 }
 0x6e7   :  { %v1964_v49 = vadd.f32 %v1963_v52, %v1953_v9 }
 0x6fe   :  { %v2768_v34 = vpop.f32.mrf.mxu1 }
 0x700   :  { %v1872_v57 = vpop.f32.mrf.mxu1 }
 0x701   :  { %v1923_v43 = vadd.f32 %v1922_v1, %v1872_v57 }
 0x703   :  { %v1924_v8 = vsub.f32 %v1923_v43, %v2639_v13 }
 0x705   :  { %vm1925_vm7 = vcmp.gt.f32.partialorder %v1924_v8, 1.0  ;;  %v1929_v17 = vmul.f32 0.9, %v1924_v8  ;;  %v1996_v8 = vstv %s4338_s0  ;;  %s4486_s0 = sld [smem:[#allocation12 + $0x4]] }
 0x706   :  { %v2640_v12 = vsel %vm1925_vm7, 1.0, %v4543_v55 }
 0x707   :  { %1928 = vst.msk [vmem:[#allocation3 + $0x30] sm:$0xff] %vm89_vm0, %v2640_v12  ;;  %v1930_v22 = vadd.f32 %v2768_v34, %v1929_v17  ;;  %v2010_v17 = vstv %s4346_s8  ;;  %s4494_s8 = sld [smem:[#allocation12 + $0x6]] }
 0x709   :  { %v1931_v56 = vsub.f32 %v1930_v22, %v2640_v12  ;;  %v2024_v12 = vstv %s4354_s29  ;;  %v2031_v22 = vstv %s4358_s30  ;;  %s2948_s29 = smov 16   ;;  %s2950_s30 = smov 32  }
 0x70b   :  { %vm1932_vm8 = vcmp.gt.f32.partialorder %v1931_v56, 1.0  ;;  %v2045_v56 = vstv %s4366_s1  ;;  %s2954_s1 = smov 56  }
 0x70c   :  { %v2641_v20 = vsel %vm1932_vm8, 1.0, %v4543_v55 }
 0x70d   :  { %1935 = vst.msk [vmem:[#allocation3 + $0x38] sm:$0xff] %vm89_vm0, %v2641_v20 }
 0x70e   :  { %v1955_v33 = vld [vmem:[#allocation3 + $0x30] sm:$0xff] }
 0x70f   :  { %v1956_v5 = vadd.f32 %v1955_v33, %v1954_v38 }
 0x711   :  { %v1965_v45 = vadd.f32 %v1964_v49, %v1956_v5 }
 0x714   :  { %v1958_v25 = vld [vmem:[#allocation3 + $0x38] sm:$0xff] }
 0x715   :  { %v1959_v29 = vadd.f32 %v1958_v25, %v1957_v26 }
 0x717   :  { %v1966_v18 = vadd.f32 %v1965_v45, %v1959_v29 }
 0x719   :  { %v1967_v36 = vmul.f32 0.125, %v1966_v18 }
 0x71b   :  { %v1968_v59 = vsub.f32 %v1938_v63, %v1967_v36  ;;  %v1969_v6 = vsub.f32 %v1941_v42, %v1967_v36  ;;  %v1970_v60 = vsub.f32 %v1944_v23, %v1967_v36  ;;  %v1971_v58 = vsub.f32 %v1947_v11, %v1967_v36 }
 0x71c   :  { %v1972_v62 = vsub.f32 %v1950_v30, %v1967_v36  ;;  %v1973_v10 = vsub.f32 %v1953_v9, %v1967_v36  ;;  %v1974_v4 = vsub.f32 %v1956_v5, %v1967_v36  ;;  %v1975_v48 = vsub.f32 %v1959_v29, %v1967_v36 }
 0x71d   :  { %v1976_v51 = vmul.f32 %v1968_v59, %v1968_v59  ;;  %v1977_v2 = vmul.f32 %v1969_v6, %v1969_v6  ;;  %v1979_v35 = vmul.f32 %v1970_v60, %v1970_v60  ;;  %v1981_v31 = vmul.f32 %v1971_v58, %v1971_v58 }
 0x71e   :  { %v1983_v14 = vmul.f32 %v1972_v62, %v1972_v62  ;;  %v1985_v15 = vmul.f32 %v1973_v10, %v1973_v10  ;;  %v1987_v39 = vmul.f32 %v1974_v4, %v1974_v4  ;;  %v1989_v34 = vmul.f32 %v1975_v48, %v1975_v48 }
 0x71f   :  { %v1978_v47 = vadd.f32 %v1977_v2, %v1976_v51  ;;  %v2027_v42 = vstv %s4356_s2  ;;  %v2038_v63 = vstv %s4362_s11  ;;  %v2041_v23 = vstv %s4364_s3  ;;  %s2949_s2 = smov 8   ;;  %s2952_s11 = smov 48  }
 0x720   :  { %s2953_s3 = smov 40  }
 0x721   :  { %v1980_v28 = vadd.f32 %v1979_v35, %v1978_v47 }
 0x723   :  { %v1982_v61 = vadd.f32 %v1981_v31, %v1980_v28  ;;  %v2263_v31 = vld [vmem:[%s4517_s4 + $0x18] sm:$0xff] }
 0x724   :  { %2783 = vmatprep.subr.mxu1 %v2263_v31 }
 0x725   :  { %v1984_v53 = vadd.f32 %v1983_v14, %v1982_v61  ;;  %2784 = vmatpush3.msra.mxu1 %v2263_v31  ;;  %v2261_v61 = vld [vmem:[%s4517_s4 + $0x8] sm:$0xff]  ;;  %v2260_v14 = vld [vmem:[%s4517_s4] sm:$0xff] }
 0x727   :  { %v1986_v7 = vadd.f32 %v1985_v15, %v1984_v53 }
 0x729   :  { %v1988_v13 = vadd.f32 %v1987_v39, %v1986_v7 }
 0x72b   :  { %v1990_v1 = vadd.f32 %v1989_v34, %v1988_v13 }
 0x72d   :  { %v1991_v57 = vmul.f32 0.125, %v1990_v1 }
 0x72f   :  { %v1992_v43 = vadd.f32 1e-05, %v1991_v57 }
 0x731   :  { %2860 = vrsqrt.f32 %v1992_v43 }
 0x73e   :  { %v2861_v3 = vpop.eup %2860 }
 0x73f   :  { %v1994_v46 = vmul.f32 %v2861_v3, %v1968_v59  ;;  %v2001_v16 = vmul.f32 %v2861_v3, %v1969_v6  ;;  %v2008_v11 = vmul.f32 %v2861_v3, %v1970_v60  ;;  %v2015_v20 = vmul.f32 %v2861_v3, %v1971_v58 }
 0x740   :  { %v2022_v40 = vmul.f32 %v2861_v3, %v1972_v62  ;;  %v2029_v32 = vmul.f32 %v2861_v3, %v1973_v10  ;;  %v2036_v41 = vmul.f32 %v2861_v3, %v1974_v4  ;;  %v2043_v30 = vmul.f32 %v2861_v3, %v1975_v48  ;;  %v2262_v4 = vld [vmem:[%s4517_s4 + $0x10] sm:$0xff]  ;;  %s2690_s4 = sld [smem:[#allocation11 + $0x2]] }
 0x741   :  { %v1997_v38 = vmul.f32 %v1996_v8, %v1994_v46  ;;  %v2004_v33 = vmul.f32 %v2003_v27, %v2001_v16  ;;  %v2011_v44 = vmul.f32 %v2010_v17, %v2008_v11  ;;  %v2018_v9 = vmul.f32 %v2017_v24, %v2015_v20  ;;  %2785 = vmatprep.subr.mxu1 %v2262_v4 }
 0x742   :  { %v2025_v5 = vmul.f32 %v2024_v12, %v2022_v40  ;;  %v2032_v52 = vmul.f32 %v2031_v22, %v2029_v32  ;;  %v2039_v26 = vmul.f32 %v2038_v63, %v2036_v41  ;;  %v2046_v49 = vmul.f32 %v2045_v56, %v2043_v30  ;;  %2786 = vmatpush3.msra.mxu1 %v2262_v4 }
 0x743   :  { %v2000_v25 = vadd.f32 %v1999_v50, %v1997_v38  ;;  %v2007_v29 = vadd.f32 %v2006_v21, %v2004_v33  ;;  %v2014_v45 = vadd.f32 %v2013_v0, %v2011_v44  ;;  %v2021_v18 = vadd.f32 %v2020_v37, %v2018_v9  ;;  %2787 = vmatprep.subr.mxu1 %v2261_v61 }
 0x744   :  { %v2028_v36 = vadd.f32 %v2027_v42, %v2025_v5  ;;  %v2035_v59 = vadd.f32 %v2034_v54, %v2032_v52  ;;  %v2042_v6 = vadd.f32 %v2041_v23, %v2039_v26  ;;  %v2049_v60 = vadd.f32 %v2048_v19, %v2046_v49  ;;  %2788 = vmatpush3.msra.mxu1 %v2261_v61 }
 0x745   :  { %2050 = vst.msk [vmem:[#allocation4] sm:$0xff] %vm89_vm0, %v2000_v25  ;;  %2051 = vst.msk [vmem:[#allocation4 + $0x8] sm:$0xff] %vm89_vm0, %v2007_v29  ;;  %2789 = vmatprep.subr.mxu1 %v2260_v14 }
 0x746   :  { %2052 = vst.msk [vmem:[#allocation4 + $0x10] sm:$0xff] %vm89_vm0, %v2014_v45  ;;  %2053 = vst.msk [vmem:[#allocation4 + $0x18] sm:$0xff] %vm89_vm0, %v2021_v18  ;;  %2790 = vmatpush3.msra.mxu1 %v2260_v14 }
 0x747   :  { %2054 = vst.msk [vmem:[#allocation4 + $0x20] sm:$0xff] %vm89_vm0, %v2028_v36  ;;  %2055 = vst.msk [vmem:[#allocation4 + $0x28] sm:$0xff] %vm89_vm0, %v2035_v59 }
 0x748   :  { %2056 = vst.msk [vmem:[#allocation4 + $0x30] sm:$0xff] %vm89_vm0, %v2042_v6  ;;  %2057 = vst.msk [vmem:[#allocation4 + $0x38] sm:$0xff] %vm89_vm0, %v2049_v60 }
 0x74c   :  { %v4394_v58 = vld [vmem:[#allocation4] sm:$0xff]  ;;  %v4396_v51 = vld [vmem:[#allocation4 + $0x8] sm:$0xff] }
 0x74d   :  { %2771 = vmatprep.mubr.msk.f32.mxu0 %vm89_vm0, %v4394_v58  ;;  %v4402_v2 = vld [vmem:[#allocation4 + $0x10] sm:$0xff]  ;;  %v4406_v62 = vld [vmem:[#allocation4 + $0x18] sm:$0xff] }
 0x74e   :  { %2772 = vmatmul.mubr.msk.f32.vlgmr.msra.gmra.mxu0 %vm89_vm0, %v4396_v51  ;;  %v4410_v47 = vld [vmem:[#allocation4 + $0x20] sm:$0xff]  ;;  %v4414_v35 = vld [vmem:[#allocation4 + $0x28] sm:$0xff] }
 0x74f   :  { %2774 = vmatprep.mubr.msk.f32.mxu0 %vm89_vm0, %v4402_v2  ;;  %v4418_v10 = vld [vmem:[#allocation4 + $0x30] sm:$0xff]  ;;  %v4422_v28 = vld [vmem:[#allocation4 + $0x38] sm:$0xff] }
 0x752   :  { %2775 = vmatmul.mubr.msk.f32.gmra.mxu0 %vm89_vm0, %v4406_v62 }
 0x753   :  { %2777 = vmatprep.mubr.msk.f32.mxu0 %vm89_vm0, %v4410_v47 }
 0x756   :  { %2778 = vmatmul.mubr.msk.f32.gmra.mxu0 %vm89_vm0, %v4414_v35 }
 0x757   :  { %2780 = vmatprep.mubr.msk.f32.mxu0 %vm89_vm0, %v4418_v10 }
 0x75a   :  { %2781 = vmatmul.mubr.msk.f32.gmra.mxu0 %vm89_vm0, %v4422_v28 }
 0x80e   :  { %v2773_v48 = vpop.f32.mrf.mxu0 }
 0x810   :  { %v2157_v53 = vpop.f32.mrf.mxu0 }
 0x811   :  { %vm2198_vm10 = vcmp.gt.f32.partialorder %v2157_v53, 1.0  ;;  %v2203_v15 = vmul.f32 0.9, %v2157_v53 }
 0x812   :  { %v2664_v7 = vsel %vm2198_vm10, 1.0, %v4543_v55  ;;  %v2776_v13 = vpop.f32.mrf.mxu0 }
 0x813   :  { %2202 = vst.msk [vmem:[#allocation5] sm:$0xff] %vm2201_vm9, %v2664_v7  ;;  %v2204_v39 = vadd.f32 %v2773_v48, %v2203_v15 }
 0x814   :  { %v2167_v57 = vpop.f32.mrf.mxu0 }
 0x815   :  { %v2205_v34 = vsub.f32 %v2204_v39, %v2664_v7 }
 0x816   :  { %v2779_v24 = vpop.f32.mrf.mxu0 }
 0x817   :  { %vm2206_vm11 = vcmp.gt.f32.partialorder %v2205_v34, 1.0  ;;  %v2210_v1 = vmul.f32 0.9, %v2205_v34 }
 0x818   :  { %v2665_v43 = vsel %vm2206_vm11, 1.0, %v4543_v55  ;;  %v2177_v22 = vpop.f32.mrf.mxu0 }
 0x819   :  { %2209 = vst.msk [vmem:[#allocation5 + $0x8] sm:$0xff] %vm2201_vm9, %v2665_v43  ;;  %v2211_v8 = vadd.f32 %v2210_v1, %v2167_v57 }
 0x81a   :  { %v2252_v50 = vld [vmem:[#allocation5] sm:$0xff]  ;;  %v2782_v16 = vpop.f32.mrf.mxu0 }
 0x81b   :  { %v2212_v27 = vsub.f32 %v2211_v8, %v2665_v43  ;;  %2791 = vmatprep.mubr.msk.f32.mxu1 %vm2201_vm9, %v2252_v50 }
 0x81c   :  { %v2187_v32 = vpop.f32.mrf.mxu0 }
 0x81d   :  { %vm2213_vm12 = vcmp.gt.f32.partialorder %v2212_v27, 1.0  ;;  %v2217_v21 = vmul.f32 0.9, %v2212_v27 }
 0x81e   :  { %v2666_v17 = vsel %vm2213_vm12, 1.0, %v4543_v55 }
 0x81f   :  { %2216 = vst.msk [vmem:[#allocation5 + $0x10] sm:$0xff] %vm2201_vm9, %v2666_v17  ;;  %v2218_v0 = vadd.f32 %v2776_v13, %v2217_v21 }
 0x820   :  { %v2253_v37 = vld [vmem:[#allocation5 + $0x8] sm:$0xff] }
 0x821   :  { %v2219_v12 = vsub.f32 %v2218_v0, %v2666_v17  ;;  %2792 = vmatmul.mubr.msk.f32.vlgmr.msra.gmra.mxu1 %vm2201_vm9, %v2253_v37 }
 0x823   :  { %vm2220_vm13 = vcmp.gt.f32.partialorder %v2219_v12, 1.0  ;;  %v2224_v42 = vmul.f32 0.9, %v2219_v12 }
 0x824   :  { %v2667_v54 = vsel %vm2220_vm13, 1.0, %v4543_v55  ;;  %vm2591_vm13 = vcmask 130048  }
 0x825   :  { %2223 = vst.msk [vmem:[#allocation5 + $0x18] sm:$0xff] %vm2201_vm9, %v2667_v54  ;;  %v2225_v3 = vadd.f32 %v2224_v42, %v2177_v22 }
 0x826   :  { %v2254_v63 = vld [vmem:[#allocation5 + $0x10] sm:$0xff] }
 0x827   :  { %v2226_v23 = vsub.f32 %v2225_v3, %v2667_v54  ;;  %2794 = vmatprep.mubr.msk.f32.mxu1 %vm2201_vm9, %v2254_v63 }
 0x829   :  { %vm2227_vm14 = vcmp.gt.f32.partialorder %v2226_v23, 1.0  ;;  %v2231_v56 = vmul.f32 0.9, %v2226_v23 }
 0x82a   :  { %v2668_v19 = vsel %vm2227_vm14, 1.0, %v4543_v55  ;;  %vm2595_vm14 = vcmask 326656  }
 0x82b   :  { %2230 = vst.msk [vmem:[#allocation5 + $0x20] sm:$0xff] %vm2201_vm9, %v2668_v19  ;;  %v2232_v46 = vadd.f32 %v2779_v24, %v2231_v56 }
 0x82c   :  { %v2255_v11 = vld [vmem:[#allocation5 + $0x18] sm:$0xff] }
 0x82d   :  { %v2233_v20 = vsub.f32 %v2232_v46, %v2668_v19  ;;  %2795 = vmatmul.mubr.msk.f32.gmra.mxu1 %vm2201_vm9, %v2255_v11 }
 0x82f   :  { %vm2234_vm15 = vcmp.gt.f32.partialorder %v2233_v20, 1.0  ;;  %v2238_v40 = vmul.f32 0.9, %v2233_v20 }
 0x830   :  { %v2669_v41 = vsel %vm2234_vm15, 1.0, %v4543_v55  ;;  %vm2597_vm15 = vcmask 392192  }
 0x831   :  { %2237 = vst.msk [vmem:[#allocation5 + $0x28] sm:$0xff] %vm2201_vm9, %v2669_v41  ;;  %v2239_v30 = vadd.f32 %v2238_v40, %v2187_v32 }
 0x832   :  { %v2256_v38 = vld [vmem:[#allocation5 + $0x20] sm:$0xff] }
 0x833   :  { %v2240_v33 = vsub.f32 %v2239_v30, %v2669_v41  ;;  %2797 = vmatprep.mubr.msk.f32.mxu1 %vm2201_vm9, %v2256_v38 }
 0x835   :  { %vm2241_vm2 = vcmp.gt.f32.partialorder %v2240_v33, 1.0  ;;  %v2245_v44 = vmul.f32 0.9, %v2240_v33 }
 0x836   :  { %v2670_v9 = vsel %vm2241_vm2, 1.0, %v4543_v55  ;;  %vm2599_vm2 = vcmask 457728  }
 0x837   :  { %2244 = vst.msk [vmem:[#allocation5 + $0x30] sm:$0xff] %vm2201_vm9, %v2670_v9  ;;  %v2246_v5 = vadd.f32 %v2782_v16, %v2245_v44 }
 0x838   :  { %v2257_v52 = vld [vmem:[#allocation5 + $0x28] sm:$0xff] }
 0x839   :  { %v2247_v26 = vsub.f32 %v2246_v5, %v2670_v9  ;;  %2798 = vmatmul.mubr.msk.f32.gmra.mxu1 %vm2201_vm9, %v2257_v52 }
 0x83b   :  { %vm2248_vm3 = vcmp.gt.f32.partialorder %v2247_v26, 1.0 }
 0x83c   :  { %v2671_v49 = vsel %vm2248_vm3, 1.0, %v4543_v55  ;;  %vm2601_vm3 = vcmask 523264  }
 0x83d   :  { %2251 = vst.msk [vmem:[#allocation5 + $0x38] sm:$0xff] %vm2201_vm9, %v2671_v49 }
 0x83e   :  { %v2258_v25 = vld [vmem:[#allocation5 + $0x30] sm:$0xff] }
 0x83f   :  { %2800 = vmatprep.mubr.msk.f32.mxu1 %vm2201_vm9, %v2258_v25 }
 0x844   :  { %v2259_v29 = vld [vmem:[#allocation5 + $0x38] sm:$0xff] }
 0x845   :  { %2801 = vmatmul.mubr.msk.f32.gmra.mxu1 %vm2201_vm9, %v2259_v29 }
 0x8e1   :  { %v2793_v45 = vpop.f32.mrf.mxu1 }
 0x8e3   :  { %v2354_v18 = vpop.f32.mrf.mxu1 }
 0x8e4   :  { %vm2395_vm4 = vcmp.gt.f32.partialorder %v2354_v18, 1.0  ;;  %v2399_v36 = vmul.f32 0.9, %v2354_v18 }
 0x8e5   :  { %v2680_v59 = vsel %vm2395_vm4, 1.0, %v4543_v55 }
 0x8e6   :  { %2398 = vst.msk [vmem:[#allocation6] sm:$0xff] %vm89_vm0, %v2680_v59  ;;  %v2400_v6 = vadd.f32 %v2793_v45, %v2399_v36 }
 0x8e8   :  { %v2401_v60 = vsub.f32 %v2400_v6, %v2680_v59 }
 0x8ea   :  { %vm2402_vm5 = vcmp.gt.f32.partialorder %v2401_v60, 1.0  ;;  %v2406_v61 = vmul.f32 0.9, %v2401_v60 }
 0x8eb   :  { %v2681_v31 = vsel %vm2402_vm5, 1.0, %v4543_v55 }
 0x8ec   :  { %2405 = vst.msk [vmem:[#allocation6 + $0x8] sm:$0xff] %vm89_vm0, %v2681_v31 }
 0x8ed   :  { %v2796_v4 = vpop.f32.mrf.mxu1  ;;  %v2449_v56 = vld [vmem:[#allocation6] sm:$0xff] }
 0x8ee   :  { %v2450_v40 = vadd.f32 %v2449_v56, %v4394_v58 }
 0x8ef   :  { %v2364_v14 = vpop.f32.mrf.mxu1 }
 0x8f0   :  { %v2407_v48 = vadd.f32 %v2406_v61, %v2364_v14 }
 0x8f2   :  { %v2408_v53 = vsub.f32 %v2407_v48, %v2681_v31 }
 0x8f3   :  { %v2452_v3 = vld [vmem:[#allocation6 + $0x8] sm:$0xff] }
 0x8f4   :  { %vm2409_vm6 = vcmp.gt.f32.partialorder %v2408_v53, 1.0  ;;  %v2413_v15 = vmul.f32 0.9, %v2408_v53  ;;  %v2453_v16 = vadd.f32 %v2452_v3, %v4396_v51  ;;  %v2529_v3 = vstv %s2692_s23 }
 0x8f5   :  { %v2682_v7 = vsel %vm2409_vm6, 1.0, %v4543_v55 }
 0x8f6   :  { %2412 = vst.msk [vmem:[#allocation6 + $0x10] sm:$0xff] %vm89_vm0, %v2682_v7  ;;  %v2414_v39 = vadd.f32 %v2796_v4, %v2413_v15  ;;  %v2472_v38 = vadd.f32 %v2453_v16, %v2450_v40 }
 0x8f8   :  { %v2415_v13 = vsub.f32 %v2414_v39, %v2682_v7 }
 0x8f9   :  { %v2799_v34 = vpop.f32.mrf.mxu1 }
 0x8fa   :  { %vm2416_vm7 = vcmp.gt.f32.partialorder %v2415_v13, 1.0  ;;  %v2420_v1 = vmul.f32 0.9, %v2415_v13 }
 0x8fb   :  { %v2374_v57 = vpop.f32.mrf.mxu1  ;;  %v2683_v43 = vsel %vm2416_vm7, 1.0, %v4543_v55 }
 0x8fc   :  { %2419 = vst.msk [vmem:[#allocation6 + $0x18] sm:$0xff] %vm89_vm0, %v2683_v43  ;;  %v2421_v8 = vadd.f32 %v2420_v1, %v2374_v57 }
 0x8fd   :  { %v2455_v19 = vld [vmem:[#allocation6 + $0x10] sm:$0xff] }
 0x8fe   :  { %v2422_v50 = vsub.f32 %v2421_v8, %v2683_v43  ;;  %v2456_v32 = vadd.f32 %v2455_v19, %v4402_v2 }
 0x900   :  { %vm2423_vm8 = vcmp.gt.f32.partialorder %v2422_v50, 1.0  ;;  %v2427_v27 = vmul.f32 0.9, %v2422_v50  ;;  %v2473_v5 = vadd.f32 %v2472_v38, %v2456_v32  ;;  %v2543_v38 = vstv %s4492_s7 }
 0x901   :  { %v2684_v21 = vsel %vm2423_vm8, 1.0, %v4543_v55 }
 0x902   :  { %2426 = vst.msk [vmem:[#allocation6 + $0x20] sm:$0xff] %vm89_vm0, %v2684_v21  ;;  %v2428_v17 = vadd.f32 %v2799_v34, %v2427_v27 }
 0x903   :  { %v2458_v11 = vld [vmem:[#allocation6 + $0x18] sm:$0xff] }
 0x904   :  { %v2429_v0 = vsub.f32 %v2428_v17, %v2684_v21  ;;  %v2459_v30 = vadd.f32 %v2458_v11, %v4406_v62  ;;  %v2522_v21 = vstv %s2690_s4  ;;  %v2525_v17 = vstv %s2691_s19 }
 0x905   :  { %v2802_v24 = vpop.f32.mrf.mxu1 }
 0x906   :  { %vm2430_vm10 = vcmp.gt.f32.partialorder %v2429_v0, 1.0  ;;  %v2434_v37 = vmul.f32 0.9, %v2429_v0  ;;  %v2474_v26 = vadd.f32 %v2473_v5, %v2459_v30  ;;  %v2515_v0 = vstv %s2688_s20 }
 0x907   :  { %v2384_v12 = vpop.f32.mrf.mxu1  ;;  %v2685_v42 = vsel %vm2430_vm10, 1.0, %v4543_v55 }
 0x908   :  { %2433 = vst.msk [vmem:[#allocation6 + $0x28] sm:$0xff] %vm89_vm0, %v2685_v42  ;;  %v2435_v22 = vadd.f32 %v2434_v37, %v2384_v12 }
 0x909   :  { %v2461_v41 = vld [vmem:[#allocation6 + $0x20] sm:$0xff] }
 0x90a   :  { %v2436_v54 = vsub.f32 %v2435_v22, %v2685_v42  ;;  %v2462_v9 = vadd.f32 %v2461_v41, %v4410_v47  ;;  %v2518_v22 = vstv %s2689_s21  ;;  %v2532_v41 = vstv %s4488_s24 }
 0x90c   :  { %vm2437_vm11 = vcmp.gt.f32.partialorder %v2436_v54, 1.0  ;;  %v2441_v63 = vmul.f32 0.9, %v2436_v54  ;;  %v2475_v2 = vadd.f32 %v2474_v26, %v2462_v9  ;;  %v2536_v54 = vstv %s2694_s22 }
 0x90d   :  { %v2686_v23 = vsel %vm2437_vm11, 1.0, %v4543_v55  ;;  %v2546_v26 = vstv %s4496_s26 }
 0x90e   :  { %2440 = vst.msk [vmem:[#allocation6 + $0x30] sm:$0xff] %vm89_vm0, %v2686_v23  ;;  %v2442_v46 = vadd.f32 %v2802_v24, %v2441_v63 }
 0x90f   :  { %v2464_v44 = vld [vmem:[#allocation6 + $0x28] sm:$0xff] }
 0x910   :  { %v2443_v20 = vsub.f32 %v2442_v46, %v2686_v23  ;;  %v2465_v52 = vadd.f32 %v2464_v44, %v4414_v35 }
 0x912   :  { %vm2444_vm12 = vcmp.gt.f32.partialorder %v2443_v20, 1.0  ;;  %v2476_v49 = vadd.f32 %v2475_v2, %v2465_v52 }
 0x913   :  { %v2687_v33 = vsel %vm2444_vm12, 1.0, %v4543_v55 }
 0x914   :  { %2447 = vst.msk [vmem:[#allocation6 + $0x38] sm:$0xff] %vm89_vm0, %v2687_v33 }
 0x915   :  { %v2467_v51 = vld [vmem:[#allocation6 + $0x30] sm:$0xff] }
 0x916   :  { %v2468_v58 = vadd.f32 %v2467_v51, %v4418_v10 }
 0x918   :  { %v2477_v29 = vadd.f32 %v2476_v49, %v2468_v58 }
 0x91b   :  { %v2470_v25 = vld [vmem:[#allocation6 + $0x38] sm:$0xff] }
 0x91c   :  { %v2471_v62 = vadd.f32 %v2470_v25, %v4422_v28 }
 0x91e   :  { %v2478_v45 = vadd.f32 %v2477_v29, %v2471_v62 }
 0x920   :  { %v2479_v55 = vmul.f32 0.125, %v2478_v45  ;;  %v2508_v45 = vstv %s2507_s12 }
 0x922   :  { %v2480_v18 = vsub.f32 %v2450_v40, %v2479_v55  ;;  %v2481_v36 = vsub.f32 %v2453_v16, %v2479_v55  ;;  %v2482_v59 = vsub.f32 %v2456_v32, %v2479_v55  ;;  %v2483_v6 = vsub.f32 %v2459_v30, %v2479_v55 }
 0x923   :  { %v2484_v31 = vsub.f32 %v2462_v9, %v2479_v55  ;;  %v2485_v61 = vsub.f32 %v2465_v52, %v2479_v55  ;;  %v2486_v48 = vsub.f32 %v2468_v58, %v2479_v55  ;;  %v2487_v7 = vsub.f32 %v2471_v62, %v2479_v55 }
 0x924   :  { %v2488_v47 = vmul.f32 %v2480_v18, %v2480_v18  ;;  %v2489_v60 = vmul.f32 %v2481_v36, %v2481_v36  ;;  %v2491_v35 = vmul.f32 %v2482_v59, %v2482_v59  ;;  %v2493_v10 = vmul.f32 %v2483_v6, %v2483_v6 }
 0x925   :  { %v2495_v15 = vmul.f32 %v2484_v31, %v2484_v31  ;;  %v2497_v39 = vmul.f32 %v2485_v61, %v2485_v61  ;;  %v2499_v34 = vmul.f32 %v2486_v48, %v2486_v48  ;;  %v2501_v57 = vmul.f32 %v2487_v7, %v2487_v7 }
 0x926   :  { %v2490_v4 = vadd.f32 %v2489_v60, %v2488_v47  ;;  %v2539_v32 = vstv %s4486_s0  ;;  %v2550_v30 = vstv %s4490_s25  ;;  %v2553_v52 = vstv %s4494_s8 }
 0x927   :  { %v2557_v58 = vstv %s4498_s27  ;;  %v2560_v62 = vstv %s2701_s28 }
 0x928   :  { %v2492_v14 = vadd.f32 %v2491_v35, %v2490_v4 }
 0x92a   :  { %v2494_v53 = vadd.f32 %v2493_v10, %v2492_v14 }
 0x92c   :  { %v2496_v28 = vadd.f32 %v2495_v15, %v2494_v53 }
 0x92e   :  { %v2498_v13 = vadd.f32 %v2497_v39, %v2496_v28 }
 0x930   :  { %v2500_v1 = vadd.f32 %v2499_v34, %v2498_v13 }
 0x932   :  { %v2502_v43 = vadd.f32 %v2501_v57, %v2500_v1 }
 0x934   :  { %v2503_v8 = vmul.f32 0.125, %v2502_v43 }
 0x936   :  { %v2504_v50 = vadd.f32 1e-05, %v2503_v8 }
 0x938   :  { %2862 = vrsqrt.f32 %v2504_v50 }
 0x945   :  { %v2863_v27 = vpop.eup %2862 }
 0x946   :  { %v2520_v24 = vmul.f32 %v2863_v27, %v2482_v59  ;;  %v2513_v37 = vmul.f32 %v2863_v27, %v2481_v36  ;;  %v2534_v12 = vmul.f32 %v2863_v27, %v2484_v31  ;;  %v2527_v42 = vmul.f32 %v2863_v27, %v2483_v6 }
 0x947   :  { %v2506_v63 = vmul.f32 %v2863_v27, %v2480_v18  ;;  %v2548_v19 = vmul.f32 %v2863_v27, %v2486_v48  ;;  %v2541_v46 = vmul.f32 %v2863_v27, %v2485_v61  ;;  %v2555_v33 = vmul.f32 %v2863_v27, %v2487_v7 }
 0x948   :  { %v2523_v23 = vmul.f32 %v2522_v21, %v2520_v24  ;;  %v2516_v56 = vmul.f32 %v2515_v0, %v2513_v37  ;;  %v2537_v20 = vmul.f32 %v2536_v54, %v2534_v12  ;;  %v2530_v40 = vmul.f32 %v2529_v3, %v2527_v42 }
 0x949   :  { %v2551_v5 = vmul.f32 %v2550_v30, %v2548_v19  ;;  %v2544_v51 = vmul.f32 %v2543_v38, %v2541_v46  ;;  %v2558_v25 = vmul.f32 %v2557_v58, %v2555_v33  ;;  %v2509_v55 = vmul.f32 %v2508_v45, %v2506_v63 }
 0x94a   :  { %v2526_v16 = vadd.f32 %v2525_v17, %v2523_v23  ;;  %v2519_v11 = vadd.f32 %v2518_v22, %v2516_v56  ;;  %v2540_v44 = vadd.f32 %v2539_v32, %v2537_v20  ;;  %v2533_v9 = vadd.f32 %v2532_v41, %v2530_v40 }
 0x94b   :  { %v2554_v2 = vadd.f32 %v2553_v52, %v2551_v5  ;;  %v2547_v49 = vadd.f32 %v2546_v26, %v2544_v51  ;;  %v2561_v29 = vadd.f32 %v2560_v62, %v2558_v25  ;;  %v2511_v18 = vstv %s2510_s13 }
 0x94c   :  { %2567 = vrot.lane.b32.xlu1 %v2526_v16, %s2948_s29  ;;  %2563 = vrot.lane.b32.xlu0 %v2519_v11, %s2949_s2  ;;  %v2512_v36 = vadd.f32 %v2511_v18, %v2509_v55 }
 0x950   :  { %2575 = vrot.lane.b32.xlu1 %v2540_v44, %s2950_s30  ;;  %2571 = vrot.lane.b32.xlu0 %v2533_v9, %s2951_s10 }
 0x954   :  { %2583 = vrot.lane.b32.xlu1 %v2554_v2, %s2952_s11  ;;  %2579 = vrot.lane.b32.xlu0 %v2547_v49, %s2953_s3 }
 0x958   :  { %2587 = vrot.lane.b32.xlu0 %v2561_v29, %s2954_s1 }
 0x9be   :  { %v2568_v59 = vpop.permute.xlu1 %2567  ;;  %v2564_v6 = vpop.permute.xlu0 %2563 }
 0x9bf   :  { %v2590_v47 = vsel %vm89_vm0, %v2512_v36, %v2564_v6 }
 0x9c0   :  { %v2592_v4 = vsel %vm2591_vm13, %v2590_v47, %v2568_v59 }
 0x9c2   :  { %v2576_v60 = vpop.permute.xlu1 %2575  ;;  %v2572_v31 = vpop.permute.xlu0 %2571 }
 0x9c3   :  { %v2593_v35 = vsel %vm227_vm1, %v2592_v4, %v2572_v31 }
 0x9c4   :  { %v2594_v14 = vsel %vm2201_vm9, %v2593_v35, %v2576_v60 }
 0x9c6   :  { %v2580_v61 = vpop.permute.xlu0 %2579  ;;  %v2584_v10 = vpop.permute.xlu1 %2583 }
 0x9c7   :  { %v2596_v48 = vsel %vm2595_vm14, %v2594_v14, %v2580_v61 }
 0x9c8   :  { %v2598_v15 = vsel %vm2597_vm15, %v2596_v48, %v2584_v10 }
 0x9ca   :  { %v2588_v53 = vpop.permute.xlu0 %2587 }
 0x9cb   :  { %v2600_v7 = vsel %vm2599_vm2, %v2598_v15, %v2588_v53 }
 0x9cc   :  { %2602 = vst.msk [vmem:[%s4522_s9] sm:$0xff] %vm2601_vm3, %v2600_v7 }
 0x9cd   :  { %2607 = vsyncpa [#allocation8], 1 }
 0x9ce   :  { %2608 = vsyncpa [#allocation10], 1 }
 0x9cf   :  { %2609 = vsyncpa [#allocation13], 1 }

</bundles_post_ra>
